<compile_context>
chip_gen: v7x
topology: tpu7x:2x2x1
jax: 0.10.0
libtpu: 0.0.40
codegen_flags: <defaults>
</compile_context>

<pallas_src>
import functools

import jax
import jax.numpy as jnp
from jax import lax
from jax.experimental import pallas as pl
from jax.experimental.pallas import tpu as pltpu


def _round_up(x, m):
    return (x + m - 1) // m * m


def _cdiv(a, b):
    return -(-a // b)


@functools.lru_cache(maxsize=1)
def _vmem_limit_bytes():
    """Chip-legal VMEM limit: 3/4 of physical capacity, capped at 96 MiB.

    v7x has 64 MiB per TensorCore (-> 48 MiB), v5e/v6e have 128 MiB (-> 96 MiB).
    Falls back to the tightest generation if the query is unavailable.
    """
    try:
        cap = int(pltpu.get_tpu_info().vmem_capacity_bytes)
    except Exception:
        cap = 64 * 1024 * 1024
    return min(cap * 3 // 4, 96 * 1024 * 1024)


# ----------------------------- Pallas kernels ------------------------------

def _linear_kernel(x_ref, w_ref, b_ref, o_ref, *, relu):
    # y = x @ w + b (optionally ReLU), one M-tile per grid step.
    # bf16 x bf16 operands, f32 accumulate, bias added in f32, bf16 store.
    y = jnp.dot(x_ref[...], w_ref[...], preferred_element_type=jnp.float32)
    y = y + b_ref[...]
    if relu:
        y = jnp.maximum(y, 0.0)
    o_ref[...] = y.astype(o_ref.dtype)


def linear(x, w, b, *, relu, out_dtype=jnp.bfloat16, tm_max=256, min_tiles=2):
    """Pallas matmul + bias (+ReLU), tiled over M with a 'parallel' grid axis.

    tm is derived from M (no over-padding); min_tiles=2 keeps both v7x
    TensorCores busy on small layers.
    """
    M, K = x.shape
    Kw, N = w.shape
    assert K == Kw
    Kp, Np = _round_up(K, 128), _round_up(N, 128)
    Mp = _round_up(M, 8)
    n_tiles = max(min_tiles, _cdiv(Mp, tm_max))
    tm = _round_up(_cdiv(Mp, n_tiles), 8)
    Mp = tm * n_tiles
    xp = jnp.pad(x, ((0, Mp - M), (0, Kp - K))).astype(jnp.bfloat16)
    wp = jnp.pad(w, ((0, Kp - K), (0, Np - N))).astype(jnp.bfloat16)
    bp = jnp.pad(b.reshape(1, N), ((0, 0), (0, Np - N))).astype(jnp.float32)
    out = pl.pallas_call(
        functools.partial(_linear_kernel, relu=relu),
        out_shape=jax.ShapeDtypeStruct((Mp, Np), out_dtype),
        grid=(n_tiles,),
        in_specs=[pl.BlockSpec((tm, Kp), lambda i: (i, 0)),   # activations: M-tiled
                  pl.BlockSpec((Kp, Np), lambda i: (0, 0)),   # weights: resident
                  pl.BlockSpec((1, Np), lambda i: (0, 0))],   # bias: resident
        out_specs=pl.BlockSpec((tm, Np), lambda i: (i, 0)),
        compiler_params=pltpu.CompilerParams(
            dimension_semantics=("parallel",),
            vmem_limit_bytes=_vmem_limit_bytes()),
        cost_estimate=pl.CostEstimate(
            flops=2 * Mp * Kp * Np,
            transcendentals=0,
            bytes_accessed=2 * (Mp * Kp + Kp * Np)
            + Mp * Np * jnp.dtype(out_dtype).itemsize),
    )(xp, wp, bp)
    return out[:M, :N]


def _streams_kernel(feat_ref, w1_ref, b1_ref, w2_ref, b2_ref,
                    v_ref, a_ref, q_ref, h_acc,
                    *, batch, action_dim, val_col):
    # Grid axis 0 = K chunks of the fused FC1 (value|advantage) reduction; the
    # FC1 weight stream is double-buffered against the FC1 matmul.
    k = pl.program_id(0)

    @pl.when(k == 0)
    def _():
        h_acc[...] = jnp.zeros_like(h_acc)

    h_acc[...] += jnp.dot(feat_ref[...], w1_ref[...],
                          preferred_element_type=jnp.float32)

    @pl.when(k == pl.num_programs(0) - 1)
    def _():
        # h = relu(feat @ [wv1|wa1] + [bv1|ba1]); both heads are ONE 128-wide
        # MXU pass: advantage in cols [0, action_dim), value in col val_col.
        h = jnp.maximum(h_acc[...] + b1_ref[...], 0.0)
        va = jnp.dot(h.astype(w2_ref.dtype), w2_ref[...],
                     preferred_element_type=jnp.float32) + b2_ref[...]
        value = va[:, val_col:val_col + 1]
        Bp, N2 = va.shape
        rows = lax.broadcasted_iota(jnp.int32, (Bp, N2), 0)
        cols = lax.broadcasted_iota(jnp.int32, (Bp, N2), 1)
        valid = (rows < batch) & (cols < action_dim)
        # PyTorch semantics: advantage.sum() is a GLOBAL sum over batch AND actions.
        adv_sum = jnp.sum(jnp.where(valid, va, 0.0))
        q = value + (va - adv_sum * (1.0 / action_dim))
        v_ref[...] = value
        a_ref[...] = va
        q_ref[...] = q


def streams_heads(feat, w1, b1, w2, b2, action_dim, *, tk=640):
    """Fused FC1(value|adv) + both heads + duelling combine, K-pipelined."""
    B, K = feat.shape
    Kp, N1 = w1.shape                 # FC1 weight already K-padded at prep time
    N2 = w2.shape[1]
    assert action_dim < N2
    val_col = N2 - 1                  # value lives in the last padding lane
    Bp = _round_up(B, 8)
    featp = jnp.pad(feat, ((0, Bp - B), (0, Kp - K))).astype(jnp.bfloat16)
    if Kp % tk != 0:
        tk = Kp                       # fall back to a single chunk
    nk = Kp // tk
    v, a, q = pl.pallas_call(
        functools.partial(_streams_kernel, batch=B, action_dim=action_dim,
                          val_col=val_col),
        out_shape=(jax.ShapeDtypeStruct((Bp, 1), jnp.float32),
                   jax.ShapeDtypeStruct((Bp, N2), jnp.float32),
                   jax.ShapeDtypeStruct((Bp, N2), jnp.float32)),
        grid=(nk,),
        in_specs=[pl.BlockSpec((Bp, tk), lambda k: (0, k)),   # activations: K-tiled
                  pl.BlockSpec((tk, N1), lambda k: (k, 0)),   # FC1 weight: K-tiled
                  pl.BlockSpec((1, N1), lambda k: (0, 0)),    # FC1 bias: resident
                  pl.BlockSpec((N1, N2), lambda k: (0, 0)),   # packed heads: resident
                  pl.BlockSpec((1, N2), lambda k: (0, 0))],   # head bias: resident
        out_specs=(pl.BlockSpec((Bp, 1), lambda k: (0, 0)),
                   pl.BlockSpec((Bp, N2), lambda k: (0, 0)),
                   pl.BlockSpec((Bp, N2), lambda k: (0, 0))),
        scratch_shapes=[pltpu.VMEM((Bp, N1), jnp.float32)],   # f32 FC1 accumulator
        compiler_params=pltpu.CompilerParams(
            dimension_semantics=("arbitrary",),
            vmem_limit_bytes=_vmem_limit_bytes()),
        cost_estimate=pl.CostEstimate(
            flops=2 * Bp * Kp * N1 + 2 * Bp * N1 * N2,
            transcendentals=0,
            bytes_accessed=2 * (Bp * Kp + Kp * N1 + N1 * N2)
            + 4 * Bp * (1 + 2 * N2)),
    )(featp, w1, b1, w2, b2)
    return v[:B, :1], a[:B, :action_dim], q[:B, :action_dim]


# ------------------------- parameter repacking ------------------------------

def prepare_params(p, action_dim):
    """One-time weight repacking (done outside the forward pass).

    * conv weights -> (IC*KH*KW, OC) bf16 matmul matrices matching the patch
      feature ordering of lax.conv_general_dilated_patches,
    * FC1 rows permuted from torch's CHW flatten order to the HWC order of the
      NHWC conv pipeline, value/advantage streams fused side by side, bf16,
    * both head matrices packed into ONE 128-lane block (advantage in cols
      [0, action_dim), value in the last padding lane), bf16.
    """
    def conv_mat(w):                       # (OC, IC, KH, KW) -> (IC*KH*KW, OC)
        return w.reshape(w.shape[0], -1).T.astype(jnp.bfloat16)

    def chw_to_hwc_rows(w):                # rows c*49+h*7+w  ->  rows (h*7+w)*64+c
        return w.reshape(64, 7, 7, -1).transpose(1, 2, 0, 3).reshape(64 * 7 * 7, -1)

    K1 = 64 * 7 * 7
    Kp = _round_up(K1, 128)                                        # 3200 = 5 * 640
    w1 = jnp.concatenate([chw_to_hwc_rows(p['wv1']),
                          chw_to_hwc_rows(p['wa1'])], axis=1)      # (3136, 1024)
    w1 = jnp.pad(w1, ((0, Kp - K1), (0, 0))).astype(jnp.bfloat16)  # (3200, 1024)
    b1 = jnp.concatenate([p['bv1'], p['ba1']]).reshape(1, -1).astype(jnp.float32)

    Ap = _round_up(action_dim, 128)
    N2 = Ap if Ap > action_dim else Ap + 128   # guarantee a free lane for value
    val_col = N2 - 1
    w2 = jnp.zeros((1024, N2), jnp.float32)
    w2 = w2.at[:512, val_col].set(p['wv2'][:, 0])          # value head
    w2 = w2.at[512:, :action_dim].set(p['wa2'])            # advantage head
    b2 = jnp.zeros((1, N2), jnp.float32)
    b2 = b2.at[0, val_col].set(p['bv2'][0])
    b2 = b2.at[0, :action_dim].set(p['ba2'])

    return {
        'cw1': conv_mat(p['w1']), 'cb1': p['b1'].astype(jnp.float32),
        'cw2': conv_mat(p['w2']), 'cb2': p['b2'].astype(jnp.float32),
        'cw3': conv_mat(p['w3']), 'cb3': p['b3'].astype(jnp.float32),
        'w1': w1, 'b1': b1,
        'w2': w2.astype(jnp.bfloat16), 'b2': b2,
    }


# ------------------------------ full forward -------------------------------

def duelling_dqn_forward(x_nchw, pp, action_dim):
    B = x_nchw.shape[0]
    x = x_nchw.astype(jnp.bfloat16)

    # Each conv = one fused XLA patch-extraction op (NHWC patches, feature order
    # matching the (OC, IC, KH, KW) weight flatten) + one tiled Pallas
    # matmul-bias-ReLU on the MXU, all in bf16 with f32 accumulation.
    p1 = lax.conv_general_dilated_patches(
        x, (8, 8), (4, 4), 'VALID',
        dimension_numbers=('NCHW', 'OIHW', 'NHWC'))                 # (B,20,20,C*64)
    y1 = linear(p1.reshape(B * 20 * 20, p1.shape[3]), pp['cw1'], pp['cb1'], relu=True)
    a1 = y1.reshape(B, 20, 20, 64)

    p2 = lax.conv_general_dilated_patches(
        a1, (4, 4), (2, 2), 'VALID',
        dimension_numbers=('NHWC', 'HWIO', 'NHWC'))                 # (B,9,9,1024)
    y2 = linear(p2.reshape(B * 9 * 9, p2.shape[3]), pp['cw2'], pp['cb2'], relu=True)
    a2 = y2.reshape(B, 9, 9, 64)

    p3 = lax.conv_general_dilated_patches(
        a2, (3, 3), (1, 1), 'VALID',
        dimension_numbers=('NHWC', 'HWIO', 'NHWC'))                 # (B,7,7,576)
    y3 = linear(p3.reshape(B * 7 * 7, p3.shape[3]), pp['cw3'], pp['cb3'], relu=True)

    # HWC flatten; FC1 rows were permuted at prep time so no runtime transpose.
    feat = y3.reshape(B, 7 * 7 * 64)
    return streams_heads(feat, pp['w1'], pp['b1'], pp['w2'], pp['b2'], action_dim)


# -------------------------- params & pure-JAX ref ---------------------------

def init_params(key, in_channels, action_dim):
    ks = jax.random.split(key, 14)
    w = lambda k, shape, s: s * jax.random.normal(k, shape, jnp.float32)
    return {
        'w1': w(ks[0], (64, in_channels, 8, 8), 0.05), 'b1': w(ks[1], (64,), 0.05),
        'w2': w(ks[2], (64, 64, 4, 4), 0.05),          'b2': w(ks[3], (64,), 0.05),
        'w3': w(ks[4], (64, 64, 3, 3), 0.05),          'b3': w(ks[5], (64,), 0.05),
        'wv1': w(ks[6], (64 * 7 * 7, 512), 0.02),      'bv1': w(ks[7], (512,), 0.02),
        'wa1': w(ks[8], (64 * 7 * 7, 512), 0.02),      'ba1': w(ks[9], (512,), 0.02),
        'wv2': w(ks[10], (512, 1), 0.02),              'bv2': w(ks[11], (1,), 0.02),
        'wa2': w(ks[12], (512, action_dim), 0.02),     'ba2': w(ks[13], (action_dim,), 0.02),
    }


def reference_forward(x_nchw, p, action_dim):
    hi = lax.Precision.HIGHEST

    def conv(x, w, b, stride):
        y = lax.conv_general_dilated(x, w, (stride, stride), 'VALID',
                                     dimension_numbers=('NCHW', 'OIHW', 'NCHW'),
                                     precision=hi)
        return jnp.maximum(y + b[None, :, None, None], 0.0)

    x = conv(x_nchw, p['w1'], p['b1'], 4)
    x = conv(x, p['w2'], p['b2'], 2)
    x = conv(x, p['w3'], p['b3'], 1)
    feat = x.reshape(x.shape[0], -1)
    hv = jnp.maximum(jnp.dot(feat, p['wv1'], precision=hi) + p['bv1'], 0.0)
    ha = jnp.maximum(jnp.dot(feat, p['wa1'], precision=hi) + p['ba1'], 0.0)
    value = jnp.dot(hv, p['wv2'], precision=hi) + p['bv2']
    adv = jnp.dot(ha, p['wa2'], precision=hi) + p['ba2']
    q = value + (adv - adv.sum() / action_dim)
    return value, adv, q


if __name__ == "__main__":
    # forward implies 84x84 spatial input (flatten to 64*7*7); keep B/C small.
    B, C, H, W = 2, 4, 84, 84
    action_dim = 6
    kx, kp = jax.random.split(jax.random.PRNGKey(0))
    x = jax.random.normal(kx, (B, C, H, W), jnp.float32)
    params = init_params(kp, C, action_dim)
    prepped = prepare_params(params, action_dim)

    fwd = jax.jit(duelling_dqn_forward, static_argnames=('action_dim',))
    value, advantage, action_value = jax.block_until_ready(
        fwd(x, prepped, action_dim=action_dim))

    assert value.shape == (B, 1)
    assert advantage.shape == (B, action_dim)
    assert action_value.shape == (B, action_dim)

    v_ref, a_ref, q_ref = reference_forward(x, params, action_dim)
    # bf16 weights/activations with f32 accumulation vs. an f32 HIGHEST reference.
    tol = dict(rtol=2e-2, atol=2e-2)
    ok = (jnp.allclose(value, v_ref, **tol)
          and jnp.allclose(advantage, a_ref, **tol)
          and jnp.allclose(action_value, q_ref, **tol))
    assert bool(ok), "Pallas output mismatch vs pure-JAX reference"
    print("KERNEL_OK")
</pallas_src>

<mosaic_0001>
module attributes {stable_mosaic.version = 11 : i64} {
  func.func @_linear_kernel(%arg0: i32, %arg1: memref<200x256xbf16, #tpu.memory_space<vmem>>, %arg2: memref<256x128xbf16, #tpu.memory_space<vmem>>, %arg3: memref<1x128xf32, #tpu.memory_space<vmem>>, %arg4: memref<200x128xbf16, #tpu.memory_space<vmem>>) attributes {dimension_semantics = [#tpu.dimension_semantics<parallel>], iteration_bounds = array<i64: 4>, scalar_prefetch = 0 : i64, scratch_operands = 0 : i64, tpu.core_type = #tpu.core_type<tc>, window_params = [{transform_indices = @transform_0, window_bounds = array<i64: 200, 256>}, {pipeline_mode = #tpu.pipeline_mode<synchronous>, transform_indices = @transform_1, window_bounds = array<i64: 256, 128>}, {pipeline_mode = #tpu.pipeline_mode<synchronous>, transform_indices = @transform_2, window_bounds = array<i64: 1, 128>}, {transform_indices = @transform_3, window_bounds = array<i64: 200, 128>}]} {
    %c0 = arith.constant 0 : index
    %c0_0 = arith.constant 0 : index
    %0 = vector.load %arg1[%c0, %c0_0] : memref<200x256xbf16, #tpu.memory_space<vmem>>, vector<200x256xbf16>
    %c0_1 = arith.constant 0 : index
    %c0_2 = arith.constant 0 : index
    %1 = vector.load %arg2[%c0_1, %c0_2] : memref<256x128xbf16, #tpu.memory_space<vmem>>, vector<256x128xbf16>
    %cst = arith.constant dense<0.000000e+00> : vector<200x128xf32>
    %2 = tpu.matmul %0, %1, %cst {dimension_numbers = #tpu.dot_dimension_numbers<[1], [0], [0], [1], [0, 0, 1, 1], [], []>} : vector<200x256xbf16>, vector<256x128xbf16>, vector<200x128xf32> -> vector<200x128xf32>
    %c0_3 = arith.constant 0 : index
    %c0_4 = arith.constant 0 : index
    %3 = vector.load %arg3[%c0_3, %c0_4] : memref<1x128xf32, #tpu.memory_space<vmem>>, vector<1x128xf32>
    %4 = vector.broadcast %3 : vector<1x128xf32> to vector<200x128xf32>
    %5 = arith.addf %2, %4 : vector<200x128xf32>
    %cst_5 = arith.constant 0.000000e+00 : f32
    %6 = vector.broadcast %cst_5 : f32 to vector<200x128xf32>
    %7 = arith.maximumf %5, %6 : vector<200x128xf32>
    %8 = arith.truncf %7 : vector<200x128xf32> to vector<200x128xbf16>
    %c0_6 = arith.constant 0 : index
    %c0_7 = arith.constant 0 : index
    %9 = vector.load %arg4[%c0_6, %c0_7] : memref<200x128xbf16, #tpu.memory_space<vmem>>, vector<200x128xbf16>
    tpu.vector_store %arg4[%c0_6, %c0_7], %8 {strides = array<i32>} : memref<200x128xbf16, #tpu.memory_space<vmem>>, vector<200x128xbf16>,
    return
  }
  func.func @transform_0(%arg0: i32) -> (i32, i32) {
    %c0_i32 = arith.constant 0 : i32
    %c0_i32_0 = arith.constant 0 : i32
    return %arg0, %c0_i32 : i32, i32
  }
  func.func @transform_1(%arg0: i32) -> (i32, i32) {
    %c0_i32 = arith.constant 0 : i32
    %c0_i32_0 = arith.constant 0 : i32
    %c0_i32_1 = arith.constant 0 : i32
    return %c0_i32, %c0_i32_0 : i32, i32
  }
  func.func @transform_2(%arg0: i32) -> (i32, i32) {
    %c0_i32 = arith.constant 0 : i32
    %c0_i32_0 = arith.constant 0 : i32
    %c0_i32_1 = arith.constant 0 : i32
    return %c0_i32, %c0_i32_0 : i32, i32
  }
  func.func @transform_3(%arg0: i32) -> (i32, i32) {
    %c0_i32 = arith.constant 0 : i32
    %c0_i32_0 = arith.constant 0 : i32
    return %arg0, %c0_i32 : i32, i32
  }
}

module attributes {stable_mosaic.version = 11 : i64} {
  func.func @_linear_kernel(%arg0: i32, %arg1: memref<88x1024xbf16, #tpu.memory_space<vmem>>, %arg2: memref<1024x128xbf16, #tpu.memory_space<vmem>>, %arg3: memref<1x128xf32, #tpu.memory_space<vmem>>, %arg4: memref<88x128xbf16, #tpu.memory_space<vmem>>) attributes {dimension_semantics = [#tpu.dimension_semantics<parallel>], iteration_bounds = array<i64: 2>, scalar_prefetch = 0 : i64, scratch_operands = 0 : i64, tpu.core_type = #tpu.core_type<tc>, window_params = [{transform_indices = @transform_0, window_bounds = array<i64: 88, 1024>}, {pipeline_mode = #tpu.pipeline_mode<synchronous>, transform_indices = @transform_1, window_bounds = array<i64: 1024, 128>}, {pipeline_mode = #tpu.pipeline_mode<synchronous>, transform_indices = @transform_2, window_bounds = array<i64: 1, 128>}, {transform_indices = @transform_3, window_bounds = array<i64: 88, 128>}]} {
    %c0 = arith.constant 0 : index
    %c0_0 = arith.constant 0 : index
    %0 = vector.load %arg1[%c0, %c0_0] : memref<88x1024xbf16, #tpu.memory_space<vmem>>, vector<88x1024xbf16>
    %c0_1 = arith.constant 0 : index
    %c0_2 = arith.constant 0 : index
    %1 = vector.load %arg2[%c0_1, %c0_2] : memref<1024x128xbf16, #tpu.memory_space<vmem>>, vector<1024x128xbf16>
    %cst = arith.constant dense<0.000000e+00> : vector<88x128xf32>
    %2 = tpu.matmul %0, %1, %cst {dimension_numbers = #tpu.dot_dimension_numbers<[1], [0], [0], [1], [0, 0, 1, 1], [], []>} : vector<88x1024xbf16>, vector<1024x128xbf16>, vector<88x128xf32> -> vector<88x128xf32>
    %c0_3 = arith.constant 0 : index
    %c0_4 = arith.constant 0 : index
    %3 = vector.load %arg3[%c0_3, %c0_4] : memref<1x128xf32, #tpu.memory_space<vmem>>, vector<1x128xf32>
    %4 = vector.broadcast %3 : vector<1x128xf32> to vector<88x128xf32>
    %5 = arith.addf %2, %4 : vector<88x128xf32>
    %cst_5 = arith.constant 0.000000e+00 : f32
    %6 = vector.broadcast %cst_5 : f32 to vector<88x128xf32>
    %7 = arith.maximumf %5, %6 : vector<88x128xf32>
    %8 = arith.truncf %7 : vector<88x128xf32> to vector<88x128xbf16>
    %c0_6 = arith.constant 0 : index
    %c0_7 = arith.constant 0 : index
    %9 = vector.load %arg4[%c0_6, %c0_7] : memref<88x128xbf16, #tpu.memory_space<vmem>>, vector<88x128xbf16>
    tpu.vector_store %arg4[%c0_6, %c0_7], %8 {strides = array<i32>} : memref<88x128xbf16, #tpu.memory_space<vmem>>, vector<88x128xbf16>,
    return
  }
  func.func @transform_0(%arg0: i32) -> (i32, i32) {
    %c0_i32 = arith.constant 0 : i32
    %c0_i32_0 = arith.constant 0 : i32
    return %arg0, %c0_i32 : i32, i32
  }
  func.func @transform_1(%arg0: i32) -> (i32, i32) {
    %c0_i32 = arith.constant 0 : i32
    %c0_i32_0 = arith.constant 0 : i32
    %c0_i32_1 = arith.constant 0 : i32
    return %c0_i32, %c0_i32_0 : i32, i32
  }
  func.func @transform_2(%arg0: i32) -> (i32, i32) {
    %c0_i32 = arith.constant 0 : i32
    %c0_i32_0 = arith.constant 0 : i32
    %c0_i32_1 = arith.constant 0 : i32
    return %c0_i32, %c0_i32_0 : i32, i32
  }
  func.func @transform_3(%arg0: i32) -> (i32, i32) {
    %c0_i32 = arith.constant 0 : i32
    %c0_i32_0 = arith.constant 0 : i32
    return %arg0, %c0_i32 : i32, i32
  }
}

module attributes {stable_mosaic.version = 11 : i64} {
  func.func @_linear_kernel(%arg0: i32, %arg1: memref<56x640xbf16, #tpu.memory_space<vmem>>, %arg2: memref<640x128xbf16, #tpu.memory_space<vmem>>, %arg3: memref<1x128xf32, #tpu.memory_space<vmem>>, %arg4: memref<56x128xbf16, #tpu.memory_space<vmem>>) attributes {dimension_semantics = [#tpu.dimension_semantics<parallel>], iteration_bounds = array<i64: 2>, scalar_prefetch = 0 : i64, scratch_operands = 0 : i64, tpu.core_type = #tpu.core_type<tc>, window_params = [{transform_indices = @transform_0, window_bounds = array<i64: 56, 640>}, {pipeline_mode = #tpu.pipeline_mode<synchronous>, transform_indices = @transform_1, window_bounds = array<i64: 640, 128>}, {pipeline_mode = #tpu.pipeline_mode<synchronous>, transform_indices = @transform_2, window_bounds = array<i64: 1, 128>}, {transform_indices = @transform_3, window_bounds = array<i64: 56, 128>}]} {
    %c0 = arith.constant 0 : index
    %c0_0 = arith.constant 0 : index
    %0 = vector.load %arg1[%c0, %c0_0] : memref<56x640xbf16, #tpu.memory_space<vmem>>, vector<56x640xbf16>
    %c0_1 = arith.constant 0 : index
    %c0_2 = arith.constant 0 : index
    %1 = vector.load %arg2[%c0_1, %c0_2] : memref<640x128xbf16, #tpu.memory_space<vmem>>, vector<640x128xbf16>
    %cst = arith.constant dense<0.000000e+00> : vector<56x128xf32>
    %2 = tpu.matmul %0, %1, %cst {dimension_numbers = #tpu.dot_dimension_numbers<[1], [0], [0], [1], [0, 0, 1, 1], [], []>} : vector<56x640xbf16>, vector<640x128xbf16>, vector<56x128xf32> -> vector<56x128xf32>
    %c0_3 = arith.constant 0 : index
    %c0_4 = arith.constant 0 : index
    %3 = vector.load %arg3[%c0_3, %c0_4] : memref<1x128xf32, #tpu.memory_space<vmem>>, vector<1x128xf32>
    %4 = vector.broadcast %3 : vector<1x128xf32> to vector<56x128xf32>
    %5 = arith.addf %2, %4 : vector<56x128xf32>
    %cst_5 = arith.constant 0.000000e+00 : f32
    %6 = vector.broadcast %cst_5 : f32 to vector<56x128xf32>
    %7 = arith.maximumf %5, %6 : vector<56x128xf32>
    %8 = arith.truncf %7 : vector<56x128xf32> to vector<56x128xbf16>
    %c0_6 = arith.constant 0 : index
    %c0_7 = arith.constant 0 : index
    %9 = vector.load %arg4[%c0_6, %c0_7] : memref<56x128xbf16, #tpu.memory_space<vmem>>, vector<56x128xbf16>
    tpu.vector_store %arg4[%c0_6, %c0_7], %8 {strides = array<i32>} : memref<56x128xbf16, #tpu.memory_space<vmem>>, vector<56x128xbf16>,
    return
  }
  func.func @transform_0(%arg0: i32) -> (i32, i32) {
    %c0_i32 = arith.constant 0 : i32
    %c0_i32_0 = arith.constant 0 : i32
    return %arg0, %c0_i32 : i32, i32
  }
  func.func @transform_1(%arg0: i32) -> (i32, i32) {
    %c0_i32 = arith.constant 0 : i32
    %c0_i32_0 = arith.constant 0 : i32
    %c0_i32_1 = arith.constant 0 : i32
    return %c0_i32, %c0_i32_0 : i32, i32
  }
  func.func @transform_2(%arg0: i32) -> (i32, i32) {
    %c0_i32 = arith.constant 0 : i32
    %c0_i32_0 = arith.constant 0 : i32
    %c0_i32_1 = arith.constant 0 : i32
    return %c0_i32, %c0_i32_0 : i32, i32
  }
  func.func @transform_3(%arg0: i32) -> (i32, i32) {
    %c0_i32 = arith.constant 0 : i32
    %c0_i32_0 = arith.constant 0 : i32
    return %arg0, %c0_i32 : i32, i32
  }
}

module attributes {stable_mosaic.version = 11 : i64} {
  func.func @_streams_kernel(%arg0: i32, %arg1: memref<8x640xbf16, #tpu.memory_space<vmem>>, %arg2: memref<640x1024xbf16, #tpu.memory_space<vmem>>, %arg3: memref<1x1024xf32, #tpu.memory_space<vmem>>, %arg4: memref<1024x128xbf16, #tpu.memory_space<vmem>>, %arg5: memref<1x128xf32, #tpu.memory_space<vmem>>, %arg6: memref<8x1xf32, #tpu.memory_space<vmem>>, %arg7: memref<8x128xf32, #tpu.memory_space<vmem>>, %arg8: memref<8x128xf32, #tpu.memory_space<vmem>>, %arg9: memref<8x1024xf32, #tpu.memory_space<vmem>>) attributes {dimension_semantics = [#tpu.dimension_semantics<arbitrary>], iteration_bounds = array<i64: 5>, scalar_prefetch = 0 : i64, scratch_operands = 1 : i64, tpu.core_type = #tpu.core_type<tc>, window_params = [{transform_indices = @transform_0, window_bounds = array<i64: 8, 640>}, {transform_indices = @transform_1, window_bounds = array<i64: 640, 1024>}, {pipeline_mode = #tpu.pipeline_mode<synchronous>, transform_indices = @transform_2, window_bounds = array<i64: 1, 1024>}, {pipeline_mode = #tpu.pipeline_mode<synchronous>, transform_indices = @transform_3, window_bounds = array<i64: 1024, 128>}, {pipeline_mode = #tpu.pipeline_mode<synchronous>, transform_indices = @transform_4, window_bounds = array<i64: 1, 128>}, {pipeline_mode = #tpu.pipeline_mode<synchronous>, transform_indices = @transform_5, window_bounds = array<i64: 8, 1>}, {pipeline_mode = #tpu.pipeline_mode<synchronous>, transform_indices = @transform_6, window_bounds = array<i64: 8, 128>}, {pipeline_mode = #tpu.pipeline_mode<synchronous>, transform_indices = @transform_7, window_bounds = array<i64: 8, 128>}]} {
    %c0_i32 = arith.constant 0 : i32
    %0 = arith.cmpi eq, %arg0, %c0_i32 : i32
    %1 = arith.extui %0 : i1 to i32
    %c0_i32_0 = arith.constant 0 : i32
    %2 = arith.cmpi ne, %1, %c0_i32_0 : i32
    scf.if %2 {
      %cst_9 = arith.constant 0.000000e+00 : f32
      %12 = vector.broadcast %cst_9 : f32 to vector<8x1024xf32>
      %c0_10 = arith.constant 0 : index
      %c0_11 = arith.constant 0 : index
      %13 = vector.load %arg9[%c0_10, %c0_11] : memref<8x1024xf32, #tpu.memory_space<vmem>>, vector<8x1024xf32>
      tpu.vector_store %arg9[%c0_10, %c0_11], %12 {strides = array<i32>} : memref<8x1024xf32, #tpu.memory_space<vmem>>, vector<8x1024xf32>,
    } else {
    }
    %c0 = arith.constant 0 : index
    %c0_1 = arith.constant 0 : index
    %3 = vector.load %arg9[%c0, %c0_1] : memref<8x1024xf32, #tpu.memory_space<vmem>>, vector<8x1024xf32>
    %c0_2 = arith.constant 0 : index
    %c0_3 = arith.constant 0 : index
    %4 = vector.load %arg1[%c0_2, %c0_3] : memref<8x640xbf16, #tpu.memory_space<vmem>>, vector<8x640xbf16>
    %c0_4 = arith.constant 0 : index
    %c0_5 = arith.constant 0 : index
    %5 = vector.load %arg2[%c0_4, %c0_5] : memref<640x1024xbf16, #tpu.memory_space<vmem>>, vector<640x1024xbf16>
    %cst = arith.constant dense<0.000000e+00> : vector<8x1024xf32>
    %6 = tpu.matmul %4, %5, %cst {dimension_numbers = #tpu.dot_dimension_numbers<[1], [0], [0], [1], [0, 0, 1, 1], [], []>} : vector<8x640xbf16>, vector<640x1024xbf16>, vector<8x1024xf32> -> vector<8x1024xf32>
    %7 = arith.addf %3, %6 : vector<8x1024xf32>
    %c0_6 = arith.constant 0 : index
    %c0_7 = arith.constant 0 : index
    %8 = vector.load %arg9[%c0_6, %c0_7] : memref<8x1024xf32, #tpu.memory_space<vmem>>, vector<8x1024xf32>
    tpu.vector_store %arg9[%c0_6, %c0_7], %7 {strides = array<i32>} : memref<8x1024xf32, #tpu.memory_space<vmem>>, vector<8x1024xf32>,
    %c4_i32 = arith.constant 4 : i32
    %9 = arith.cmpi eq, %arg0, %c4_i32 : i32
    %10 = arith.extui %9 : i1 to i32
    %c0_i32_8 = arith.constant 0 : i32
    %11 = arith.cmpi ne, %10, %c0_i32_8 : i32
    scf.if %11 {
      %c0_9 = arith.constant 0 : index
      %c0_10 = arith.constant 0 : index
      %12 = vector.load %arg9[%c0_9, %c0_10] : memref<8x1024xf32, #tpu.memory_space<vmem>>, vector<8x1024xf32>
      %c0_11 = arith.constant 0 : index
      %c0_12 = arith.constant 0 : index
      %13 = vector.load %arg3[%c0_11, %c0_12] : memref<1x1024xf32, #tpu.memory_space<vmem>>, vector<1x1024xf32>
      %14 = vector.broadcast %13 : vector<1x1024xf32> to vector<8x1024xf32>
      %15 = arith.addf %12, %14 : vector<8x1024xf32>
      %cst_13 = arith.constant 0.000000e+00 : f32
      %16 = vector.broadcast %cst_13 : f32 to vector<8x1024xf32>
      %17 = arith.maximumf %15, %16 : vector<8x1024xf32>
      %18 = arith.truncf %17 : vector<8x1024xf32> to vector<8x1024xbf16>
      %c0_14 = arith.constant 0 : index
      %c0_15 = arith.constant 0 : index
      %19 = vector.load %arg4[%c0_14, %c0_15] : memref<1024x128xbf16, #tpu.memory_space<vmem>>, vector<1024x128xbf16>
      %cst_16 = arith.constant dense<0.000000e+00> : vector<8x128xf32>
      %20 = tpu.matmul %18, %19, %cst_16 {dimension_numbers = #tpu.dot_dimension_numbers<[1], [0], [0], [1], [0, 0, 1, 1], [], []>} : vector<8x1024xbf16>, vector<1024x128xbf16>, vector<8x128xf32> -> vector<8x128xf32>
      %c0_17 = arith.constant 0 : index
      %c0_18 = arith.constant 0 : index
      %21 = vector.load %arg5[%c0_17, %c0_18] : memref<1x128xf32, #tpu.memory_space<vmem>>, vector<1x128xf32>
      %22 = vector.broadcast %21 : vector<1x128xf32> to vector<8x128xf32>
      %23 = arith.addf %20, %22 : vector<8x128xf32>
      %24 = vector.extract_strided_slice %23 {offsets = [0, 127], sizes = [8, 1], strides = [1, 1]} : vector<8x128xf32> to vector<8x1xf32>
      %25 = tpu.iota {dimensions = array<i32: 0>} : vector<8x128xi32>
      %26 = tpu.iota {dimensions = array<i32: 1>} : vector<8x128xi32>
      %c2_i32 = arith.constant 2 : i32
      %27 = vector.broadcast %c2_i32 : i32 to vector<8x128xi32>
      %28 = arith.cmpi slt, %25, %27 : vector<8x128xi32>
      %c6_i32 = arith.constant 6 : i32
      %29 = vector.broadcast %c6_i32 : i32 to vector<8x128xi32>
      %30 = arith.cmpi slt, %26, %29 : vector<8x128xi32>
      %31 = arith.andi %28, %30 : vector<8x128xi1>
      %cst_19 = arith.constant 0.000000e+00 : f32
      %32 = vector.broadcast %cst_19 : f32 to vector<8x128xf32>
      %33 = arith.select %31, %23, %32 : vector<8x128xi1>, vector<8x128xf32>
      %34 = vector.shape_cast %33 : vector<8x128xf32> to vector<1x8x128xf32>
      %cst_20 = arith.constant dense<0.000000e+00> : vector<1xf32>
      %35 = vector.multi_reduction <add>, %34, %cst_20 [1, 2] : vector<1x8x128xf32> to vector<1xf32>
      %36 = vector.shape_cast %35 : vector<1xf32> to vector<1x1x1xf32>
      %37 = vector.extract %36[0, 0, 0] : f32 from vector<1x1x1xf32>
      %cst_21 = arith.constant 0.166666672 : f32
      %38 = arith.mulf %37, %cst_21 : f32
      %39 = vector.broadcast %38 : f32 to vector<8x128xf32>
      %40 = arith.subf %23, %39 : vector<8x128xf32>
      %41 = vector.broadcast %24 : vector<8x1xf32> to vector<8x128xf32>
      %42 = arith.addf %41, %40 : vector<8x128xf32>
      %c0_22 = arith.constant 0 : index
      %c0_23 = arith.constant 0 : index
      %43 = vector.load %arg6[%c0_22, %c0_23] : memref<8x1xf32, #tpu.memory_space<vmem>>, vector<8x1xf32>
      tpu.vector_store %arg6[%c0_22, %c0_23], %24 {strides = array<i32>} : memref<8x1xf32, #tpu.memory_space<vmem>>, vector<8x1xf32>,
      %c0_24 = arith.constant 0 : index
      %c0_25 = arith.constant 0 : index
      %44 = vector.load %arg7[%c0_24, %c0_25] : memref<8x128xf32, #tpu.memory_space<vmem>>, vector<8x128xf32>
      tpu.vector_store %arg7[%c0_24, %c0_25], %23 {strides = array<i32>} : memref<8x128xf32, #tpu.memory_space<vmem>>, vector<8x128xf32>,
      %c0_26 = arith.constant 0 : index
      %c0_27 = arith.constant 0 : index
      %45 = vector.load %arg8[%c0_26, %c0_27] : memref<8x128xf32, #tpu.memory_space<vmem>>, vector<8x128xf32>
      tpu.vector_store %arg8[%c0_26, %c0_27], %42 {strides = array<i32>} : memref<8x128xf32, #tpu.memory_space<vmem>>, vector<8x128xf32>,
    } else {
    }
    return
  }
  func.func @transform_0(%arg0: i32) -> (i32, i32) {
    %c0_i32 = arith.constant 0 : i32
    %c0_i32_0 = arith.constant 0 : i32
    return %c0_i32, %arg0 : i32, i32
  }
  func.func @transform_1(%arg0: i32) -> (i32, i32) {
    %c0_i32 = arith.constant 0 : i32
    %c0_i32_0 = arith.constant 0 : i32
    return %arg0, %c0_i32 : i32, i32
  }
  func.func @transform_2(%arg0: i32) -> (i32, i32) {
    %c0_i32 = arith.constant 0 : i32
    %c0_i32_0 = arith.constant 0 : i32
    %c0_i32_1 = arith.constant 0 : i32
    return %c0_i32, %c0_i32_0 : i32, i32
  }
  func.func @transform_3(%arg0: i32) -> (i32, i32) {
    %c0_i32 = arith.constant 0 : i32
    %c0_i32_0 = arith.constant 0 : i32
    %c0_i32_1 = arith.constant 0 : i32
    return %c0_i32, %c0_i32_0 : i32, i32
  }
  func.func @transform_4(%arg0: i32) -> (i32, i32) {
    %c0_i32 = arith.constant 0 : i32
    %c0_i32_0 = arith.constant 0 : i32
    %c0_i32_1 = arith.constant 0 : i32
    return %c0_i32, %c0_i32_0 : i32, i32
  }
  func.func @transform_5(%arg0: i32) -> (i32, i32) {
    %c0_i32 = arith.constant 0 : i32
    %c0_i32_0 = arith.constant 0 : i32
    %c0_i32_1 = arith.constant 0 : i32
    return %c0_i32, %c0_i32_0 : i32, i32
  }
  func.func @transform_6(%arg0: i32) -> (i32, i32) {
    %c0_i32 = arith.constant 0 : i32
    %c0_i32_0 = arith.constant 0 : i32
    %c0_i32_1 = arith.constant 0 : i32
    return %c0_i32, %c0_i32_0 : i32, i32
  }
  func.func @transform_7(%arg0: i32) -> (i32, i32) {
    %c0_i32 = arith.constant 0 : i32
    %c0_i32_0 = arith.constant 0 : i32
    %c0_i32_1 = arith.constant 0 : i32
    return %c0_i32, %c0_i32_0 : i32, i32
  }
}

</mosaic_0001>

<bundles_post_ra>
// kernel: duelling_dqn_forward.4
= control target key start
LH: loop header
LB: loop body
LE: loop exit
PB: predicated region body
PF: predicated region fallthrough
CT: control target
= control target key end

     0   :  { %s1183_s12 = smov 0   ;;  %s1324_s0 = inlined_call_operand.vmem [shape: bf16[800,256], index: 0, kind: input, shape index: {}]   ;;  %s1325_s1 = inlined_call_operand.vmem [shape: bf16[256,128], index: 1, kind: input, shape index: {}]   ;;  %s1326_s2 = inlined_call_operand.vmem [shape: f32[1,128], index: 2, kind: input, shape index: {}]   ;;  %s1327_s3 = inlined_call_operand.vmem [shape: bf16[800,128], index: 3, kind: output, shape index: {}]  }
   0x1 LB: > { %s808_s13 = sadd.s32 4294967295, %s1161_s12   ;;  %p812_p0 = scmp.ge.s32.totalorder %s1161_s12, 1  ;;  %s1161_s12 = sphi %s1183_s12, %s13_s12  }
   0x2   : > { %p139_p1 = scmp.lt.s32.totalorder %s1161_s12, 5 }
   0x4   : > { %p140_p2 = pnand %p812_p0, %p139_p1 }
   0x5   : > { %v1101_v0 = vld [vmem:[%s1325_s1 + $0x40] sm:$0xff] (!%p140_p2)   ;;  %s164_s16 = smul.u32 (!%p140_p2), 25, %s808_s13  ;;  %v1103_v2 = vld [vmem:[%s1325_s1 + $0x48] sm:$0xff] (!%p140_p2)   ;;  %v1105_v4 = vld [vmem:[%s1325_s1 + $0x50] sm:$0xff] (!%p140_p2)  }
   0x6   : > { %143 = sbr.rel (%p140_p2) target bundleno = 310 (0x136), region = 32  ;;  %v1102_v1 = vld [vmem:[%s1325_s1] sm:$0xff] (!%p140_p2)   ;;  %983 = vmatprep.subr.bf16.mxu0 (!%p140_p2), %v1101_v0  ;;  %1077 = vmatprep.subr.bf16.mxu1 (!%p140_p2), %v1101_v0  ;;  %v1104_v3 = vld [vmem:[%s1325_s1 + $0x8] sm:$0xff] (!%p140_p2)   ;;  %v1106_v5 = vld [vmem:[%s1325_s1 + $0x10] sm:$0xff] (!%p140_p2)  }
   0x7   : > { %984 = vmatpush3.bf16.msra.mxu0 (!%p140_p2), %v1102_v1  ;;  %1085 = vmatpush3.bf16.msra.mxu1 (!%p140_p2), %v1102_v1  ;;  %p165_p3 = scmp.lt.s32.totalorder (!%p140_p2), %s164_s16, 99  ;;  %v1107_v6 = vld [vmem:[%s1325_s1 + $0x58] sm:$0xff] (!%p140_p2)   ;;  %v1109_v8 = vld [vmem:[%s1325_s1 + $0x60] sm:$0xff] (!%p140_p2)   ;;  %v1111_v10 = vld [vmem:[%s1325_s1 + $0x68] sm:$0xff] (!%p140_p2)  }
   0x8   : > { %985 = vmatprep.subr.bf16.mxu0 (!%p140_p2), %v1103_v2  ;;  %1078 = vmatprep.subr.bf16.mxu1 (!%p140_p2), %v1103_v2  ;;  %v1108_v7 = vld [vmem:[%s1325_s1 + $0x18] sm:$0xff] (!%p140_p2)   ;;  %v1110_v9 = vld [vmem:[%s1325_s1 + $0x20] sm:$0xff] (!%p140_p2)   ;;  %v1112_v13 = vld [vmem:[%s1325_s1 + $0x28] sm:$0xff] (!%p140_p2)  }
   0x9   : > { %v1113_v14 = vld [vmem:[%s1325_s1 + $0x70] sm:$0xff] (!%p140_p2)   ;;  %v1115_v16 = vld [vmem:[%s1325_s1 + $0x78] sm:$0xff] (!%p140_p2)   ;;  %v1275_v45 = vld [vmem:[%s1326_s2] ss:$0 sm:$0xff] (!%p140_p2) }
   0xa   : > { %v1114_v15 = vld [vmem:[%s1325_s1 + $0x30] sm:$0xff] (!%p140_p2)   ;;  %v1116_v17 = vld [vmem:[%s1325_s1 + $0x38] sm:$0xff] (!%p140_p2)  }
   0xb   : > { %986 = vmatpush3.bf16.msra.mxu0 (!%p140_p2), %v1104_v3  ;;  %1086 = vmatpush3.bf16.msra.mxu1 (!%p140_p2), %v1104_v3 }
   0xc   : > { %987 = vmatprep.subr.bf16.mxu0 (!%p140_p2), %v1105_v4  ;;  %1079 = vmatprep.subr.bf16.mxu1 (!%p140_p2), %v1105_v4 }
   0xd   : > { %s1329_s16 = smov (!%p165_p3, %s164_s16), 99 }
   0xe   : > { %s886_s4 = sshll.u32 %s1329_s16, 3  ;;  %s815_s28 = sshll.u32 %s1329_s16, 2 }
   0xf   : > { %988 = vmatpush3.bf16.msra.mxu0 %v1106_v5  ;;  %1087 = vmatpush3.bf16.msra.mxu1 %v1106_v5  ;;  %s1224_s9 = scalar_lea.vmem %s1324_s0, %s886_s4  ;;  %s1285_s4 = scalar_lea.vmem %s1327_s3, %s815_s28 }
  0x10   : > { %989 = vmatprep.subr.bf16.mxu0 %v1107_v6  ;;  %1080 = vmatprep.subr.bf16.mxu1 %v1107_v6  ;;  %v1119_v11 = vld [vmem:[%s1224_s9 + $0x4] ss:$8 sps:$4 sm:$0xff]   ;;  %v1122_v12 = vld [vmem:[%s1224_s9 + $0x74] ss:$8 sps:$4 sm:$0xff]   ;;  %v1117_v18 = vld [vmem:[%s1224_s9] ss:$8 sps:$4 sm:$0xff]  }
  0x11   : > { %497 = vmatprep.mubr.bf16.mxu0 %v1119_v11  ;;  %553 = vmatprep.mubr.bf16.mxu1 %v1122_v12  ;;  %v1120_v19 = vld [vmem:[%s1224_s9 + $0x70] ss:$8 sps:$4 sm:$0xff]   ;;  %v1123_v20 = vld [vmem:[%s1224_s9 + $0x14] ss:$8 sps:$4 sm:$0xff]   ;;  %v1126_v21 = vld [vmem:[%s1224_s9 + $0x84] ss:$8 sps:$4 sm:$0xff]  }
  0x12   : > { %v1125_v22 = vld [vmem:[%s1224_s9 + $0x10] ss:$8 sps:$4 sm:$0xff]   ;;  %v1130_v23 = vld [vmem:[%s1224_s9 + $0x80] ss:$8 sps:$4 sm:$0xff]   ;;  %v1128_v24 = vld [vmem:[%s1224_s9 + $0x24] ss:$8 sps:$4 sm:$0xff]  }
  0x13   : > { %990 = vmatpush3.bf16.msra.mxu0 %v1108_v7  ;;  %1088 = vmatpush3.bf16.msra.mxu1 %v1108_v7  ;;  %v1132_v25 = vld [vmem:[%s1224_s9 + $0x94] ss:$8 sps:$4 sm:$0xff]   ;;  %v1131_v26 = vld [vmem:[%s1224_s9 + $0x20] ss:$8 sps:$4 sm:$0xff]   ;;  %v1136_v27 = vld [vmem:[%s1224_s9 + $0x90] ss:$8 sps:$4 sm:$0xff]  }
  0x14   : > { %991 = vmatprep.subr.bf16.mxu0 %v1109_v8  ;;  %1081 = vmatprep.subr.bf16.mxu1 %v1109_v8  ;;  %v1134_v28 = vld [vmem:[%s1224_s9 + $0x34] ss:$8 sps:$4 sm:$0xff]   ;;  %v1138_v29 = vld [vmem:[%s1224_s9 + $0xa4] ss:$8 sps:$4 sm:$0xff]   ;;  %v1137_v30 = vld [vmem:[%s1224_s9 + $0x30] ss:$8 sps:$4 sm:$0xff]  }
  0x15   : > { %v1142_v31 = vld [vmem:[%s1224_s9 + $0xa0] ss:$8 sps:$4 sm:$0xff]   ;;  %v1140_v32 = vld [vmem:[%s1224_s9 + $0x44] ss:$8 sps:$4 sm:$0xff]   ;;  %v1144_v33 = vld [vmem:[%s1224_s9 + $0xb4] ss:$8 sps:$4 sm:$0xff]  }
  0x16   : > { %v202_v34 = vld [vmem:[%s1224_s9 + $0xc0] sm:$0xff]  ;;  %v1148_v36 = vld [vmem:[%s1224_s9 + $0xb0] ss:$8 sps:$4 sm:$0xff]   ;;  %v1146_v37 = vld [vmem:[%s1224_s9 + $0x54] ss:$8 sps:$4 sm:$0xff]  }
  0x17   : > { %992 = vmatpush3.bf16.msra.mxu0 %v1110_v9  ;;  %1089 = vmatpush3.bf16.msra.mxu1 %v1110_v9  ;;  %v1143_v35 = vld [vmem:[%s1224_s9 + $0x40] ss:$8 sps:$4 sm:$0xff]   ;;  %v842_v38 = vcombine.high %v202_v34, %v202_v34  ;;  %v1149_v39 = vld [vmem:[%s1224_s9 + $0x50] ss:$8 sps:$4 sm:$0xff]   ;;  %v841_v40 = vcombine.low %v202_v34, %v202_v34  ;;  %v1151_v41 = vld [vmem:[%s1224_s9 + $0x64] ss:$8 sps:$4 sm:$0xff]  }
  0x18   : > { %993 = vmatprep.subr.bf16.mxu0 %v1111_v10  ;;  %1082 = vmatprep.subr.bf16.mxu1 %v1111_v10  ;;  %v1154_v42 = vld [vmem:[%s1224_s9 + $0x60] ss:$8 sps:$4 sm:$0xff]  }
  0x1b   : > { %994 = vmatpush3.bf16.msra.mxu0 %v1112_v13  ;;  %1090 = vmatpush3.bf16.msra.mxu1 %v1112_v13 }
  0x1c   : > { %995 = vmatprep.subr.bf16.mxu0 %v1113_v14  ;;  %1083 = vmatprep.subr.bf16.mxu1 %v1113_v14 }
  0x1f   : > { %996 = vmatpush3.bf16.msra.mxu0 %v1114_v15  ;;  %1091 = vmatpush3.bf16.msra.mxu1 %v1114_v15 }
  0x20   : > { %997 = vmatprep.subr.bf16.mxu0 %v1115_v16  ;;  %1084 = vmatprep.subr.bf16.mxu1 %v1115_v16 }
  0x23   : > { %998 = vmatpush3.bf16.msra.mxu0 %v1116_v17  ;;  %1092 = vmatpush3.bf16.msra.mxu1 %v1116_v17 }
  0x26   : > { %498 = vmatmul.mubr.bf16.vlgmr.msra.gmra.mrb[0].mxu0 %v1117_v18  ;;  %554 = vmatmul.mubr.bf16.vlgmr.msra.gmra.mrb[0].mxu1 %v1120_v19 }
  0x27   : > { %505 = vmatprep.mubr.bf16.mxu0 %v1123_v20  ;;  %561 = vmatprep.mubr.bf16.mxu1 %v1126_v21 }
  0x2e   : > { %506 = vmatmul.mubr.bf16.gmra.mrb[4].mxu0 %v1125_v22  ;;  %562 = vmatmul.mubr.bf16.gmra.mrb[4].mxu1 %v1130_v23 }
  0x2f   : > { %513 = vmatprep.mubr.bf16.mxu0 %v1128_v24  ;;  %569 = vmatprep.mubr.bf16.mxu1 %v1132_v25 }
  0x36   : > { %514 = vmatmul.mubr.bf16.gmra.mrb[8].mxu0 %v1131_v26  ;;  %570 = vmatmul.mubr.bf16.gmra.mrb[8].mxu1 %v1136_v27 }
  0x37   : > { %521 = vmatprep.mubr.bf16.mxu0 %v1134_v28  ;;  %577 = vmatprep.mubr.bf16.mxu1 %v1138_v29 }
  0x3e   : > { %522 = vmatmul.mubr.bf16.gmra.mrb[12].mxu0 %v1137_v30  ;;  %578 = vmatmul.mubr.bf16.gmra.mrb[12].mxu1 %v1142_v31 }
  0x3f   : > { %529 = vmatprep.mubr.bf16.mxu0 %v1140_v32  ;;  %585 = vmatprep.mubr.bf16.mxu1 %v1144_v33 }
  0x46   : > { %530 = vmatmul.mubr.bf16.gmra.mrb[16].mxu0 %v1143_v35  ;;  %586 = vmatmul.mubr.bf16.gmra.mrb[16].mxu1 %v1148_v36 }
  0x47   : > { %537 = vmatprep.mubr.bf16.mxu0 %v1146_v37  ;;  %593 = vmatprep.mubr.bf16.mxu1 %v842_v38 }
  0x4e   : > { %538 = vmatmul.mubr.bf16.gmra.mrb[20].mxu0 %v1149_v39  ;;  %594 = vmatmul.mubr.bf16.gmra.mrb[20].mxu1 %v841_v40 }
  0x4f   : > { %545 = vmatprep.mubr.bf16.mxu0 %v1151_v41 }
  0x56   : > { %546 = vmatmul.mubr.bf16.gmra.mrb[24].mxu0 %v1154_v42 }
  0xf9   : > { %v999_v43 = vpop.f32.mrb[0].mxu0  ;;  %v1041_v44 = vpop.f32.mrb[0].mxu1 }
  0xfa   : > { %v1000_v46 = vpop.f32.mrb[1].mxu0  ;;  %v1042_v47 = vpop.f32.mrb[1].mxu1 }
  0xfb   : > { %v1001_v48 = vadd.f32 %v1000_v46, %v999_v43  ;;  %v1002_v49 = vpop.f32.mrb[2].mxu0  ;;  %v1043_v50 = vadd.f32 %v1042_v47, %v1041_v44  ;;  %v1044_v51 = vpop.f32.mrb[2].mxu1 }
  0xfc   : > { %v1003_v52 = vpop.f32.mrb[3].mxu0  ;;  %v1045_v53 = vpop.f32.mrb[3].mxu1 }
  0xfd   : > { %v500_v54 = vadd.f32 %v1001_v48, %v1275_v45  ;;  %v1004_v55 = vadd.f32 %v1003_v52, %v1002_v49  ;;  %v556_v56 = vadd.f32 %v1043_v50, %v1275_v45  ;;  %v1046_v57 = vadd.f32 %v1045_v53, %v1044_v51 }
  0xff   : > { %v503_v58 = vadd.f32 %v1004_v55, %v1275_v45  ;;  %v615_v59 = vmax.f32 %v556_v56, 0.0  ;;  %v559_v60 = vadd.f32 %v1046_v57, %v1275_v45  ;;  %v601_v61 = vmax.f32 %v500_v54, 0.0 }
 0x101   : > { %v602_v62 = vmax.f32 %v503_v58, 0.0  ;;  %v1005_v63 = vpop.f32.mrb[4].mxu0  ;;  %v616_v0 = vmax.f32 %v559_v60, 0.0  ;;  %v1047_v1 = vpop.f32.mrb[4].mxu1 }
 0x102   : > { %v1006_v2 = vpop.f32.mrb[5].mxu0  ;;  %v1048_v3 = vpop.f32.mrb[5].mxu1 }
 0x103   : > { %v915_v4 = vpack.c.bf16 %v602_v62, %v601_v61  ;;  %v1007_v5 = vadd.f32 %v1006_v2, %v1005_v63  ;;  %v1008_v6 = vpop.f32.mrb[6].mxu0  ;;  %v950_v7 = vpack.c.bf16 %v616_v0, %v615_v59  ;;  %v1049_v8 = vadd.f32 %v1048_v3, %v1047_v1  ;;  %v1050_v9 = vpop.f32.mrb[6].mxu1 }
 0x104   : > { %v1009_v10 = vpop.f32.mrb[7].mxu0  ;;  %v1051_v11 = vpop.f32.mrb[7].mxu1 }
 0x105   : > { %916 = vst [vmem:[%s1285_s4] sm:$0xff] %v915_v4   ;;  %v508_v12 = vadd.f32 %v1007_v5, %v1275_v45  ;;  %978 = vst [vmem:[%s1285_s4 + $0x38] sm:$0xff] %v950_v7   ;;  %v1010_v13 = vadd.f32 %v1009_v10, %v1008_v6  ;;  %v564_v14 = vadd.f32 %v1049_v8, %v1275_v45 }
 0x106   : > { %v1052_v15 = vadd.f32 %v1051_v11, %v1050_v9 }
 0x107   : > { %v511_v16 = vadd.f32 %v1010_v13, %v1275_v45  ;;  %v617_v17 = vmax.f32 %v564_v14, 0.0  ;;  %v603_v19 = vmax.f32 %v508_v12, 0.0 }
 0x108   : > { %v567_v18 = vadd.f32 %v1052_v15, %v1275_v45 }
 0x109   : > { %v604_v20 = vmax.f32 %v511_v16, 0.0  ;;  %v1011_v21 = vpop.f32.mrb[8].mxu0  ;;  %v1053_v23 = vpop.f32.mrb[8].mxu1 }
 0x10a   : > { %v618_v22 = vmax.f32 %v567_v18, 0.0  ;;  %v1012_v24 = vpop.f32.mrb[9].mxu0  ;;  %v1054_v25 = vpop.f32.mrb[9].mxu1 }
 0x10b   : > { %v920_v26 = vpack.c.bf16 %v604_v20, %v603_v19  ;;  %v1013_v27 = vadd.f32 %v1012_v24, %v1011_v21  ;;  %v1014_v28 = vpop.f32.mrb[10].mxu0  ;;  %v1055_v30 = vadd.f32 %v1054_v25, %v1053_v23  ;;  %v1056_v31 = vpop.f32.mrb[10].mxu1 }
 0x10c   : > { %v955_v29 = vpack.c.bf16 %v618_v22, %v617_v17  ;;  %v1015_v32 = vpop.f32.mrb[11].mxu0  ;;  %v1057_v33 = vpop.f32.mrb[11].mxu1 }
 0x10d   : > { %972 = vst [vmem:[%s1285_s4 + $0x8] sm:$0xff] %v920_v26   ;;  %v516_v34 = vadd.f32 %v1013_v27, %v1275_v45  ;;  %v1016_v35 = vadd.f32 %v1015_v32, %v1014_v28  ;;  %v572_v36 = vadd.f32 %v1055_v30, %v1275_v45  ;;  %v1058_v37 = vadd.f32 %v1057_v33, %v1056_v31 }
 0x10e   : > { %979 = vst [vmem:[%s1285_s4 + $0x40] sm:$0xff] %v955_v29  }
 0x10f   : > { %v519_v38 = vadd.f32 %v1016_v35, %v1275_v45  ;;  %v619_v39 = vmax.f32 %v572_v36, 0.0  ;;  %v575_v40 = vadd.f32 %v1058_v37, %v1275_v45  ;;  %v605_v41 = vmax.f32 %v516_v34, 0.0 }
 0x111   : > { %v606_v42 = vmax.f32 %v519_v38, 0.0  ;;  %v1017_v43 = vpop.f32.mrb[12].mxu0  ;;  %v620_v44 = vmax.f32 %v575_v40, 0.0  ;;  %v1059_v46 = vpop.f32.mrb[12].mxu1 }
 0x112   : > { %v1018_v47 = vpop.f32.mrb[13].mxu0  ;;  %v1060_v48 = vpop.f32.mrb[13].mxu1 }
 0x113   : > { %v925_v49 = vpack.c.bf16 %v606_v42, %v605_v41  ;;  %v1019_v50 = vadd.f32 %v1018_v47, %v1017_v43  ;;  %v1020_v51 = vpop.f32.mrb[14].mxu0  ;;  %v960_v52 = vpack.c.bf16 %v620_v44, %v619_v39  ;;  %v1061_v53 = vadd.f32 %v1060_v48, %v1059_v46  ;;  %v1062_v54 = vpop.f32.mrb[14].mxu1 }
 0x114   : > { %v1021_v55 = vpop.f32.mrb[15].mxu0  ;;  %v1063_v56 = vpop.f32.mrb[15].mxu1 }
 0x115   : > { %973 = vst [vmem:[%s1285_s4 + $0x10] sm:$0xff] %v925_v49   ;;  %v524_v57 = vadd.f32 %v1019_v50, %v1275_v45  ;;  %980 = vst [vmem:[%s1285_s4 + $0x48] sm:$0xff] %v960_v52   ;;  %v1022_v58 = vadd.f32 %v1021_v55, %v1020_v51  ;;  %v580_v59 = vadd.f32 %v1061_v53, %v1275_v45 }
 0x116   : > { %v1064_v60 = vadd.f32 %v1063_v56, %v1062_v54 }
 0x117   : > { %v527_v61 = vadd.f32 %v1022_v58, %v1275_v45  ;;  %v621_v62 = vmax.f32 %v580_v59, 0.0  ;;  %v607_v0 = vmax.f32 %v524_v57, 0.0 }
 0x118   : > { %v583_v63 = vadd.f32 %v1064_v60, %v1275_v45 }
 0x119   : > { %v608_v1 = vmax.f32 %v527_v61, 0.0  ;;  %v1023_v2 = vpop.f32.mrb[16].mxu0  ;;  %v1065_v4 = vpop.f32.mrb[16].mxu1 }
 0x11a   : > { %v622_v3 = vmax.f32 %v583_v63, 0.0  ;;  %v1024_v5 = vpop.f32.mrb[17].mxu0  ;;  %v1066_v6 = vpop.f32.mrb[17].mxu1 }
 0x11b   : > { %v930_v7 = vpack.c.bf16 %v608_v1, %v607_v0  ;;  %v1025_v8 = vadd.f32 %v1024_v5, %v1023_v2  ;;  %v1026_v9 = vpop.f32.mrb[18].mxu0  ;;  %v1067_v11 = vadd.f32 %v1066_v6, %v1065_v4  ;;  %v1068_v12 = vpop.f32.mrb[18].mxu1 }
 0x11c   : > { %v965_v10 = vpack.c.bf16 %v622_v3, %v621_v62  ;;  %v1027_v13 = vpop.f32.mrb[19].mxu0  ;;  %v1069_v14 = vpop.f32.mrb[19].mxu1 }
 0x11d   : > { %974 = vst [vmem:[%s1285_s4 + $0x18] sm:$0xff] %v930_v7   ;;  %v532_v15 = vadd.f32 %v1025_v8, %v1275_v45  ;;  %v1028_v16 = vadd.f32 %v1027_v13, %v1026_v9  ;;  %v588_v17 = vadd.f32 %v1067_v11, %v1275_v45  ;;  %v1070_v18 = vadd.f32 %v1069_v14, %v1068_v12 }
 0x11e   : > { %981 = vst [vmem:[%s1285_s4 + $0x50] sm:$0xff] %v965_v10  }
 0x11f   : > { %v535_v19 = vadd.f32 %v1028_v16, %v1275_v45  ;;  %v623_v20 = vmax.f32 %v588_v17, 0.0  ;;  %v591_v21 = vadd.f32 %v1070_v18, %v1275_v45  ;;  %v609_v22 = vmax.f32 %v532_v15, 0.0 }
 0x121   : > { %v610_v23 = vmax.f32 %v535_v19, 0.0  ;;  %v1029_v24 = vpop.f32.mrb[20].mxu0  ;;  %v624_v25 = vmax.f32 %v591_v21, 0.0  ;;  %v1071_v26 = vpop.f32.mrb[20].mxu1 }
 0x122   : > { %v1030_v27 = vpop.f32.mrb[21].mxu0  ;;  %v1072_v28 = vpop.f32.mrb[21].mxu1 }
 0x123   : > { %v935_v29 = vpack.c.bf16 %v610_v23, %v609_v22  ;;  %v1031_v30 = vadd.f32 %v1030_v27, %v1029_v24  ;;  %v1032_v31 = vpop.f32.mrb[22].mxu0  ;;  %v970_v32 = vpack.c.bf16 %v624_v25, %v623_v20  ;;  %v1073_v33 = vadd.f32 %v1072_v28, %v1071_v26  ;;  %v1074_v34 = vpop.f32.mrb[22].mxu1 }
 0x124   : > { %v1033_v35 = vpop.f32.mrb[23].mxu0  ;;  %v1075_v36 = vpop.f32.mrb[23].mxu1 }
 0x125   : > { %975 = vst [vmem:[%s1285_s4 + $0x20] sm:$0xff] %v935_v29   ;;  %v540_v37 = vadd.f32 %v1031_v30, %v1275_v45  ;;  %982 = vst [vmem:[%s1285_s4 + $0x58] sm:$0xff] %v970_v32   ;;  %v1034_v38 = vadd.f32 %v1033_v35, %v1032_v31  ;;  %v596_v39 = vadd.f32 %v1073_v33, %v1275_v45 }
 0x127   : > { %v543_v40 = vadd.f32 %v1034_v38, %v1275_v45  ;;  %v625_v41 = vmax.f32 %v596_v39, 0.0  ;;  %v611_v42 = vmax.f32 %v540_v37, 0.0 }
 0x129   : > { %v612_v43 = vmax.f32 %v543_v40, 0.0  ;;  %v1035_v44 = vpop.f32.mrb[24].mxu0  ;;  %v911_v46 = vpack.c.bf16 %v625_v41, %v625_v41 }
 0x12a   : > { %v1036_v47 = vpop.f32.mrb[25].mxu0 }
 0x12b   : > { %v940_v48 = vpack.c.bf16 %v612_v43, %v611_v42  ;;  %751 = vst [vmem:[%s1285_s4 + $0x60] sm:$0xf] %v911_v46  ;;  %v1037_v49 = vadd.f32 %v1036_v47, %v1035_v44  ;;  %v1038_v50 = vpop.f32.mrb[26].mxu0 }
 0x12c   : > { %v1039_v51 = vpop.f32.mrb[27].mxu0 }
 0x12d   : > { %976 = vst [vmem:[%s1285_s4 + $0x28] sm:$0xff] %v940_v48   ;;  %v548_v52 = vadd.f32 %v1037_v49, %v1275_v45  ;;  %v1040_v53 = vadd.f32 %v1039_v51, %v1038_v50 }
 0x12f   : > { %v551_v54 = vadd.f32 %v1040_v53, %v1275_v45  ;;  %v613_v55 = vmax.f32 %v548_v52, 0.0 }
 0x131   : > { %v614_v56 = vmax.f32 %v551_v54, 0.0 }
 0x133   : > { %v945_v57 = vpack.c.bf16 %v614_v56, %v613_v55 }
 0x135   : > { %977 = vst [vmem:[%s1285_s4 + $0x30] sm:$0xff] %v945_v57  }
 0x136 PF: > { %s13_s12 = sadd.s32 1, %s1161_s12  }
 0x137   : > { %p10_p4 = scmp.ge.s32.totalorder %s13_s12, 6  }
 0x139   :  { %12 = sbr.rel (!%p10_p4) target bundleno = 1 (0x1), region = 62 }

// kernel: duelling_dqn_forward.5
= control target key start
LH: loop header
LB: loop body
LE: loop exit
PB: predicated region body
PF: predicated region fallthrough
CT: control target
= control target key end

     0   :  { %s1903_s12 = smov 0   ;;  %s2221_s0 = inlined_call_operand.vmem [shape: bf16[176,1024], index: 0, kind: input, shape index: {}]   ;;  %s2222_s1 = inlined_call_operand.vmem [shape: bf16[1024,128], index: 1, kind: input, shape index: {}]   ;;  %s2223_s2 = inlined_call_operand.vmem [shape: f32[1,128], index: 2, kind: input, shape index: {}]   ;;  %s2224_s3 = inlined_call_operand.vmem [shape: bf16[176,128], index: 3, kind: output, shape index: {}]  }
   0x1 LB: > { %s1412_s13 = sadd.s32 4294967295, %s1881_s12   ;;  %p1416_p0 = scmp.ge.s32.totalorder %s1881_s12, 1  ;;  %s1881_s12 = sphi %s1903_s12, %s13_s12  }
   0x2   : > { %p139_p1 = scmp.lt.s32.totalorder %s1881_s12, 3 }
   0x4   : > { %p140_p2 = pnand %p1416_p0, %p139_p1 }
   0x5   : > { %v1803_v0 = vld [vmem:[%s2222_s1 + $0x40] sm:$0xff] (!%p140_p2)   ;;  %v1807_v4 = vld [vmem:[%s2222_s1 + $0x48] sm:$0xff] (!%p140_p2)   ;;  %v1811_v8 = vld [vmem:[%s2222_s1 + $0x50] sm:$0xff] (!%p140_p2)   ;;  %s164_s19 = smul.u32 (!%p140_p2), 11, %s1412_s13 }
   0x6   : > { %143 = sbr.rel (%p140_p2) target bundleno = 351 (0x15f), region = 32  ;;  %v1804_v1 = vld [vmem:[%s2222_s1 + $0xc0] sm:$0xff] (!%p140_p2)   ;;  %1587 = vmatprep.subr.bf16.mxu0 (!%p140_p2), %v1803_v0  ;;  %v1808_v5 = vld [vmem:[%s2222_s1 + $0xc8] sm:$0xff] (!%p140_p2)   ;;  %v1812_v9 = vld [vmem:[%s2222_s1 + $0xd0] sm:$0xff] (!%p140_p2)  }
   0x7   : > { %v1805_v2 = vld [vmem:[%s2222_s1] sm:$0xff] (!%p140_p2)   ;;  %1639 = vmatprep.subr.bf16.mxu1 (!%p140_p2), %v1804_v1  ;;  %v1809_v6 = vld [vmem:[%s2222_s1 + $0x8] sm:$0xff] (!%p140_p2)   ;;  %v1813_v10 = vld [vmem:[%s2222_s1 + $0x10] sm:$0xff] (!%p140_p2)   ;;  %p165_p3 = scmp.lt.s32.totalorder (!%p140_p2), %s164_s19, 21 }
   0x8   : > { %v1806_v3 = vld [vmem:[%s2222_s1 + $0x80] sm:$0xff] (!%p140_p2)   ;;  %1588 = vmatpush3.bf16.msra.mxu0 (!%p140_p2), %v1805_v2  ;;  %v1810_v7 = vld [vmem:[%s2222_s1 + $0x88] sm:$0xff] (!%p140_p2)   ;;  %v1814_v11 = vld [vmem:[%s2222_s1 + $0x90] sm:$0xff] (!%p140_p2)  }
   0x9   : > { %1640 = vmatpush3.bf16.msra.mxu1 (!%p140_p2), %v1806_v3  ;;  %1589 = vmatprep.subr.bf16.mxu0 (!%p140_p2), %v1807_v4  ;;  %v1815_v12 = vld [vmem:[%s2222_s1 + $0x58] sm:$0xff] (!%p140_p2)   ;;  %v1819_v16 = vld [vmem:[%s2222_s1 + $0x60] sm:$0xff] (!%p140_p2)   ;;  %v1823_v20 = vld [vmem:[%s2222_s1 + $0x68] sm:$0xff] (!%p140_p2)  }
   0xa   : > { %1641 = vmatprep.subr.bf16.mxu1 (!%p140_p2), %v1808_v5  ;;  %v1816_v13 = vld [vmem:[%s2222_s1 + $0xd8] sm:$0xff] (!%p140_p2)   ;;  %v1820_v17 = vld [vmem:[%s2222_s1 + $0xe0] sm:$0xff] (!%p140_p2)   ;;  %v1824_v21 = vld [vmem:[%s2222_s1 + $0xe8] sm:$0xff] (!%p140_p2)  }
   0xb   : > { %v1817_v14 = vld [vmem:[%s2222_s1 + $0x18] sm:$0xff] (!%p140_p2)   ;;  %v1821_v18 = vld [vmem:[%s2222_s1 + $0x20] sm:$0xff] (!%p140_p2)   ;;  %v1825_v22 = vld [vmem:[%s2222_s1 + $0x28] sm:$0xff] (!%p140_p2)  }
   0xc   : > { %1590 = vmatpush3.bf16.msra.mxu0 (!%p140_p2), %v1809_v6  ;;  %v1818_v15 = vld [vmem:[%s2222_s1 + $0x98] sm:$0xff] (!%p140_p2)   ;;  %v1822_v19 = vld [vmem:[%s2222_s1 + $0xa0] sm:$0xff] (!%p140_p2)   ;;  %v1826_v23 = vld [vmem:[%s2222_s1 + $0xa8] sm:$0xff] (!%p140_p2)  }
   0xd   : > { %1642 = vmatpush3.bf16.msra.mxu1 %v1810_v7  ;;  %1591 = vmatprep.subr.bf16.mxu0 %v1811_v8  ;;  %s2226_s19 = smov (!%p165_p3, %s164_s19), 21  ;;  %v1827_v24 = vld [vmem:[%s2222_s1 + $0x70] sm:$0xff]   ;;  %v1831_v28 = vld [vmem:[%s2222_s1 + $0x78] sm:$0xff]   ;;  %v1835_v40 = vld [vmem:[%s2222_s1 + $0x140] sm:$0xff]  }
   0xe   : > { %1643 = vmatprep.subr.bf16.mxu1 %v1812_v9  ;;  %v1828_v25 = vld [vmem:[%s2222_s1 + $0xf0] sm:$0xff]   ;;  %s1546_s18 = sshll.u32 %s2226_s19, 5  ;;  %v1832_v29 = vld [vmem:[%s2222_s1 + $0xf8] sm:$0xff]   ;;  %v1836_v41 = vld [vmem:[%s2222_s1 + $0x100] sm:$0xff]  }
   0xf   : > { %v1829_v26 = vld [vmem:[%s2222_s1 + $0x30] sm:$0xff]   ;;  %s2009_s13 = scalar_lea.vmem %s2221_s0, %s1546_s18  ;;  %v1833_v30 = vld [vmem:[%s2222_s1 + $0x38] sm:$0xff]   ;;  %v1837_v42 = vld [vmem:[%s2222_s1 + $0x1c0] sm:$0xff]  }
  0x10   : > { %1592 = vmatpush3.bf16.msra.mxu0 %v1813_v10  ;;  %v1830_v27 = vld [vmem:[%s2222_s1 + $0xb0] sm:$0xff]   ;;  %v1834_v31 = vld [vmem:[%s2222_s1 + $0xb8] sm:$0xff]   ;;  %v178_v32 = vld [vmem:[%s2009_s13] sm:$0xff] }
  0x11   : > { %1644 = vmatpush3.bf16.msra.mxu1 %v1814_v11  ;;  %1593 = vmatprep.subr.bf16.mxu0 %v1815_v12  ;;  %v182_v33 = vld [vmem:[%s2009_s13 + $0x20] sm:$0xff]  ;;  %v179_v34 = vld [vmem:[%s2009_s13 + $0x8] sm:$0xff]  ;;  %v1843_v56 = vld [vmem:[%s2222_s1 + $0x150] sm:$0xff]  }
  0x12   : > { %1645 = vmatprep.subr.bf16.mxu1 %v1816_v13  ;;  %v1421_v35 = vcombine.low %v178_v32, %v182_v33  ;;  %v1422_v36 = vcombine.high %v178_v32, %v182_v33  ;;  %v183_v37 = vld [vmem:[%s2009_s13 + $0x28] sm:$0xff]  ;;  %v1838_v43 = vld [vmem:[%s2222_s1 + $0x180] sm:$0xff]   ;;  %v1844_v57 = vld [vmem:[%s2222_s1 + $0x110] sm:$0xff]  }
  0x13   : > { %v1423_v38 = vcombine.low %v179_v34, %v183_v37  ;;  %v1424_v39 = vcombine.high %v179_v34, %v183_v37  ;;  %v1839_v44 = vld [vmem:[%s2222_s1 + $0x148] sm:$0xff]   ;;  %v186_v45 = vld [vmem:[%s2009_s13 + $0x40] sm:$0xff]  ;;  %v1845_v58 = vld [vmem:[%s2222_s1 + $0x1d0] sm:$0xff]  }
  0x14   : > { %1594 = vmatpush3.bf16.msra.mxu0 %v1817_v14  ;;  %1001 = vmatprep.mubr.bf16.mxu0 %v1422_v36  ;;  %v190_v46 = vld [vmem:[%s2009_s13 + $0x60] sm:$0xff]  ;;  %v187_v48 = vld [vmem:[%s2009_s13 + $0x48] sm:$0xff]  ;;  %v1846_v1 = vld [vmem:[%s2222_s1 + $0x190] sm:$0xff]  }
  0x15   : > { %1646 = vmatpush3.bf16.msra.mxu1 %v1818_v15  ;;  %1595 = vmatprep.subr.bf16.mxu0 %v1819_v16  ;;  %v1430_v47 = vcombine.high %v186_v45, %v190_v46  ;;  %v191_v49 = vld [vmem:[%s2009_s13 + $0x68] sm:$0xff]  ;;  %v1429_v52 = vcombine.low %v186_v45, %v190_v46  ;;  %v194_v59 = vld [vmem:[%s2009_s13 + $0x80] sm:$0xff]  ;;  %v1847_v3 = vld [vmem:[%s2222_s1 + $0x158] sm:$0xff]  }
  0x16   : > { %1647 = vmatprep.subr.bf16.mxu1 %v1820_v17  ;;  %1081 = vmatprep.mubr.bf16.mxu1 %v1424_v39  ;;  %v1432_v50 = vcombine.high %v187_v48, %v191_v49  ;;  %v1840_v51 = vld [vmem:[%s2222_s1 + $0x108] sm:$0xff]   ;;  %v1431_v53 = vcombine.low %v187_v48, %v191_v49  ;;  %v198_v60 = vld [vmem:[%s2009_s13 + $0xa0] sm:$0xff]  ;;  %v1848_v5 = vld [vmem:[%s2222_s1 + $0x118] sm:$0xff]  }
  0x17   : > { %v1841_v54 = vld [vmem:[%s2222_s1 + $0x1c8] sm:$0xff]   ;;  %v1438_v63 = vcombine.high %v194_v59, %v198_v60  ;;  %v1437_v2 = vcombine.low %v194_v59, %v198_v60  ;;  %v1849_v6 = vld [vmem:[%s2222_s1 + $0x1d8] sm:$0xff]   ;;  %v202_v8 = vld [vmem:[%s2009_s13 + $0xc0] sm:$0xff] }
  0x18   : > { %1596 = vmatpush3.bf16.msra.mxu0 %v1821_v18  ;;  %v1842_v55 = vld [vmem:[%s2222_s1 + $0x188] sm:$0xff]   ;;  %v1850_v7 = vld [vmem:[%s2222_s1 + $0x198] sm:$0xff]   ;;  %v206_v9 = vld [vmem:[%s2009_s13 + $0xe0] sm:$0xff] }
  0x19   : > { %1648 = vmatpush3.bf16.msra.mxu1 %v1822_v19  ;;  %1597 = vmatprep.subr.bf16.mxu0 %v1823_v20  ;;  %v195_v61 = vld [vmem:[%s2009_s13 + $0x88] sm:$0xff]  ;;  %v1446_v11 = vcombine.high %v202_v8, %v206_v9  ;;  %v1851_v14 = vld [vmem:[%s2222_s1 + $0x160] sm:$0xff]   ;;  %v1445_v16 = vcombine.low %v202_v8, %v206_v9  ;;  %v1860_v32 = vld [vmem:[%s2222_s1 + $0x130] sm:$0xff]  }
  0x1a   : > { %1649 = vmatprep.subr.bf16.mxu1 %v1824_v21  ;;  %v199_v62 = vld [vmem:[%s2009_s13 + $0xa8] sm:$0xff]  ;;  %v1852_v15 = vld [vmem:[%s2222_s1 + $0x120] sm:$0xff]   ;;  %v1861_v34 = vld [vmem:[%s2222_s1 + $0x1f0] sm:$0xff]  }
  0x1b   : > { %v1440_v0 = vcombine.high %v195_v61, %v199_v62  ;;  %v1439_v4 = vcombine.low %v195_v61, %v199_v62  ;;  %v203_v10 = vld [vmem:[%s2009_s13 + $0xc8] sm:$0xff]  ;;  %v1853_v17 = vld [vmem:[%s2222_s1 + $0x1e0] sm:$0xff]   ;;  %v1864_v39 = vld [vmem:[%s2222_s1 + $0x1b0] sm:$0xff]  }
  0x1c   : > { %1598 = vmatpush3.bf16.msra.mxu0 %v1825_v22  ;;  %v207_v12 = vld [vmem:[%s2009_s13 + $0xe8] sm:$0xff]  ;;  %v1854_v19 = vld [vmem:[%s2222_s1 + $0x1a0] sm:$0xff]   ;;  %v184_v45 = vld [vmem:[%s2009_s13 + $0x30] sm:$0xff] }
  0x1d   : > { %1650 = vmatpush3.bf16.msra.mxu1 %v1826_v23  ;;  %1599 = vmatprep.subr.bf16.mxu0 %v1827_v24  ;;  %v1448_v13 = vcombine.high %v203_v10, %v207_v12  ;;  %v1447_v18 = vcombine.low %v203_v10, %v207_v12  ;;  %v1855_v20 = vld [vmem:[%s2222_s1 + $0x168] sm:$0xff]   ;;  %v210_v21 = vld [vmem:[%s2009_s13 + $0x100] sm:$0xff]  ;;  %v185_v48 = vld [vmem:[%s2009_s13 + $0x38] sm:$0xff] }
  0x1e   : > { %1651 = vmatprep.subr.bf16.mxu1 %v1828_v25  ;;  %v214_v22 = vld [vmem:[%s2009_s13 + $0x120] sm:$0xff]  ;;  %v211_v24 = vld [vmem:[%s2009_s13 + $0x108] sm:$0xff]  ;;  %v196_v60 = vld [vmem:[%s2009_s13 + $0x90] sm:$0xff] }
  0x1f   : > { %v1454_v23 = vcombine.high %v210_v21, %v214_v22  ;;  %v215_v25 = vld [vmem:[%s2009_s13 + $0x128] sm:$0xff]  ;;  %v200_v61 = vld [vmem:[%s2009_s13 + $0xb0] sm:$0xff]  ;;  %v197_v62 = vld [vmem:[%s2009_s13 + $0x98] sm:$0xff] }
  0x20   : > { %1600 = vmatpush3.bf16.msra.mxu0 %v1829_v26  ;;  %v1456_v26 = vcombine.high %v211_v24, %v215_v25  ;;  %v1455_v33 = vcombine.low %v211_v24, %v215_v25  ;;  %v219_v37 = vld [vmem:[%s2009_s13 + $0x148] sm:$0xff]  ;;  %v1441_v8 = vcombine.low %v196_v60, %v200_v61  ;;  %v212_v12 = vld [vmem:[%s2009_s13 + $0x110] sm:$0xff] }
  0x21   : > { %1652 = vmatpush3.bf16.msra.mxu1 %v1830_v27  ;;  %1601 = vmatprep.subr.bf16.mxu0 %v1831_v28  ;;  %v1856_v27 = vld [vmem:[%s2222_s1 + $0x128] sm:$0xff]   ;;  %v1463_v49 = vcombine.low %v219_v37, %v219_v37 }
  0x22   : > { %1653 = vmatprep.subr.bf16.mxu1 %v1832_v29  ;;  %v1857_v28 = vld [vmem:[%s2222_s1 + $0x1e8] sm:$0xff]  }
  0x23   : > { %v1858_v29 = vld [vmem:[%s2222_s1 + $0x1a8] sm:$0xff]  }
  0x24   : > { %1602 = vmatpush3.bf16.msra.mxu0 %v1833_v30  ;;  %v1859_v30 = vld [vmem:[%s2222_s1 + $0x170] sm:$0xff]  }
  0x25   : > { %1654 = vmatpush3.bf16.msra.mxu1 %v1834_v31  ;;  %1691 = vmatprep.subr.bf16.mxu0 %v1835_v40  ;;  %v1453_v31 = vcombine.low %v210_v21, %v214_v22  ;;  %v1867_v40 = vld [vmem:[%s2222_s1 + $0x178] sm:$0xff]  }
  0x26   : > { %1743 = vmatprep.subr.bf16.mxu1 %v1837_v42  ;;  %v1869_v42 = vld [vmem:[%s2222_s1 + $0x1f8] sm:$0xff]  }
  0x27   : > { %1002 = vmatmul.mubr.bf16.vlgmr.msra.gmra.mrb[0].mxu0 %v1421_v35  ;;  %v218_v35 = vld [vmem:[%s2009_s13 + $0x140] sm:$0xff]  ;;  %v221_v21 = vld [vmem:[%s2009_s13 + $0x158] sm:$0xff] }
  0x28   : > { %1082 = vmatmul.mubr.bf16.vlgmr.msra.gmra.mrb[0].mxu1 %v1423_v38  ;;  %1692 = vmatpush3.bf16.msra.mxu0 %v1836_v41  ;;  %v1462_v36 = vcombine.high %v218_v35, %v218_v35  ;;  %v1464_v38 = vcombine.high %v219_v37, %v219_v37  ;;  %v1868_v41 = vld [vmem:[%s2222_s1 + $0x138] sm:$0xff]   ;;  %v1461_v46 = vcombine.low %v218_v35, %v218_v35 }
  0x29   : > { %1744 = vmatpush3.bf16.msra.mxu1 %v1838_v43  ;;  %1693 = vmatprep.subr.bf16.mxu0 %v1839_v44  ;;  %v1870_v43 = vld [vmem:[%s2222_s1 + $0x1b8] sm:$0xff]   ;;  %v180_v44 = vld [vmem:[%s2009_s13 + $0x10] sm:$0xff]  ;;  %v1468_v25 = vcombine.high %v221_v21, %v221_v21 }
  0x2a   : > { %1009 = vmatprep.mubr.bf16.mxu0 %v1430_v47  ;;  %1089 = vmatprep.mubr.bf16.mxu1 %v1432_v50  ;;  %v181_v47 = vld [vmem:[%s2009_s13 + $0x18] sm:$0xff]  ;;  %v1426_v50 = vcombine.high %v180_v44, %v184_v45 }
  0x2b   : > { %1745 = vmatprep.subr.bf16.mxu1 %v1841_v54  ;;  %v189_v54 = vld [vmem:[%s2009_s13 + $0x58] sm:$0xff] }
  0x2c   : > { %1694 = vmatpush3.bf16.msra.mxu0 %v1840_v51  ;;  %v1428_v51 = vcombine.high %v181_v47, %v185_v48 }
  0x2d   : > { %1746 = vmatpush3.bf16.msra.mxu1 %v1842_v55  ;;  %1695 = vmatprep.subr.bf16.mxu0 %v1843_v56  ;;  %v193_v55 = vld [vmem:[%s2009_s13 + $0x78] sm:$0xff]  ;;  %v1425_v56 = vcombine.low %v180_v44, %v184_v45 }
  0x2e   : > { %1747 = vmatprep.subr.bf16.mxu1 %v1845_v58  ;;  %v1436_v59 = vcombine.high %v189_v54, %v193_v55 }
  0x2f   : > { %1010 = vmatmul.mubr.bf16.gmra.mrb[4].mxu0 %v1429_v52  ;;  %v188_v52 = vld [vmem:[%s2009_s13 + $0x50] sm:$0xff] }
  0x30   : > { %1090 = vmatmul.mubr.bf16.gmra.mrb[4].mxu1 %v1431_v53  ;;  %1696 = vmatpush3.bf16.msra.mxu0 %v1844_v57  ;;  %v192_v53 = vld [vmem:[%s2009_s13 + $0x70] sm:$0xff]  ;;  %v1427_v57 = vcombine.low %v181_v47, %v185_v48 }
  0x31   : > { %1017 = vmatprep.mubr.bf16.mxu0 %v1438_v63  ;;  %1097 = vmatprep.mubr.bf16.mxu1 %v1440_v0  ;;  %v1434_v58 = vcombine.high %v188_v52, %v192_v53  ;;  %v201_v63 = vld [vmem:[%s2009_s13 + $0xb8] sm:$0xff]  ;;  %v1433_v0 = vcombine.low %v188_v52, %v192_v53 }
  0x32   : > { %1748 = vmatpush3.bf16.msra.mxu1 %v1846_v1  ;;  %1697 = vmatprep.subr.bf16.mxu0 %v1847_v3  ;;  %v1435_v1 = vcombine.low %v189_v54, %v193_v55  ;;  %v1444_v3 = vcombine.high %v197_v62, %v201_v63  ;;  %v1443_v9 = vcombine.low %v197_v62, %v201_v63 }
  0x33   : > { %1749 = vmatprep.subr.bf16.mxu1 %v1849_v6  ;;  %v205_v6 = vld [vmem:[%s2009_s13 + $0xd8] sm:$0xff] }
  0x34   : > { %1698 = vmatpush3.bf16.msra.mxu0 %v1848_v5  ;;  %v208_v5 = vld [vmem:[%s2009_s13 + $0xf0] sm:$0xff] }
  0x35   : > { %1699 = vmatprep.subr.bf16.mxu0 %v1851_v14  ;;  %v213_v14 = vld [vmem:[%s2009_s13 + $0x118] sm:$0xff] }
  0x36   : > { %1750 = vmatpush3.bf16.msra.mxu1 %v1850_v7  ;;  %v209_v7 = vld [vmem:[%s2009_s13 + $0xf8] sm:$0xff] }
  0x37   : > { %1018 = vmatmul.mubr.bf16.gmra.mrb[8].mxu0 %v1437_v2  ;;  %1751 = vmatprep.subr.bf16.mxu1 %v1853_v17  ;;  %v1442_v2 = vcombine.high %v196_v60, %v200_v61  ;;  %v1451_v17 = vcombine.low %v205_v6, %v209_v7 }
  0x38   : > { %1098 = vmatmul.mubr.bf16.gmra.mrb[8].mxu1 %v1439_v4  ;;  %1025 = vmatprep.mubr.bf16.mxu0 %v1446_v11  ;;  %v204_v4 = vld [vmem:[%s2009_s13 + $0xd0] sm:$0xff]  ;;  %v1452_v11 = vcombine.high %v205_v6, %v209_v7 }
  0x39   : > { %1105 = vmatprep.mubr.bf16.mxu1 %v1448_v13  ;;  %1700 = vmatpush3.bf16.msra.mxu0 %v1852_v15  ;;  %v1450_v10 = vcombine.high %v204_v4, %v208_v5  ;;  %v216_v13 = vld [vmem:[%s2009_s13 + $0x130] sm:$0xff]  ;;  %v217_v15 = vld [vmem:[%s2009_s13 + $0x138] sm:$0xff] }
  0x3a   : > { %1752 = vmatpush3.bf16.msra.mxu1 %v1854_v19  ;;  %1701 = vmatprep.subr.bf16.mxu0 %v1855_v20  ;;  %v1460_v19 = vcombine.high %v213_v14, %v217_v15  ;;  %v220_v20 = vld [vmem:[%s2009_s13 + $0x150] sm:$0xff]  ;;  %v1457_v22 = vcombine.low %v212_v12, %v216_v13  ;;  %s1419_s13 = sshll.u32 %s2226_s19, 2 }
  0x3b   : > { %1753 = vmatprep.subr.bf16.mxu1 %v1857_v28  ;;  %v1466_v24 = vcombine.high %v220_v20, %v220_v20  ;;  %s2201_s28 = scalar_lea.vmem %s2224_s3, %s1419_s13 }
  0x3d   : > { %1702 = vmatpush3.bf16.msra.mxu0 %v1856_v27  ;;  %v1467_v27 = vcombine.low %v221_v21, %v221_v21 }
  0x3e   : > { %1754 = vmatpush3.bf16.msra.mxu1 %v1858_v29  ;;  %1703 = vmatprep.subr.bf16.mxu0 %v1859_v30  ;;  %v2160_v30 = vld [vmem:[%s2223_s2] ss:$0 sm:$0xff] }
  0x3f   : > { %1026 = vmatmul.mubr.bf16.gmra.mrb[12].mxu0 %v1445_v16  ;;  %1755 = vmatprep.subr.bf16.mxu1 %v1861_v34  ;;  %v1449_v16 = vcombine.low %v204_v4, %v208_v5 }
  0x40   : > { %1106 = vmatmul.mubr.bf16.gmra.mrb[12].mxu1 %v1447_v18  ;;  %1033 = vmatprep.mubr.bf16.mxu0 %v1454_v23  ;;  %v1458_v18 = vcombine.high %v212_v12, %v216_v13  ;;  %v1459_v23 = vcombine.low %v213_v14, %v217_v15 }
  0x41   : > { %1113 = vmatprep.mubr.bf16.mxu1 %v1456_v26  ;;  %1704 = vmatpush3.bf16.msra.mxu0 %v1860_v32  ;;  %v1465_v26 = vcombine.low %v220_v20, %v220_v20 }
  0x42   : > { %1756 = vmatpush3.bf16.msra.mxu1 %v1864_v39  ;;  %1705 = vmatprep.subr.bf16.mxu0 %v1867_v40 }
  0x43   : > { %1757 = vmatprep.subr.bf16.mxu1 %v1869_v42 }
  0x45   : > { %1706 = vmatpush3.bf16.msra.mxu0 %v1868_v41 }
  0x46   : > { %1758 = vmatpush3.bf16.msra.mxu1 %v1870_v43 }
  0x47   : > { %1034 = vmatmul.mubr.bf16.gmra.mrb[16].mxu0 %v1453_v31 }
  0x48   : > { %1114 = vmatmul.mubr.bf16.gmra.mrb[16].mxu1 %v1455_v33  ;;  %1041 = vmatprep.mubr.bf16.mxu0 %v1462_v36 }
  0x49   : > { %1121 = vmatprep.mubr.bf16.mxu1 %v1464_v38 }
  0x4f   : > { %1042 = vmatmul.mubr.bf16.gmra.mrb[20].mxu0 %v1461_v46 }
  0x50   : > { %1122 = vmatmul.mubr.bf16.gmra.mrb[20].mxu1 %v1463_v49  ;;  %1161 = vmatprep.mubr.bf16.mxu0 %v1426_v50 }
  0x51   : > { %1241 = vmatprep.mubr.bf16.mxu1 %v1428_v51 }
  0x57   : > { %1162 = vmatmul.mubr.bf16.vlgmr.msra.gmra.mrb[24].mxu0 %v1425_v56 }
  0x58   : > { %1242 = vmatmul.mubr.bf16.vlgmr.msra.gmra.mrb[24].mxu1 %v1427_v57  ;;  %1169 = vmatprep.mubr.bf16.mxu0 %v1434_v58 }
  0x59   : > { %1249 = vmatprep.mubr.bf16.mxu1 %v1436_v59 }
  0x5f   : > { %1170 = vmatmul.mubr.bf16.gmra.mrb[28].mxu0 %v1433_v0 }
  0x60   : > { %1250 = vmatmul.mubr.bf16.gmra.mrb[28].mxu1 %v1435_v1  ;;  %1177 = vmatprep.mubr.bf16.mxu0 %v1442_v2 }
  0x61   : > { %1257 = vmatprep.mubr.bf16.mxu1 %v1444_v3 }
  0x67   : > { %1178 = vmatmul.mubr.bf16.gmra.mrb[32].mxu0 %v1441_v8 }
  0x68   : > { %1258 = vmatmul.mubr.bf16.gmra.mrb[32].mxu1 %v1443_v9  ;;  %1185 = vmatprep.mubr.bf16.mxu0 %v1450_v10 }
  0x69   : > { %1265 = vmatprep.mubr.bf16.mxu1 %v1452_v11 }
  0x6f   : > { %1186 = vmatmul.mubr.bf16.gmra.mrb[36].mxu0 %v1449_v16 }
  0x70   : > { %1266 = vmatmul.mubr.bf16.gmra.mrb[36].mxu1 %v1451_v17  ;;  %1193 = vmatprep.mubr.bf16.mxu0 %v1458_v18 }
  0x71   : > { %1273 = vmatprep.mubr.bf16.mxu1 %v1460_v19 }
  0x77   : > { %1194 = vmatmul.mubr.bf16.gmra.mrb[40].mxu0 %v1457_v22 }
  0x78   : > { %1274 = vmatmul.mubr.bf16.gmra.mrb[40].mxu1 %v1459_v23  ;;  %1201 = vmatprep.mubr.bf16.mxu0 %v1466_v24 }
  0x79   : > { %1281 = vmatprep.mubr.bf16.mxu1 %v1468_v25 }
  0x7f   : > { %1202 = vmatmul.mubr.bf16.gmra.mrb[44].mxu0 %v1465_v26 }
  0x80   : > { %1282 = vmatmul.mubr.bf16.gmra.mrb[44].mxu1 %v1467_v27 }
  0xfa   : > { %v1603_v28 = vpop.f32.mrb[0].mxu0 }
  0xfb   : > { %v1655_v29 = vpop.f32.mrb[0].mxu1  ;;  %v1604_v31 = vpop.f32.mrb[1].mxu0 }
  0xfc   : > { %v1605_v32 = vadd.f32 %v1604_v31, %v1603_v28  ;;  %v1656_v33 = vpop.f32.mrb[1].mxu1  ;;  %v1606_v34 = vpop.f32.mrb[2].mxu0 }
  0xfd   : > { %v1657_v35 = vadd.f32 %v1656_v33, %v1655_v29  ;;  %v1658_v36 = vpop.f32.mrb[2].mxu1  ;;  %v1607_v37 = vpop.f32.mrb[3].mxu0 }
  0xfe   : > { %v1004_v38 = vadd.f32 %v1605_v32, %v2160_v30  ;;  %v1608_v39 = vadd.f32 %v1607_v37, %v1606_v34  ;;  %v1659_v40 = vpop.f32.mrb[3].mxu1 }
  0xff   : > { %v1660_v41 = vadd.f32 %v1659_v40, %v1658_v36 }
 0x100   : > { %v2163_v42 = vadd.f32 %v1657_v35, %v1004_v38  ;;  %v1007_v43 = vadd.f32 %v1608_v39, %v2160_v30 }
 0x102   : > { %v2166_v44 = vadd.f32 %v1660_v41, %v1007_v43  ;;  %v1609_v45 = vpop.f32.mrb[4].mxu0 }
 0x103   : > { %v1661_v46 = vpop.f32.mrb[4].mxu1  ;;  %v1610_v47 = vpop.f32.mrb[5].mxu0 }
 0x104   : > { %v1611_v48 = vadd.f32 %v1610_v47, %v1609_v45  ;;  %v1662_v49 = vpop.f32.mrb[5].mxu1  ;;  %v1612_v50 = vpop.f32.mrb[6].mxu0 }
 0x105   : > { %v1663_v51 = vadd.f32 %v1662_v49, %v1661_v46  ;;  %v1664_v52 = vpop.f32.mrb[6].mxu1  ;;  %v1613_v53 = vpop.f32.mrb[7].mxu0 }
 0x106   : > { %v1012_v54 = vadd.f32 %v1611_v48, %v2160_v30  ;;  %v1614_v55 = vadd.f32 %v1613_v53, %v1612_v50  ;;  %v1665_v56 = vpop.f32.mrb[7].mxu1 }
 0x107   : > { %v1666_v57 = vadd.f32 %v1665_v56, %v1664_v52 }
 0x108   : > { %v2169_v58 = vadd.f32 %v1663_v51, %v1012_v54  ;;  %v1015_v59 = vadd.f32 %v1614_v55, %v2160_v30 }
 0x10a   : > { %v2172_v60 = vadd.f32 %v1666_v57, %v1015_v59  ;;  %v1615_v61 = vpop.f32.mrb[8].mxu0 }
 0x10b   : > { %v1667_v62 = vpop.f32.mrb[8].mxu1  ;;  %v1616_v63 = vpop.f32.mrb[9].mxu0 }
 0x10c   : > { %v1617_v0 = vadd.f32 %v1616_v63, %v1615_v61  ;;  %v1668_v1 = vpop.f32.mrb[9].mxu1  ;;  %v1618_v2 = vpop.f32.mrb[10].mxu0 }
 0x10d   : > { %v1669_v3 = vadd.f32 %v1668_v1, %v1667_v62  ;;  %v1670_v4 = vpop.f32.mrb[10].mxu1  ;;  %v1619_v5 = vpop.f32.mrb[11].mxu0 }
 0x10e   : > { %v1020_v6 = vadd.f32 %v1617_v0, %v2160_v30  ;;  %v1620_v7 = vadd.f32 %v1619_v5, %v1618_v2  ;;  %v1671_v8 = vpop.f32.mrb[11].mxu1 }
 0x10f   : > { %v1672_v9 = vadd.f32 %v1671_v8, %v1670_v4 }
 0x110   : > { %v2175_v10 = vadd.f32 %v1669_v3, %v1020_v6  ;;  %v1023_v11 = vadd.f32 %v1620_v7, %v2160_v30 }
 0x112   : > { %v2178_v12 = vadd.f32 %v1672_v9, %v1023_v11  ;;  %v1621_v13 = vpop.f32.mrb[12].mxu0 }
 0x113   : > { %v1673_v14 = vpop.f32.mrb[12].mxu1  ;;  %v1622_v15 = vpop.f32.mrb[13].mxu0 }
 0x114   : > { %v1623_v16 = vadd.f32 %v1622_v15, %v1621_v13  ;;  %v1674_v17 = vpop.f32.mrb[13].mxu1  ;;  %v1624_v18 = vpop.f32.mrb[14].mxu0 }
 0x115   : > { %v1675_v19 = vadd.f32 %v1674_v17, %v1673_v14  ;;  %v1676_v20 = vpop.f32.mrb[14].mxu1  ;;  %v1625_v21 = vpop.f32.mrb[15].mxu0 }
 0x116   : > { %v1028_v22 = vadd.f32 %v1623_v16, %v2160_v30  ;;  %v1626_v23 = vadd.f32 %v1625_v21, %v1624_v18  ;;  %v1677_v24 = vpop.f32.mrb[15].mxu1 }
 0x117   : > { %v1678_v25 = vadd.f32 %v1677_v24, %v1676_v20 }
 0x118   : > { %v2181_v26 = vadd.f32 %v1675_v19, %v1028_v22  ;;  %v1031_v27 = vadd.f32 %v1626_v23, %v2160_v30 }
 0x11a   : > { %v2184_v28 = vadd.f32 %v1678_v25, %v1031_v27  ;;  %v1627_v29 = vpop.f32.mrb[16].mxu0 }
 0x11b   : > { %v1679_v31 = vpop.f32.mrb[16].mxu1  ;;  %v1628_v32 = vpop.f32.mrb[17].mxu0 }
 0x11c   : > { %v1629_v33 = vadd.f32 %v1628_v32, %v1627_v29  ;;  %v1680_v34 = vpop.f32.mrb[17].mxu1  ;;  %v1630_v35 = vpop.f32.mrb[18].mxu0 }
 0x11d   : > { %v1681_v36 = vadd.f32 %v1680_v34, %v1679_v31  ;;  %v1682_v37 = vpop.f32.mrb[18].mxu1  ;;  %v1631_v38 = vpop.f32.mrb[19].mxu0 }
 0x11e   : > { %v1036_v39 = vadd.f32 %v1629_v33, %v2160_v30  ;;  %v1632_v40 = vadd.f32 %v1631_v38, %v1630_v35  ;;  %v1683_v41 = vpop.f32.mrb[19].mxu1 }
 0x11f   : > { %v1684_v43 = vadd.f32 %v1683_v41, %v1682_v37 }
 0x120   : > { %v2187_v45 = vadd.f32 %v1681_v36, %v1036_v39  ;;  %v1039_v46 = vadd.f32 %v1632_v40, %v2160_v30 }
 0x122   : > { %v2190_v47 = vadd.f32 %v1684_v43, %v1039_v46  ;;  %v1633_v48 = vpop.f32.mrb[20].mxu0 }
 0x123   : > { %v1685_v49 = vpop.f32.mrb[20].mxu1  ;;  %v1634_v50 = vpop.f32.mrb[21].mxu0 }
 0x124   : > { %v1635_v51 = vadd.f32 %v1634_v50, %v1633_v48  ;;  %v1686_v52 = vpop.f32.mrb[21].mxu1  ;;  %v1636_v53 = vpop.f32.mrb[22].mxu0 }
 0x125   : > { %v1687_v54 = vadd.f32 %v1686_v52, %v1685_v49  ;;  %v1688_v55 = vpop.f32.mrb[22].mxu1  ;;  %v1637_v56 = vpop.f32.mrb[23].mxu0 }
 0x126   : > { %v1044_v57 = vadd.f32 %v1635_v51, %v2160_v30  ;;  %v1689_v59 = vpop.f32.mrb[23].mxu1 }
 0x128   : > { %v2193_v61 = vadd.f32 %v1687_v54, %v1044_v57 }
 0x12a   : > { %v1707_v62 = vpop.f32.mrb[24].mxu0 }
 0x12b   : > { %v1759_v63 = vpop.f32.mrb[24].mxu1  ;;  %v1708_v0 = vpop.f32.mrb[25].mxu0 }
 0x12c   : > { %v1709_v1 = vadd.f32 %v1708_v0, %v1707_v62  ;;  %v1760_v2 = vpop.f32.mrb[25].mxu1  ;;  %v1710_v3 = vpop.f32.mrb[26].mxu0 }
 0x12d   : > { %v1761_v4 = vadd.f32 %v1760_v2, %v1759_v63  ;;  %v1762_v5 = vpop.f32.mrb[26].mxu1  ;;  %v1711_v6 = vpop.f32.mrb[27].mxu0 }
 0x12e   : > { %v1164_v7 = vadd.f32 %v1709_v1, %v2163_v42  ;;  %v1712_v8 = vadd.f32 %v1711_v6, %v1710_v3  ;;  %v1763_v9 = vpop.f32.mrb[27].mxu1 }
 0x12f   : > { %v1764_v11 = vadd.f32 %v1763_v9, %v1762_v5 }
 0x130   : > { %v1244_v13 = vadd.f32 %v1761_v4, %v1164_v7  ;;  %v1167_v30 = vadd.f32 %v1712_v8, %v2166_v44 }
 0x132   : > { %v1247_v14 = vadd.f32 %v1764_v11, %v1167_v30  ;;  %v1713_v15 = vpop.f32.mrb[28].mxu0  ;;  %v1289_v18 = vmax.f32 %v1244_v13, 0.0 }
 0x133   : > { %v1765_v16 = vpop.f32.mrb[28].mxu1  ;;  %v1714_v17 = vpop.f32.mrb[29].mxu0 }
 0x134   : > { %v1290_v19 = vmax.f32 %v1247_v14, 0.0  ;;  %v1715_v20 = vadd.f32 %v1714_v17, %v1713_v15  ;;  %v1766_v21 = vpop.f32.mrb[29].mxu1  ;;  %v1716_v22 = vpop.f32.mrb[30].mxu0 }
 0x135   : > { %v1767_v42 = vadd.f32 %v1766_v21, %v1765_v16  ;;  %v1768_v23 = vpop.f32.mrb[30].mxu1  ;;  %v1717_v24 = vpop.f32.mrb[31].mxu0 }
 0x136   : > { %v1561_v44 = vpack.c.bf16 %v1290_v19, %v1289_v18  ;;  %v1172_v25 = vadd.f32 %v1715_v20, %v2169_v58  ;;  %v1718_v27 = vadd.f32 %v1717_v24, %v1716_v22  ;;  %v1769_v29 = vpop.f32.mrb[31].mxu1 }
 0x137   : > { %v1770_v31 = vadd.f32 %v1769_v29, %v1768_v23 }
 0x138   : > { %1562 = vst [vmem:[%s2201_s28] sm:$0xff] %v1561_v44   ;;  %v1252_v32 = vadd.f32 %v1767_v42, %v1172_v25  ;;  %v1175_v33 = vadd.f32 %v1718_v27, %v2172_v60 }
 0x13a   : > { %v1255_v34 = vadd.f32 %v1770_v31, %v1175_v33  ;;  %v1719_v35 = vpop.f32.mrb[32].mxu0  ;;  %v1291_v38 = vmax.f32 %v1252_v32, 0.0 }
 0x13b   : > { %v1771_v36 = vpop.f32.mrb[32].mxu1  ;;  %v1720_v37 = vpop.f32.mrb[33].mxu0 }
 0x13c   : > { %v1292_v39 = vmax.f32 %v1255_v34, 0.0  ;;  %v1721_v40 = vadd.f32 %v1720_v37, %v1719_v35  ;;  %v1772_v41 = vpop.f32.mrb[33].mxu1  ;;  %v1722_v43 = vpop.f32.mrb[34].mxu0 }
 0x13d   : > { %v1773_v46 = vadd.f32 %v1772_v41, %v1771_v36  ;;  %v1774_v48 = vpop.f32.mrb[34].mxu1  ;;  %v1723_v58 = vpop.f32.mrb[35].mxu0 }
 0x13e   : > { %v1566_v49 = vpack.c.bf16 %v1292_v39, %v1291_v38  ;;  %v1180_v50 = vadd.f32 %v1721_v40, %v2175_v10  ;;  %v1724_v51 = vadd.f32 %v1723_v58, %v1722_v43  ;;  %v1775_v52 = vpop.f32.mrb[35].mxu1 }
 0x13f   : > { %v1776_v53 = vadd.f32 %v1775_v52, %v1774_v48 }
 0x140   : > { %1583 = vst [vmem:[%s2201_s28 + $0x8] sm:$0xff] %v1566_v49   ;;  %v1260_v60 = vadd.f32 %v1773_v46, %v1180_v50  ;;  %v1183_v54 = vadd.f32 %v1724_v51, %v2178_v12 }
 0x142   : > { %v1263_v55 = vadd.f32 %v1776_v53, %v1183_v54  ;;  %v1725_v56 = vpop.f32.mrb[36].mxu0  ;;  %v1293_v62 = vmax.f32 %v1260_v60, 0.0 }
 0x143   : > { %v1777_v57 = vpop.f32.mrb[36].mxu1  ;;  %v1726_v59 = vpop.f32.mrb[37].mxu0 }
 0x144   : > { %v1294_v63 = vmax.f32 %v1263_v55, 0.0  ;;  %v1727_v0 = vadd.f32 %v1726_v59, %v1725_v56  ;;  %v1778_v1 = vpop.f32.mrb[37].mxu1  ;;  %v1728_v2 = vpop.f32.mrb[38].mxu0 }
 0x145   : > { %v1779_v3 = vadd.f32 %v1778_v1, %v1777_v57  ;;  %v1780_v4 = vpop.f32.mrb[38].mxu1  ;;  %v1729_v10 = vpop.f32.mrb[39].mxu0 }
 0x146   : > { %v1571_v5 = vpack.c.bf16 %v1294_v63, %v1293_v62  ;;  %v1188_v6 = vadd.f32 %v1727_v0, %v2181_v26  ;;  %v1730_v7 = vadd.f32 %v1729_v10, %v1728_v2  ;;  %v1781_v8 = vpop.f32.mrb[39].mxu1 }
 0x147   : > { %v1782_v9 = vadd.f32 %v1781_v8, %v1780_v4 }
 0x148   : > { %1584 = vst [vmem:[%s2201_s28 + $0x10] sm:$0xff] %v1571_v5   ;;  %v1268_v12 = vadd.f32 %v1779_v3, %v1188_v6  ;;  %v1191_v11 = vadd.f32 %v1730_v7, %v2184_v28 }
 0x14a   : > { %v1271_v13 = vadd.f32 %v1782_v9, %v1191_v11  ;;  %v1731_v30 = vpop.f32.mrb[40].mxu0  ;;  %v1295_v16 = vmax.f32 %v1268_v12, 0.0 }
 0x14b   : > { %v1783_v14 = vpop.f32.mrb[40].mxu1  ;;  %v1732_v15 = vpop.f32.mrb[41].mxu0 }
 0x14c   : > { %v1296_v17 = vmax.f32 %v1271_v13, 0.0  ;;  %v1733_v18 = vadd.f32 %v1732_v15, %v1731_v30  ;;  %v1784_v19 = vpop.f32.mrb[41].mxu1  ;;  %v1734_v20 = vpop.f32.mrb[42].mxu0 }
 0x14d   : > { %v1785_v21 = vadd.f32 %v1784_v19, %v1783_v14  ;;  %v1786_v22 = vpop.f32.mrb[42].mxu1  ;;  %v1735_v26 = vpop.f32.mrb[43].mxu0 }
 0x14e   : > { %v1576_v42 = vpack.c.bf16 %v1296_v17, %v1295_v16  ;;  %v1196_v23 = vadd.f32 %v1733_v18, %v2187_v45  ;;  %v1736_v24 = vadd.f32 %v1735_v26, %v1734_v20  ;;  %v1787_v44 = vpop.f32.mrb[43].mxu1 }
 0x14f   : > { %v1788_v25 = vadd.f32 %v1787_v44, %v1786_v22 }
 0x150   : > { %1585 = vst [vmem:[%s2201_s28 + $0x18] sm:$0xff] %v1576_v42   ;;  %v1276_v28 = vadd.f32 %v1785_v21, %v1196_v23  ;;  %v1199_v27 = vadd.f32 %v1736_v24, %v2190_v47 }
 0x152   : > { %v1279_v29 = vadd.f32 %v1788_v25, %v1199_v27  ;;  %v1737_v31 = vpop.f32.mrb[44].mxu0  ;;  %v1297_v34 = vmax.f32 %v1276_v28, 0.0 }
 0x153   : > { %v1789_v32 = vpop.f32.mrb[44].mxu1  ;;  %v1738_v33 = vpop.f32.mrb[45].mxu0 }
 0x154   : > { %v1298_v35 = vmax.f32 %v1279_v29, 0.0  ;;  %v1739_v36 = vadd.f32 %v1738_v33, %v1737_v31  ;;  %v1790_v37 = vpop.f32.mrb[45].mxu1  ;;  %v1740_v38 = vpop.f32.mrb[46].mxu0 }
 0x155   : > { %v1791_v39 = vadd.f32 %v1790_v37, %v1789_v32  ;;  %v1792_v45 = vpop.f32.mrb[46].mxu1  ;;  %v1741_v40 = vpop.f32.mrb[47].mxu0 }
 0x156   : > { %v1581_v41 = vpack.c.bf16 %v1298_v35, %v1297_v34  ;;  %v1204_v43 = vadd.f32 %v1739_v36, %v2193_v61  ;;  %v1793_v46 = vpop.f32.mrb[47].mxu1 }
 0x158   : > { %1586 = vst [vmem:[%s2201_s28 + $0x20] sm:$0xff] %v1581_v41   ;;  %v1284_v47 = vadd.f32 %v1791_v39, %v1204_v43 }
 0x15a   : > { %v1299_v48 = vmax.f32 %v1284_v47, 0.0 }
 0x15c   : > { %v1557_v58 = vpack.c.bf16 %v1299_v48, %v1299_v48 }
 0x15e   : > { %1355 = vst [vmem:[%s2201_s28 + $0x28] sm:$0xf] %v1557_v58 }
 0x15f PF: > { %s13_s12 = sadd.s32 1, %s1881_s12  }
 0x160   : > { %p10_p4 = scmp.ge.s32.totalorder %s13_s12, 4  }
 0x162   :  { %12 = sbr.rel (!%p10_p4) target bundleno = 1 (0x1), region = 62 }

// kernel: duelling_dqn_forward.6
= control target key start
LH: loop header
LB: loop body
LE: loop exit
PB: predicated region body
PF: predicated region fallthrough
CT: control target
= control target key end

     0   :  { %s1249_s12 = smov 0   ;;  %s1415_s0 = inlined_call_operand.vmem [shape: bf16[112,640], index: 0, kind: input, shape index: {}]   ;;  %s1416_s1 = inlined_call_operand.vmem [shape: bf16[640,128], index: 1, kind: input, shape index: {}]   ;;  %s1417_s2 = inlined_call_operand.vmem [shape: f32[1,128], index: 2, kind: input, shape index: {}]   ;;  %s1418_s3 = inlined_call_operand.vmem [shape: bf16[112,128], index: 3, kind: output, shape index: {}]  }
   0x1 LB: > { %s913_s13 = sadd.s32 4294967295, %s1227_s12   ;;  %p917_p0 = scmp.ge.s32.totalorder %s1227_s12, 1  ;;  %s1227_s12 = sphi %s1249_s12, %s13_s12  }
   0x2   : > { %p139_p1 = scmp.lt.s32.totalorder %s1227_s12, 3 }
   0x4   : > { %p140_p2 = pnand %p917_p0, %p139_p1 }
   0x5   : > { %v1155_v0 = vld [vmem:[%s1416_s1 + $0x40] sm:$0xff] (!%p140_p2)   ;;  %v1159_v4 = vld [vmem:[%s1416_s1 + $0x48] sm:$0xff] (!%p140_p2)   ;;  %v1163_v8 = vld [vmem:[%s1416_s1 + $0x50] sm:$0xff] (!%p140_p2)   ;;  %s164_s17 = smul.u32 (!%p140_p2), 7, %s913_s13 }
   0x6   : > { %143 = sbr.rel (%p140_p2) target bundleno = 295 (0x127), region = 32  ;;  %v1156_v1 = vld [vmem:[%s1416_s1 + $0xc0] sm:$0xff] (!%p140_p2)   ;;  %1014 = vmatprep.subr.bf16.mxu0 (!%p140_p2), %v1155_v0  ;;  %v1160_v5 = vld [vmem:[%s1416_s1 + $0xc8] sm:$0xff] (!%p140_p2)   ;;  %v1164_v9 = vld [vmem:[%s1416_s1 + $0xd0] sm:$0xff] (!%p140_p2)  }
   0x7   : > { %v1157_v2 = vld [vmem:[%s1416_s1] sm:$0xff] (!%p140_p2)   ;;  %1054 = vmatprep.subr.bf16.mxu1 (!%p140_p2), %v1156_v1  ;;  %v1161_v6 = vld [vmem:[%s1416_s1 + $0x8] sm:$0xff] (!%p140_p2)   ;;  %v1165_v10 = vld [vmem:[%s1416_s1 + $0x10] sm:$0xff] (!%p140_p2)   ;;  %p165_p3 = scmp.lt.s32.totalorder (!%p140_p2), %s164_s17, 13 }
   0x8   : > { %v1158_v3 = vld [vmem:[%s1416_s1 + $0x80] sm:$0xff] (!%p140_p2)   ;;  %1015 = vmatpush3.bf16.msra.mxu0 (!%p140_p2), %v1157_v2  ;;  %v1162_v7 = vld [vmem:[%s1416_s1 + $0x88] sm:$0xff] (!%p140_p2)   ;;  %v1166_v11 = vld [vmem:[%s1416_s1 + $0x90] sm:$0xff] (!%p140_p2)  }
   0x9   : > { %1055 = vmatpush3.bf16.msra.mxu1 (!%p140_p2), %v1158_v3  ;;  %1016 = vmatprep.subr.bf16.mxu0 (!%p140_p2), %v1159_v4  ;;  %v1167_v12 = vld [vmem:[%s1416_s1 + $0x58] sm:$0xff] (!%p140_p2)   ;;  %v1171_v16 = vld [vmem:[%s1416_s1 + $0x60] sm:$0xff] (!%p140_p2)   ;;  %v1175_v20 = vld [vmem:[%s1416_s1 + $0x68] sm:$0xff] (!%p140_p2)  }
   0xa   : > { %1056 = vmatprep.subr.bf16.mxu1 (!%p140_p2), %v1160_v5  ;;  %v1168_v13 = vld [vmem:[%s1416_s1 + $0xd8] sm:$0xff] (!%p140_p2)   ;;  %v1172_v17 = vld [vmem:[%s1416_s1 + $0xe0] sm:$0xff] (!%p140_p2)   ;;  %v1176_v21 = vld [vmem:[%s1416_s1 + $0xe8] sm:$0xff] (!%p140_p2)  }
   0xb   : > { %v1169_v14 = vld [vmem:[%s1416_s1 + $0x18] sm:$0xff] (!%p140_p2)   ;;  %v1173_v18 = vld [vmem:[%s1416_s1 + $0x20] sm:$0xff] (!%p140_p2)   ;;  %v1177_v22 = vld [vmem:[%s1416_s1 + $0x28] sm:$0xff] (!%p140_p2)  }
   0xc   : > { %1017 = vmatpush3.bf16.msra.mxu0 (!%p140_p2), %v1161_v6  ;;  %v1170_v15 = vld [vmem:[%s1416_s1 + $0x98] sm:$0xff] (!%p140_p2)   ;;  %v1174_v19 = vld [vmem:[%s1416_s1 + $0xa0] sm:$0xff] (!%p140_p2)   ;;  %v1178_v23 = vld [vmem:[%s1416_s1 + $0xa8] sm:$0xff] (!%p140_p2)  }
   0xd   : > { %1057 = vmatpush3.bf16.msra.mxu1 %v1162_v7  ;;  %1018 = vmatprep.subr.bf16.mxu0 %v1163_v8  ;;  %s1420_s17 = smov (!%p165_p3, %s164_s17), 13  ;;  %v1179_v24 = vld [vmem:[%s1416_s1 + $0x70] sm:$0xff]   ;;  %v1183_v28 = vld [vmem:[%s1416_s1 + $0x78] sm:$0xff]   ;;  %v1193_v36 = vld [vmem:[%s1416_s1 + $0x100] sm:$0xff]  }
   0xe   : > { %1058 = vmatprep.subr.bf16.mxu1 %v1164_v9  ;;  %v1180_v25 = vld [vmem:[%s1416_s1 + $0xf0] sm:$0xff]   ;;  %s1146_s16 = smul.u32 20, %s1420_s17  ;;  %v1184_v29 = vld [vmem:[%s1416_s1 + $0xf8] sm:$0xff]   ;;  %v1194_v37 = vld [vmem:[%s1416_s1 + $0x108] sm:$0xff]   ;;  %s919_s13 = sshll.u32 %s1420_s17, 2 }
   0xf   : > { %v1181_v26 = vld [vmem:[%s1416_s1 + $0x30] sm:$0xff]   ;;  %v1185_v30 = vld [vmem:[%s1416_s1 + $0x38] sm:$0xff]   ;;  %v1209_v46 = vld [vmem:[%s1416_s1 + $0x120] sm:$0xff]   ;;  %s175_s28 = scalar_lea.vmem %s1418_s3, %s919_s13 }
  0x10   : > { %1019 = vmatpush3.bf16.msra.mxu0 %v1165_v10  ;;  %v1182_v27 = vld [vmem:[%s1416_s1 + $0xb0] sm:$0xff]   ;;  %s1355_s27 = scalar_lea.vmem %s1415_s0, %s1146_s16  ;;  %v1186_v31 = vld [vmem:[%s1416_s1 + $0xb8] sm:$0xff]   ;;  %v1210_v53 = vld [vmem:[%s1416_s1 + $0x128] sm:$0xff]  }
  0x11   : > { %1059 = vmatpush3.bf16.msra.mxu1 %v1166_v11  ;;  %1020 = vmatprep.subr.bf16.mxu0 %v1167_v12  ;;  %v1187_v32 = vld [vmem:[%s1355_s27] ss:$20 sps:$4 sm:$0xff]   ;;  %v1189_v33 = vld [vmem:[%s1355_s27 + $0x4] ss:$20 sps:$4 sm:$0xff]   ;;  %v1190_v34 = vld [vmem:[%s1355_s27 + $0x8] ss:$20 sps:$4 sm:$0xff]  }
  0x12   : > { %1060 = vmatprep.subr.bf16.mxu1 %v1168_v13  ;;  %v1192_v35 = vld [vmem:[%s1355_s27 + $0xc] ss:$20 sps:$4 sm:$0xff]   ;;  %654 = vmatprep.mubr.bf16.mxu0 %v1189_v33  ;;  %v1197_v39 = vld [vmem:[%s1355_s27 + $0x34] ss:$20 sps:$4 sm:$0xff]   ;;  %v1200_v42 = vld [vmem:[%s1355_s27 + $0x30] ss:$20 sps:$4 sm:$0xff]  }
  0x13   : > { %718 = vmatprep.mubr.bf16.mxu1 %v1192_v35  ;;  %v1195_v38 = vld [vmem:[%s1355_s27 + $0x2c] ss:$20 sps:$4 sm:$0xff]   ;;  %v1199_v40 = vld [vmem:[%s1355_s27 + $0x28] ss:$20 sps:$4 sm:$0xff]   ;;  %v1201_v41 = vld [vmem:[%s1416_s1 + $0x110] sm:$0xff]  }
  0x14   : > { %1021 = vmatpush3.bf16.msra.mxu0 %v1169_v14  ;;  %v1203_v43 = vld [vmem:[%s1355_s27 + $0x54] ss:$20 sps:$4 sm:$0xff]   ;;  %v1202_v44 = vld [vmem:[%s1416_s1 + $0x118] sm:$0xff]   ;;  %v197_v48 = vld [vmem:[%s1355_s27 + $0x80] sm:$0xff] }
  0x15   : > { %1061 = vmatpush3.bf16.msra.mxu1 %v1170_v15  ;;  %1022 = vmatprep.subr.bf16.mxu0 %v1171_v16  ;;  %v1205_v45 = vld [vmem:[%s1355_s27 + $0x5c] ss:$20 sps:$4 sm:$0xff]   ;;  %v1208_v50 = vld [vmem:[%s1355_s27 + $0x58] ss:$20 sps:$4 sm:$0xff]   ;;  %v939_v52 = vcombine.high %v197_v48, %v197_v48  ;;  %v938_v56 = vcombine.low %v197_v48, %v197_v48  ;;  %v1218_v58 = vld [vmem:[%s1355_s27 + $0x60] ss:$20 sps:$4 sm:$0xff]  }
  0x16   : > { %1062 = vmatprep.subr.bf16.mxu1 %v1172_v17  ;;  %v196_v47 = vld [vmem:[%s1355_s27 + $0x78] sm:$0xff]  ;;  %v1207_v49 = vld [vmem:[%s1355_s27 + $0x50] ss:$20 sps:$4 sm:$0xff]   ;;  %v1220_v61 = vld [vmem:[%s1355_s27 + $0x88] ss:$0 sps:$4 sm:$0xff]  }
  0x17   : > { %v937_v51 = vcombine.high %v196_v47, %v196_v47  ;;  %v1215_v54 = vld [vmem:[%s1416_s1 + $0x130] sm:$0xff]   ;;  %v936_v55 = vcombine.low %v196_v47, %v196_v47  ;;  %v1216_v59 = vld [vmem:[%s1416_s1 + $0x138] sm:$0xff]   ;;  %v920_v0 = vld [vmem:[%s1417_s2] ss:$0 sm:$0xff] }
  0x18   : > { %1023 = vmatpush3.bf16.msra.mxu0 %v1173_v18  ;;  %v1217_v57 = vld [vmem:[%s1355_s27 + $0x10] ss:$20 sps:$4 sm:$0xff]   ;;  %v1219_v60 = vld [vmem:[%s1355_s27 + $0x38] ss:$20 sps:$4 sm:$0xff]  }
  0x19   : > { %1063 = vmatpush3.bf16.msra.mxu1 %v1174_v19  ;;  %1024 = vmatprep.subr.bf16.mxu0 %v1175_v20 }
  0x1a   : > { %1064 = vmatprep.subr.bf16.mxu1 %v1176_v21 }
  0x1c   : > { %1025 = vmatpush3.bf16.msra.mxu0 %v1177_v22 }
  0x1d   : > { %1065 = vmatpush3.bf16.msra.mxu1 %v1178_v23  ;;  %1026 = vmatprep.subr.bf16.mxu0 %v1179_v24 }
  0x1e   : > { %1066 = vmatprep.subr.bf16.mxu1 %v1180_v25 }
  0x20   : > { %1027 = vmatpush3.bf16.msra.mxu0 %v1181_v26 }
  0x21   : > { %1067 = vmatpush3.bf16.msra.mxu1 %v1182_v27  ;;  %1028 = vmatprep.subr.bf16.mxu0 %v1183_v28 }
  0x22   : > { %1068 = vmatprep.subr.bf16.mxu1 %v1184_v29 }
  0x24   : > { %1029 = vmatpush3.bf16.msra.mxu0 %v1185_v30 }
  0x25   : > { %1069 = vmatpush3.bf16.msra.mxu1 %v1186_v31  ;;  %1106 = vmatprep.subr.bf16.mxu0 %v1193_v36 }
  0x26   : > { %1130 = vmatprep.subr.bf16.mxu1 %v1193_v36 }
  0x27   : > { %655 = vmatmul.mubr.bf16.vlgmr.msra.gmra.mrb[0].mxu0 %v1187_v32 }
  0x28   : > { %719 = vmatmul.mubr.bf16.vlgmr.msra.gmra.mrb[0].mxu1 %v1190_v34  ;;  %1107 = vmatpush3.bf16.msra.mxu0 %v1193_v36 }
  0x29   : > { %1138 = vmatpush3.bf16.msra.mxu1 %v1193_v36  ;;  %1108 = vmatprep.subr.bf16.mxu0 %v1194_v37 }
  0x2a   : > { %1131 = vmatprep.subr.bf16.mxu1 %v1194_v37  ;;  %662 = vmatprep.mubr.bf16.mxu0 %v1195_v38 }
  0x2b   : > { %726 = vmatprep.mubr.bf16.mxu1 %v1197_v39 }
  0x2c   : > { %1109 = vmatpush3.bf16.msra.mxu0 %v1194_v37 }
  0x2d   : > { %1139 = vmatpush3.bf16.msra.mxu1 %v1194_v37  ;;  %1110 = vmatprep.subr.bf16.mxu0 %v1201_v41 }
  0x2e   : > { %1132 = vmatprep.subr.bf16.mxu1 %v1201_v41 }
  0x2f   : > { %663 = vmatmul.mubr.bf16.gmra.mrb[4].mxu0 %v1199_v40 }
  0x30   : > { %727 = vmatmul.mubr.bf16.gmra.mrb[4].mxu1 %v1200_v42  ;;  %670 = vmatprep.mubr.bf16.mxu0 %v1203_v43 }
  0x31   : > { %1111 = vmatpush3.bf16.msra.mxu0 %v1201_v41  ;;  %734 = vmatprep.mubr.bf16.mxu1 %v1205_v45 }
  0x32   : > { %1140 = vmatpush3.bf16.msra.mxu1 %v1201_v41  ;;  %1112 = vmatprep.subr.bf16.mxu0 %v1202_v44 }
  0x33   : > { %1133 = vmatprep.subr.bf16.mxu1 %v1202_v44 }
  0x35   : > { %1113 = vmatpush3.bf16.msra.mxu0 %v1202_v44 }
  0x36   : > { %1141 = vmatpush3.bf16.msra.mxu1 %v1202_v44  ;;  %1114 = vmatprep.subr.bf16.mxu0 %v1209_v46 }
  0x37   : > { %671 = vmatmul.mubr.bf16.gmra.mrb[8].mxu0 %v1207_v49  ;;  %1134 = vmatprep.subr.bf16.mxu1 %v1209_v46 }
  0x38   : > { %735 = vmatmul.mubr.bf16.gmra.mrb[8].mxu1 %v1208_v50  ;;  %678 = vmatprep.mubr.bf16.mxu0 %v937_v51 }
  0x39   : > { %1115 = vmatpush3.bf16.msra.mxu0 %v1209_v46  ;;  %742 = vmatprep.mubr.bf16.mxu1 %v939_v52 }
  0x3a   : > { %1142 = vmatpush3.bf16.msra.mxu1 %v1209_v46  ;;  %1116 = vmatprep.subr.bf16.mxu0 %v1210_v53 }
  0x3b   : > { %1135 = vmatprep.subr.bf16.mxu1 %v1210_v53 }
  0x3d   : > { %1117 = vmatpush3.bf16.msra.mxu0 %v1210_v53 }
  0x3e   : > { %1143 = vmatpush3.bf16.msra.mxu1 %v1210_v53  ;;  %1118 = vmatprep.subr.bf16.mxu0 %v1215_v54 }
  0x3f   : > { %679 = vmatmul.mubr.bf16.gmra.mrb[12].mxu0 %v936_v55  ;;  %1136 = vmatprep.subr.bf16.mxu1 %v1215_v54 }
  0x40   : > { %743 = vmatmul.mubr.bf16.gmra.mrb[12].mxu1 %v938_v56  ;;  %1122 = vmatprep.mubr.bf16.mxu0 %v1217_v57 }
  0x41   : > { %1119 = vmatpush3.bf16.msra.mxu0 %v1215_v54  ;;  %1126 = vmatprep.mubr.bf16.mxu1 %v1218_v58 }
  0x42   : > { %1144 = vmatpush3.bf16.msra.mxu1 %v1215_v54  ;;  %1120 = vmatprep.subr.bf16.mxu0 %v1216_v59 }
  0x43   : > { %1137 = vmatprep.subr.bf16.mxu1 %v1216_v59 }
  0x45   : > { %1121 = vmatpush3.bf16.msra.mxu0 %v1216_v59 }
  0x46   : > { %1145 = vmatpush3.bf16.msra.mxu1 %v1216_v59 }
  0x48   : > { %1123 = vmatmul.mubr.bf16.vlgmr.msra.gmra.mrb[16].mxu0 %v1219_v60 }
  0x49   : > { %1127 = vmatmul.mubr.bf16.vlgmr.msra.gmra.mrb[16].mxu1 %v1220_v61 }
  0xfa   : > { %v1030_v62 = vpop.f32.mrb[0].mxu0 }
  0xfb   : > { %v1070_v63 = vpop.f32.mrb[0].mxu1  ;;  %v1031_v1 = vpop.f32.mrb[1].mxu0 }
  0xfc   : > { %v1032_v2 = vadd.f32 %v1031_v1, %v1030_v62  ;;  %v1071_v3 = vpop.f32.mrb[1].mxu1  ;;  %v1033_v4 = vpop.f32.mrb[2].mxu0 }
  0xfd   : > { %v1072_v5 = vadd.f32 %v1071_v3, %v1070_v63  ;;  %v1073_v6 = vpop.f32.mrb[2].mxu1  ;;  %v1034_v7 = vpop.f32.mrb[3].mxu0 }
  0xfe   : > { %v657_v8 = vadd.f32 %v1032_v2, %v920_v0  ;;  %v1035_v9 = vadd.f32 %v1034_v7, %v1033_v4  ;;  %v1074_v10 = vpop.f32.mrb[3].mxu1 }
  0xff   : > { %v1075_v11 = vadd.f32 %v1074_v10, %v1073_v6 }
 0x100   : > { %v660_v12 = vadd.f32 %v1035_v9, %v920_v0  ;;  %v721_v13 = vadd.f32 %v1072_v5, %v657_v8 }
 0x102   : > { %v1036_v14 = vpop.f32.mrb[4].mxu0  ;;  %v724_v15 = vadd.f32 %v1075_v11, %v660_v12 }
 0x103   : > { %v1076_v16 = vpop.f32.mrb[4].mxu1  ;;  %v1037_v17 = vpop.f32.mrb[5].mxu0 }
 0x104   : > { %v1038_v18 = vadd.f32 %v1037_v17, %v1036_v14  ;;  %v1077_v19 = vpop.f32.mrb[5].mxu1  ;;  %v1039_v20 = vpop.f32.mrb[6].mxu0 }
 0x105   : > { %v1078_v21 = vadd.f32 %v1077_v19, %v1076_v16  ;;  %v1079_v22 = vpop.f32.mrb[6].mxu1  ;;  %v1040_v23 = vpop.f32.mrb[7].mxu0 }
 0x106   : > { %v665_v24 = vadd.f32 %v1038_v18, %v920_v0  ;;  %v1041_v25 = vadd.f32 %v1040_v23, %v1039_v20  ;;  %v1080_v26 = vpop.f32.mrb[7].mxu1 }
 0x107   : > { %v1081_v27 = vadd.f32 %v1080_v26, %v1079_v22 }
 0x108   : > { %v668_v28 = vadd.f32 %v1041_v25, %v920_v0  ;;  %v729_v29 = vadd.f32 %v1078_v21, %v665_v24 }
 0x10a   : > { %v1042_v30 = vpop.f32.mrb[8].mxu0  ;;  %v732_v31 = vadd.f32 %v1081_v27, %v668_v28 }
 0x10b   : > { %v1082_v32 = vpop.f32.mrb[8].mxu1  ;;  %v1043_v33 = vpop.f32.mrb[9].mxu0 }
 0x10c   : > { %v1044_v34 = vadd.f32 %v1043_v33, %v1042_v30  ;;  %v1083_v35 = vpop.f32.mrb[9].mxu1  ;;  %v1045_v36 = vpop.f32.mrb[10].mxu0 }
 0x10d   : > { %v1084_v37 = vadd.f32 %v1083_v35, %v1082_v32  ;;  %v1085_v38 = vpop.f32.mrb[10].mxu1  ;;  %v1046_v39 = vpop.f32.mrb[11].mxu0 }
 0x10e   : > { %v673_v40 = vadd.f32 %v1044_v34, %v920_v0  ;;  %v1047_v41 = vadd.f32 %v1046_v39, %v1045_v36  ;;  %v1086_v42 = vpop.f32.mrb[11].mxu1 }
 0x10f   : > { %v1087_v43 = vadd.f32 %v1086_v42, %v1085_v38 }
 0x110   : > { %v676_v44 = vadd.f32 %v1047_v41, %v920_v0  ;;  %v737_v45 = vadd.f32 %v1084_v37, %v673_v40 }
 0x112   : > { %v1048_v46 = vpop.f32.mrb[12].mxu0  ;;  %v740_v47 = vadd.f32 %v1087_v43, %v676_v44 }
 0x113   : > { %v1088_v48 = vpop.f32.mrb[12].mxu1  ;;  %v1049_v49 = vpop.f32.mrb[13].mxu0 }
 0x114   : > { %v1050_v50 = vadd.f32 %v1049_v49, %v1048_v46  ;;  %v1089_v51 = vpop.f32.mrb[13].mxu1  ;;  %v1051_v52 = vpop.f32.mrb[14].mxu0 }
 0x115   : > { %v1090_v53 = vadd.f32 %v1089_v51, %v1088_v48  ;;  %v1091_v54 = vpop.f32.mrb[14].mxu1  ;;  %v1052_v55 = vpop.f32.mrb[15].mxu0 }
 0x116   : > { %v681_v56 = vadd.f32 %v1050_v50, %v920_v0  ;;  %v1092_v57 = vpop.f32.mrb[15].mxu1 }
 0x118   : > { %v745_v58 = vadd.f32 %v1090_v53, %v681_v56 }
 0x11b   : > { %v1124_v59 = vpop.f32.mrb[16].mxu0 }
 0x11c   : > { %v793_v60 = vadd.f32 %v1124_v59, %v729_v29  ;;  %v1128_v61 = vpop.f32.mrb[16].mxu1  ;;  %v784_v62 = vpop.f32.mrb[17].mxu0 }
 0x11d   : > { %v809_v63 = vadd.f32 %v1128_v61, %v745_v58  ;;  %v785_v1 = vadd.f32 %v784_v62, %v721_v13  ;;  %v800_v2 = vpop.f32.mrb[17].mxu1  ;;  %v1125_v3 = vpop.f32.mrb[18].mxu0 }
 0x11e   : > { %v801_v4 = vadd.f32 %v800_v2, %v737_v45  ;;  %v796_v5 = vadd.f32 %v1125_v3, %v732_v31  ;;  %v1129_v6 = vpop.f32.mrb[18].mxu1  ;;  %v787_v7 = vpop.f32.mrb[19].mxu0  ;;  %v816_v11 = vmax.f32 %v793_v60, 0.0 }
 0x11f   : > { %v820_v8 = vmax.f32 %v809_v63, 0.0  ;;  %v788_v9 = vadd.f32 %v787_v7, %v724_v15  ;;  %v803_v10 = vpop.f32.mrb[19].mxu1  ;;  %v814_v16 = vmax.f32 %v785_v1, 0.0 }
 0x120   : > { %v817_v0 = vmax.f32 %v796_v5, 0.0  ;;  %v804_v12 = vadd.f32 %v803_v10, %v740_v47  ;;  %v818_v13 = vmax.f32 %v801_v4, 0.0 }
 0x121   : > { %v996_v14 = vpack.c.bf16 %v820_v8, %v820_v8  ;;  %v815_v17 = vmax.f32 %v788_v9, 0.0 }
 0x122   : > { %v1005_v18 = vpack.c.bf16 %v817_v0, %v816_v11  ;;  %v819_v19 = vmax.f32 %v804_v12, 0.0 }
 0x123   : > { %856 = vst [vmem:[%s175_s28 + $0x18] sm:$0xf] %v996_v14  ;;  %v1000_v20 = vpack.c.bf16 %v815_v17, %v814_v16 }
 0x124   : > { %1012 = vst [vmem:[%s175_s28 + $0x8] sm:$0xff] %v1005_v18   ;;  %v1010_v21 = vpack.c.bf16 %v819_v19, %v818_v13 }
 0x125   : > { %1001 = vst [vmem:[%s175_s28] sm:$0xff] %v1000_v20  }
 0x126   : > { %1013 = vst [vmem:[%s175_s28 + $0x10] sm:$0xff] %v1010_v21  }
 0x127 PF: > { %s13_s12 = sadd.s32 1, %s1227_s12  }
 0x128   : > { %p10_p4 = scmp.ge.s32.totalorder %s13_s12, 4  }
 0x12a   :  { %12 = sbr.rel (!%p10_p4) target bundleno = 1 (0x1), region = 62 }

// kernel: duelling_dqn_forward.7
= control target key start
LH: loop header
LB: loop body
LE: loop exit
PB: predicated region body
PF: predicated region fallthrough
CT: control target
= control target key end

     0   :  { %s4225_s24 = smov 0   ;;  %s4857_s0 = inlined_call_operand.vmem [shape: bf16[8,3200], index: 0, kind: input, shape index: {}]   ;;  %s4858_s1 = inlined_call_operand.vmem [shape: bf16[3200,1024], index: 1, kind: input, shape index: {}]   ;;  %s4859_s2 = inlined_call_operand.vmem [shape: f32[1,1024], index: 2, kind: input, shape index: {}]   ;;  %s4860_s3 = inlined_call_operand.vmem [shape: bf16[1024,128], index: 3, kind: input, shape index: {}]   ;;  %s4861_s4 = inlined_call_operand.vmem [shape: f32[1,128], index: 4, kind: input, shape index: {}]   ;;  %s4862_s5 = inlined_call_operand.vmem [shape: f32[8,1], index: 5, kind: output, shape index: {0}]   ;;  %s4863_s6 = inlined_call_operand.vmem [shape: f32[8,128], index: 6, kind: output, shape index: {1}]   ;;  %s4864_s7 = inlined_call_operand.vmem [shape: f32[8,128], index: 7, kind: output, shape index: {2}]  }
   0x1 LB: > { %s4231_s25 = sadd.s32 4294967295, %s4179_s24   ;;  %p3601_p0 = scmp.ge.s32.totalorder %s4179_s24, 1  ;;  %s4179_s24 = sphi %s4225_s24, %s18_s24  }
   0x2   : > { %p240_p1 = scmp.lt.s32.totalorder %s4179_s24, 6 }
   0x4   : > { %p241_p2 = pnand %p3601_p0, %p240_p1 }
   0x5   : > { %s273_s26 = smul.u32 (!%p241_p2), 5, %s4231_s25  ;;  %p3605_p5 = scmp.ne.s32.totalorder (!%p241_p2), %s4231_s25, 0 }
   0x6   : > { %244 = sbr.rel (%p241_p2) target bundleno = 1033 (0x409), region = 40 }
   0x7   : > { %s279_s27 = smul.u32 (!%p241_p2), 80, %s4231_s25  ;;  %p274_p3 = scmp.lt.s32.totalorder (!%p241_p2), %s273_s26, 24 }
   0x9   : > { %p280_p4 = scmp.lt.s32.totalorder (!%p241_p2), %s279_s27, 399 }
   0xd   : > { %s4866_s26 = smov (!%p274_p3, %s273_s26), 24  ;;  %s4868_s27 = smov (!%p280_p4, %s279_s27), 399 }
   0xe   : > { %s3602_s28 = sshll.u32 %s4866_s26, 2  ;;  %s3999_s9 = sshll.u32 %s4868_s27, 5  ;;  %v4181_v0 = vmov (!%p3605_p5), 0.0  }
   0xf   : > { %s4240_s8 = scalar_lea.vmem %s4857_s0, %s3602_s28  ;;  %s4245_s12 = scalar_lea.vmem %s4858_s1, %s3999_s9  ;;  %291 = vst [vmem:[#allocation2] sm:$0xff] (!%p3605_p5), %v4181_v0  ;;  %292 = vst [vmem:[#allocation2 + $0x8] sm:$0xff] (!%p3605_p5), %v4181_v0 }
  0x10   : > { %290 = sbr.rel (%p3605_p5) target bundleno = 23 (0x17), region = 44  ;;  %293 = vst [vmem:[#allocation2 + $0x10] sm:$0xff] (!%p3605_p5), %v4181_v0  ;;  %294 = vst [vmem:[#allocation2 + $0x18] sm:$0xff] (!%p3605_p5), %v4181_v0 }
  0x11   : > { %295 = vst [vmem:[#allocation2 + $0x20] sm:$0xff] (!%p3605_p5), %v4181_v0  ;;  %296 = vst [vmem:[#allocation2 + $0x28] sm:$0xff] (!%p3605_p5), %v4181_v0 }
  0x12   : > { %297 = vst [vmem:[#allocation2 + $0x30] sm:$0xff] (!%p3605_p5), %v4181_v0  ;;  %298 = vst [vmem:[#allocation2 + $0x38] sm:$0xff] (!%p3605_p5), %v4181_v0 }
  0x17 PF: > { %v310_v1 = vld [vmem:[%s4245_s12] sm:$0xff]  ;;  %v4280_v55 = vld [vmem:[%s4240_s8 + $0x8] sm:$0xff]  ;;  %p3931_p6 = scmp.ne.s32.totalorder %s4231_s25, 4 }
  0x18   : > { %v314_v2 = vld [vmem:[%s4245_s12 + $0x20] sm:$0xff]  ;;  %v4290_v60 = vcombine.high %v4280_v55, %v4280_v55  ;;  %s4184_s15 = smov (!%p3931_p6), 1   ;;  %vm3542_vm3 = vcmask (!%p3931_p6), 7168  }
  0x19   : > { %v438_v3 = vld [vmem:[%s4245_s12 + $0x400] sm:$0xff]  ;;  %v3612_v4 = vcombine.high %v310_v1, %v314_v2  ;;  %v3611_v6 = vcombine.low %v310_v1, %v314_v2 }
  0x1a   : > { %v442_v5 = vld [vmem:[%s4245_s12 + $0x420] sm:$0xff]  ;;  %2321 = vmatprep.mubr.bf16.mxu1 %v4290_v60 }
  0x1b   : > { %v318_v7 = vld [vmem:[%s4245_s12 + $0x40] sm:$0xff]  ;;  %v3740_v9 = vcombine.high %v438_v3, %v442_v5  ;;  %v3739_v10 = vcombine.low %v438_v3, %v442_v5  ;;  %2248 = vmatprep.subr.bf16.mxu0 %v3612_v4 }
  0x1c   : > { %v322_v8 = vld [vmem:[%s4245_s12 + $0x60] sm:$0xff]  ;;  %2249 = vmatpush1.bf16.msra.mxu0 %v3611_v6 }
  0x1d   : > { %v3620_v11 = vcombine.high %v318_v7, %v322_v8  ;;  %v446_v12 = vld [vmem:[%s4245_s12 + $0x440] sm:$0xff]  ;;  %2289 = vmatprep.subr.bf16.mxu1 %v3740_v9  ;;  %v3619_v19 = vcombine.low %v318_v7, %v322_v8 }
  0x1e   : > { %v450_v13 = vld [vmem:[%s4245_s12 + $0x460] sm:$0xff]  ;;  %2290 = vmatpush1.bf16.msra.mxu1 %v3739_v10 }
  0x1f   : > { %v326_v14 = vld [vmem:[%s4245_s12 + $0x80] sm:$0xff]  ;;  %v3748_v15 = vcombine.high %v446_v12, %v450_v13  ;;  %2250 = vmatprep.subr.bf16.mxu0 %v3620_v11  ;;  %v3747_v20 = vcombine.low %v446_v12, %v450_v13 }
  0x20   : > { %v330_v16 = vld [vmem:[%s4245_s12 + $0xa0] sm:$0xff]  ;;  %2251 = vmatpush1.bf16.msra.mxu0 %v3619_v19 }
  0x21   : > { %v454_v17 = vld [vmem:[%s4245_s12 + $0x480] sm:$0xff]  ;;  %v3628_v21 = vcombine.high %v326_v14, %v330_v16  ;;  %2291 = vmatprep.subr.bf16.mxu1 %v3748_v15  ;;  %v3627_v27 = vcombine.low %v326_v14, %v330_v16 }
  0x22   : > { %v458_v18 = vld [vmem:[%s4245_s12 + $0x4a0] sm:$0xff]  ;;  %2292 = vmatpush1.bf16.msra.mxu1 %v3747_v20 }
  0x23   : > { %v3756_v22 = vcombine.high %v454_v17, %v458_v18  ;;  %v334_v23 = vld [vmem:[%s4245_s12 + $0xc0] sm:$0xff]  ;;  %2252 = vmatprep.subr.bf16.mxu0 %v3628_v21  ;;  %v3755_v28 = vcombine.low %v454_v17, %v458_v18 }
  0x24   : > { %v338_v24 = vld [vmem:[%s4245_s12 + $0xe0] sm:$0xff]  ;;  %2253 = vmatpush1.bf16.msra.mxu0 %v3627_v27 }
  0x25   : > { %v462_v25 = vld [vmem:[%s4245_s12 + $0x4c0] sm:$0xff]  ;;  %v3636_v29 = vcombine.high %v334_v23, %v338_v24  ;;  %2293 = vmatprep.subr.bf16.mxu1 %v3756_v22  ;;  %v3635_v35 = vcombine.low %v334_v23, %v338_v24 }
  0x26   : > { %v466_v26 = vld [vmem:[%s4245_s12 + $0x4e0] sm:$0xff]  ;;  %2294 = vmatpush1.bf16.msra.mxu1 %v3755_v28 }
  0x27   : > { %v3764_v30 = vcombine.high %v462_v25, %v466_v26  ;;  %v342_v31 = vld [vmem:[%s4245_s12 + $0x100] sm:$0xff]  ;;  %2254 = vmatprep.subr.bf16.mxu0 %v3636_v29  ;;  %v3763_v36 = vcombine.low %v462_v25, %v466_v26 }
  0x28   : > { %v346_v32 = vld [vmem:[%s4245_s12 + $0x120] sm:$0xff]  ;;  %2255 = vmatpush1.bf16.msra.mxu0 %v3635_v35 }
  0x29   : > { %v470_v33 = vld [vmem:[%s4245_s12 + $0x500] sm:$0xff]  ;;  %v3644_v37 = vcombine.high %v342_v31, %v346_v32  ;;  %2295 = vmatprep.subr.bf16.mxu1 %v3764_v30  ;;  %v3643_v43 = vcombine.low %v342_v31, %v346_v32 }
  0x2a   : > { %v474_v34 = vld [vmem:[%s4245_s12 + $0x520] sm:$0xff]  ;;  %2296 = vmatpush1.bf16.msra.mxu1 %v3763_v36 }
  0x2b   : > { %v3772_v38 = vcombine.high %v470_v33, %v474_v34  ;;  %v350_v39 = vld [vmem:[%s4245_s12 + $0x140] sm:$0xff]  ;;  %2256 = vmatprep.subr.bf16.mxu0 %v3644_v37  ;;  %v3771_v44 = vcombine.low %v470_v33, %v474_v34 }
  0x2c   : > { %v354_v40 = vld [vmem:[%s4245_s12 + $0x160] sm:$0xff]  ;;  %2257 = vmatpush1.bf16.msra.mxu0 %v3643_v43 }
  0x2d   : > { %v478_v41 = vld [vmem:[%s4245_s12 + $0x540] sm:$0xff]  ;;  %v3652_v45 = vcombine.high %v350_v39, %v354_v40  ;;  %2297 = vmatprep.subr.bf16.mxu1 %v3772_v38  ;;  %v3651_v51 = vcombine.low %v350_v39, %v354_v40 }
  0x2e   : > { %v482_v42 = vld [vmem:[%s4245_s12 + $0x560] sm:$0xff]  ;;  %2298 = vmatpush1.bf16.msra.mxu1 %v3771_v44 }
  0x2f   : > { %v3780_v46 = vcombine.high %v478_v41, %v482_v42  ;;  %v358_v47 = vld [vmem:[%s4245_s12 + $0x180] sm:$0xff]  ;;  %2258 = vmatprep.subr.bf16.mxu0 %v3652_v45  ;;  %v3779_v52 = vcombine.low %v478_v41, %v482_v42 }
  0x30   : > { %v362_v48 = vld [vmem:[%s4245_s12 + $0x1a0] sm:$0xff]  ;;  %2259 = vmatpush1.bf16.msra.mxu0 %v3651_v51 }
  0x31   : > { %v486_v49 = vld [vmem:[%s4245_s12 + $0x580] sm:$0xff]  ;;  %v3660_v53 = vcombine.high %v358_v47, %v362_v48  ;;  %2299 = vmatprep.subr.bf16.mxu1 %v3780_v46  ;;  %v3659_v63 = vcombine.low %v358_v47, %v362_v48 }
  0x32   : > { %v490_v50 = vld [vmem:[%s4245_s12 + $0x5a0] sm:$0xff]  ;;  %2300 = vmatpush1.bf16.msra.mxu1 %v3779_v52 }
  0x33   : > { %v4277_v54 = vld [vmem:[%s4240_s8] sm:$0xff]  ;;  %v3788_v56 = vcombine.high %v486_v49, %v490_v50  ;;  %2260 = vmatprep.subr.bf16.mxu0 %v3660_v53  ;;  %v3787_v0 = vcombine.low %v486_v49, %v490_v50 }
  0x34   : > { %v366_v57 = vld [vmem:[%s4245_s12 + $0x1c0] sm:$0xff]  ;;  %v4286_v59 = vcombine.high %v4277_v54, %v4277_v54  ;;  %2261 = vmatpush1.bf16.msra.mxu0 %v3659_v63 }
  0x35   : > { %v370_v58 = vld [vmem:[%s4245_s12 + $0x1e0] sm:$0xff]  ;;  %2301 = vmatprep.subr.bf16.mxu1 %v3788_v56 }
  0x36   : > { %v494_v61 = vld [vmem:[%s4245_s12 + $0x5c0] sm:$0xff]  ;;  %2280 = vmatprep.mubr.bf16.mxu0 %v4286_v59  ;;  %v3668_v1 = vcombine.high %v366_v57, %v370_v58  ;;  %v3667_v7 = vcombine.low %v366_v57, %v370_v58  ;;  %2302 = vmatpush1.bf16.msra.mxu1 %v3787_v0 }
  0x37   : > { %v498_v62 = vld [vmem:[%s4245_s12 + $0x5e0] sm:$0xff] }
  0x38   : > { %v3796_v2 = vcombine.high %v494_v61, %v498_v62  ;;  %v374_v3 = vld [vmem:[%s4245_s12 + $0x200] sm:$0xff]  ;;  %2262 = vmatprep.subr.bf16.mxu0 %v3668_v1  ;;  %v3795_v8 = vcombine.low %v494_v61, %v498_v62 }
  0x39   : > { %v378_v4 = vld [vmem:[%s4245_s12 + $0x220] sm:$0xff]  ;;  %2263 = vmatpush1.bf16.msra.mxu0 %v3667_v7 }
  0x3a   : > { %v502_v5 = vld [vmem:[%s4245_s12 + $0x600] sm:$0xff]  ;;  %v3676_v9 = vcombine.high %v374_v3, %v378_v4  ;;  %2303 = vmatprep.subr.bf16.mxu1 %v3796_v2  ;;  %v3675_v15 = vcombine.low %v374_v3, %v378_v4 }
  0x3b   : > { %v506_v6 = vld [vmem:[%s4245_s12 + $0x620] sm:$0xff]  ;;  %2304 = vmatpush1.bf16.msra.mxu1 %v3795_v8 }
  0x3c   : > { %v3804_v10 = vcombine.high %v502_v5, %v506_v6  ;;  %v382_v11 = vld [vmem:[%s4245_s12 + $0x240] sm:$0xff]  ;;  %2264 = vmatprep.subr.bf16.mxu0 %v3676_v9  ;;  %v3803_v16 = vcombine.low %v502_v5, %v506_v6  ;;  %v311_v9 = vld [vmem:[%s4245_s12 + $0x8] sm:$0xff] }
  0x3d   : > { %v386_v12 = vld [vmem:[%s4245_s12 + $0x260] sm:$0xff]  ;;  %2265 = vmatpush1.bf16.msra.mxu0 %v3675_v15 }
  0x3e   : > { %v510_v13 = vld [vmem:[%s4245_s12 + $0x640] sm:$0xff]  ;;  %v3684_v17 = vcombine.high %v382_v11, %v386_v12  ;;  %2305 = vmatprep.subr.bf16.mxu1 %v3804_v10  ;;  %v3683_v23 = vcombine.low %v382_v11, %v386_v12  ;;  %v315_v10 = vld [vmem:[%s4245_s12 + $0x28] sm:$0xff] }
  0x3f   : > { %v514_v14 = vld [vmem:[%s4245_s12 + $0x660] sm:$0xff]  ;;  %2306 = vmatpush1.bf16.msra.mxu1 %v3803_v16 }
  0x40   : > { %v3812_v18 = vcombine.high %v510_v13, %v514_v14  ;;  %v390_v19 = vld [vmem:[%s4245_s12 + $0x280] sm:$0xff]  ;;  %2266 = vmatprep.subr.bf16.mxu0 %v3684_v17  ;;  %v3811_v24 = vcombine.low %v510_v13, %v514_v14  ;;  %v3614_v14 = vcombine.high %v311_v9, %v315_v10  ;;  %v4336_v17 = vcombine.low %v4277_v54, %v4277_v54 }
  0x41   : > { %v394_v20 = vld [vmem:[%s4245_s12 + $0x2a0] sm:$0xff]  ;;  %2267 = vmatpush1.bf16.msra.mxu0 %v3683_v23 }
  0x42   : > { %v518_v21 = vld [vmem:[%s4245_s12 + $0x680] sm:$0xff]  ;;  %v3692_v25 = vcombine.high %v390_v19, %v394_v20  ;;  %2307 = vmatprep.subr.bf16.mxu1 %v3812_v18  ;;  %v3691_v31 = vcombine.low %v390_v19, %v394_v20  ;;  %v319_v18 = vld [vmem:[%s4245_s12 + $0x48] sm:$0xff]  ;;  %v4342_v20 = vcombine.low %v4280_v55, %v4280_v55 }
  0x43   : > { %v522_v22 = vld [vmem:[%s4245_s12 + $0x6a0] sm:$0xff]  ;;  %2308 = vmatpush1.bf16.msra.mxu1 %v3811_v24  ;;  %v323_v19 = vld [vmem:[%s4245_s12 + $0x68] sm:$0xff] }
  0x44   : > { %v3820_v26 = vcombine.high %v518_v21, %v522_v22  ;;  %v398_v27 = vld [vmem:[%s4245_s12 + $0x2c0] sm:$0xff]  ;;  %2268 = vmatprep.subr.bf16.mxu0 %v3692_v25  ;;  %v3819_v32 = vcombine.low %v518_v21, %v522_v22  ;;  %v3613_v22 = vcombine.low %v311_v9, %v315_v10  ;;  %v3622_v24 = vcombine.high %v319_v18, %v323_v19 }
  0x45   : > { %v402_v28 = vld [vmem:[%s4245_s12 + $0x2e0] sm:$0xff]  ;;  %2269 = vmatpush1.bf16.msra.mxu0 %v3691_v31 }
  0x46   : > { %v526_v29 = vld [vmem:[%s4245_s12 + $0x6c0] sm:$0xff]  ;;  %v3700_v33 = vcombine.high %v398_v27, %v402_v28  ;;  %2309 = vmatprep.subr.bf16.mxu1 %v3820_v26  ;;  %v3699_v39 = vcombine.low %v398_v27, %v402_v28  ;;  %v327_v26 = vld [vmem:[%s4245_s12 + $0x88] sm:$0xff]  ;;  %v3621_v28 = vcombine.low %v319_v18, %v323_v19 }
  0x47   : > { %v530_v30 = vld [vmem:[%s4245_s12 + $0x6e0] sm:$0xff]  ;;  %2310 = vmatpush1.bf16.msra.mxu1 %v3819_v32  ;;  %v331_v27 = vld [vmem:[%s4245_s12 + $0xa8] sm:$0xff] }
  0x48   : > { %v3828_v34 = vcombine.high %v526_v29, %v530_v30  ;;  %v406_v35 = vld [vmem:[%s4245_s12 + $0x300] sm:$0xff]  ;;  %2270 = vmatprep.subr.bf16.mxu0 %v3700_v33  ;;  %v3827_v40 = vcombine.low %v526_v29, %v530_v30  ;;  %v3630_v30 = vcombine.high %v327_v26, %v331_v27  ;;  %v4182_v33 = vmov 0  }
  0x49   : > { %v410_v36 = vld [vmem:[%s4245_s12 + $0x320] sm:$0xff]  ;;  %2271 = vmatpush1.bf16.msra.mxu0 %v3699_v39 }
  0x4a   : > { %v534_v37 = vld [vmem:[%s4245_s12 + $0x700] sm:$0xff]  ;;  %v3708_v41 = vcombine.high %v406_v35, %v410_v36  ;;  %2311 = vmatprep.subr.bf16.mxu1 %v3828_v34  ;;  %v3707_v47 = vcombine.low %v406_v35, %v410_v36  ;;  %v335_v34 = vld [vmem:[%s4245_s12 + $0xc8] sm:$0xff] }
  0x4b   : > { %v538_v38 = vld [vmem:[%s4245_s12 + $0x720] sm:$0xff]  ;;  %2312 = vmatpush1.bf16.msra.mxu1 %v3827_v40  ;;  %v339_v35 = vld [vmem:[%s4245_s12 + $0xe8] sm:$0xff] }
  0x4c   : > { %v3836_v42 = vcombine.high %v534_v37, %v538_v38  ;;  %v414_v43 = vld [vmem:[%s4245_s12 + $0x340] sm:$0xff]  ;;  %2272 = vmatprep.subr.bf16.mxu0 %v3708_v41  ;;  %v3835_v48 = vcombine.low %v534_v37, %v538_v38  ;;  %v3629_v37 = vcombine.low %v327_v26, %v331_v27  ;;  %v3638_v39 = vcombine.high %v335_v34, %v339_v35 }
  0x4d   : > { %v418_v44 = vld [vmem:[%s4245_s12 + $0x360] sm:$0xff]  ;;  %2273 = vmatpush1.bf16.msra.mxu0 %v3707_v47 }
  0x4e   : > { %v542_v45 = vld [vmem:[%s4245_s12 + $0x740] sm:$0xff]  ;;  %v3716_v49 = vcombine.high %v414_v43, %v418_v44  ;;  %2313 = vmatprep.subr.bf16.mxu1 %v3836_v42  ;;  %v3715_v57 = vcombine.low %v414_v43, %v418_v44  ;;  %v343_v42 = vld [vmem:[%s4245_s12 + $0x108] sm:$0xff] }
  0x4f   : > { %v546_v46 = vld [vmem:[%s4245_s12 + $0x760] sm:$0xff]  ;;  %2314 = vmatpush1.bf16.msra.mxu1 %v3835_v48  ;;  %v347_v43 = vld [vmem:[%s4245_s12 + $0x128] sm:$0xff] }
  0x50   : > { %v3844_v50 = vcombine.high %v542_v45, %v546_v46  ;;  %v422_v51 = vld [vmem:[%s4245_s12 + $0x380] sm:$0xff]  ;;  %2274 = vmatprep.subr.bf16.mxu0 %v3716_v49  ;;  %v3843_v58 = vcombine.low %v542_v45, %v546_v46  ;;  %v3637_v45 = vcombine.low %v335_v34, %v339_v35  ;;  %v3646_v47 = vcombine.high %v343_v42, %v347_v43 }
  0x51   : > { %v426_v52 = vld [vmem:[%s4245_s12 + $0x3a0] sm:$0xff]  ;;  %2275 = vmatpush1.bf16.msra.mxu0 %v3715_v57 }
  0x52   : > { %v550_v53 = vld [vmem:[%s4245_s12 + $0x780] sm:$0xff]  ;;  %v3724_v61 = vcombine.high %v422_v51, %v426_v52  ;;  %2315 = vmatprep.subr.bf16.mxu1 %v3844_v50  ;;  %v3723_v3 = vcombine.low %v422_v51, %v426_v52  ;;  %v351_v50 = vld [vmem:[%s4245_s12 + $0x148] sm:$0xff] }
  0x53   : > { %v554_v56 = vld [vmem:[%s4245_s12 + $0x7a0] sm:$0xff]  ;;  %2316 = vmatpush1.bf16.msra.mxu1 %v3843_v58  ;;  %v355_v51 = vld [vmem:[%s4245_s12 + $0x168] sm:$0xff] }
  0x54   : > { %v3852_v62 = vcombine.high %v550_v53, %v554_v56  ;;  %v430_v63 = vld [vmem:[%s4245_s12 + $0x3c0] sm:$0xff]  ;;  %2276 = vmatprep.subr.bf16.mxu0 %v3724_v61  ;;  %v3851_v4 = vcombine.low %v550_v53, %v554_v56  ;;  %v3645_v53 = vcombine.low %v343_v42, %v347_v43  ;;  %v3654_v57 = vcombine.high %v351_v50, %v355_v51 }
  0x55   : > { %v434_v0 = vld [vmem:[%s4245_s12 + $0x3e0] sm:$0xff]  ;;  %2277 = vmatpush1.bf16.msra.mxu0 %v3723_v3 }
  0x56   : > { %v558_v1 = vld [vmem:[%s4245_s12 + $0x7c0] sm:$0xff]  ;;  %v3732_v5 = vcombine.high %v430_v63, %v434_v0  ;;  %2317 = vmatprep.subr.bf16.mxu1 %v3852_v62  ;;  %v3731_v11 = vcombine.low %v430_v63, %v434_v0  ;;  %v359_v62 = vld [vmem:[%s4245_s12 + $0x188] sm:$0xff] }
  0x57   : > { %v562_v2 = vld [vmem:[%s4245_s12 + $0x7e0] sm:$0xff]  ;;  %2318 = vmatpush1.bf16.msra.mxu1 %v3851_v4  ;;  %v363_v63 = vld [vmem:[%s4245_s12 + $0x1a8] sm:$0xff] }
  0x58   : > { %v3860_v6 = vcombine.high %v558_v1, %v562_v2  ;;  %v566_v7 = vld [vmem:[%s4245_s12 + $0x800] sm:$0xff]  ;;  %2278 = vmatprep.subr.bf16.mxu0 %v3732_v5  ;;  %v3859_v12 = vcombine.low %v558_v1, %v562_v2  ;;  %v3653_v1 = vcombine.low %v351_v50, %v355_v51  ;;  %v3662_v3 = vcombine.high %v359_v62, %v363_v63 }
  0x59   : > { %v570_v8 = vld [vmem:[%s4245_s12 + $0x820] sm:$0xff]  ;;  %2279 = vmatpush1.bf16.msra.mxu0 %v3731_v11  ;;  %v3661_v9 = vcombine.low %v359_v62, %v363_v63 }
  0x5a   : > { %v3868_v13 = vcombine.high %v566_v7, %v570_v8  ;;  %2319 = vmatprep.subr.bf16.mxu1 %v3860_v6  ;;  %v574_v15 = vld [vmem:[%s4245_s12 + $0x840] sm:$0xff]  ;;  %v3867_v21 = vcombine.low %v566_v7, %v570_v8  ;;  %v367_v6 = vld [vmem:[%s4245_s12 + $0x1c8] sm:$0xff] }
  0x5b   : > { %v578_v16 = vld [vmem:[%s4245_s12 + $0x860] sm:$0xff]  ;;  %2320 = vmatpush1.bf16.msra.mxu1 %v3859_v12  ;;  %v371_v7 = vld [vmem:[%s4245_s12 + $0x1e8] sm:$0xff] }
  0x5c   : > { %2330 = vmatprep.subr.bf16.mxu0 %v3868_v13  ;;  %v3876_v23 = vcombine.high %v574_v15, %v578_v16  ;;  %2371 = vmatprep.subr.bf16.mxu1 %v3614_v14  ;;  %v582_v25 = vld [vmem:[%s4245_s12 + $0x880] sm:$0xff]  ;;  %v3875_v55 = vcombine.low %v574_v15, %v578_v16  ;;  %v3670_v11 = vcombine.high %v367_v6, %v371_v7  ;;  %v439_v12 = vld [vmem:[%s4245_s12 + $0x408] sm:$0xff] }
  0x5d   : > { %v586_v54 = vld [vmem:[%s4245_s12 + $0x8a0] sm:$0xff]  ;;  %2281 = vmatmul.mubr.bf16.vlgmr.msra.gmra.mrb[0].mxu0 %v4336_v17  ;;  %v443_v13 = vld [vmem:[%s4245_s12 + $0x428] sm:$0xff]  ;;  %v3669_v18 = vcombine.low %v367_v6, %v371_v7 }
  0x5e   : > { %2322 = vmatmul.mubr.bf16.vlgmr.msra.gmra.mrb[0].mxu1 %v4342_v20  ;;  %2331 = vmatpush1.bf16.msra.mxu0 %v3867_v21  ;;  %v3884_v29 = vcombine.high %v582_v25, %v586_v54  ;;  %v590_v31 = vld [vmem:[%s4245_s12 + $0x8c0] sm:$0xff]  ;;  %v3883_v36 = vcombine.low %v582_v25, %v586_v54  ;;  %v375_v14 = vld [vmem:[%s4245_s12 + $0x208] sm:$0xff]  ;;  %v3742_v19 = vcombine.high %v439_v12, %v443_v13 }
  0x5f   : > { %2372 = vmatpush1.bf16.msra.mxu1 %v3613_v22  ;;  %2332 = vmatprep.subr.bf16.mxu0 %v3876_v23  ;;  %v594_v32 = vld [vmem:[%s4245_s12 + $0x8e0] sm:$0xff]  ;;  %v379_v15 = vld [vmem:[%s4245_s12 + $0x228] sm:$0xff]  ;;  %v3741_v26 = vcombine.low %v439_v12, %v443_v13 }
  0x60   : > { %2373 = vmatprep.subr.bf16.mxu1 %v3622_v24  ;;  %2362 = vmatprep.mubr.bf16.mxu0 %v4182_v33  ;;  %v3892_v38 = vcombine.high %v590_v31, %v594_v32  ;;  %v598_v40 = vld [vmem:[%s4245_s12 + $0x900] sm:$0xff]  ;;  %v3891_v44 = vcombine.low %v590_v31, %v594_v32  ;;  %v3678_v21 = vcombine.high %v375_v14, %v379_v15  ;;  %v447_v22 = vld [vmem:[%s4245_s12 + $0x448] sm:$0xff]  ;;  %v4379_v24 = vld [vmem:[%s4240_s8 + $0x10] ss:$0 sps:$4 sm:$0xff]  }
  0x61   : > { %2403 = vmatprep.mubr.bf16.mxu1 %v4286_v59  ;;  %v602_v41 = vld [vmem:[%s4245_s12 + $0x920] sm:$0xff]  ;;  %v451_v23 = vld [vmem:[%s4245_s12 + $0x468] sm:$0xff]  ;;  %v3677_v27 = vcombine.low %v375_v14, %v379_v15 }
  0x62   : > { %2333 = vmatpush1.bf16.msra.mxu0 %v3875_v55  ;;  %v3900_v46 = vcombine.high %v598_v40, %v602_v41  ;;  %v606_v48 = vld [vmem:[%s4245_s12 + $0x940] sm:$0xff]  ;;  %v3899_v52 = vcombine.low %v598_v40, %v602_v41  ;;  %v383_v25 = vld [vmem:[%s4245_s12 + $0x248] sm:$0xff]  ;;  %v3750_v55 = vcombine.high %v447_v22, %v451_v23  ;;  %v3749_v34 = vcombine.low %v447_v22, %v451_v23 }
  0x63   : > { %2374 = vmatpush1.bf16.msra.mxu1 %v3621_v28  ;;  %2334 = vmatprep.subr.bf16.mxu0 %v3884_v29  ;;  %v610_v49 = vld [vmem:[%s4245_s12 + $0x960] sm:$0xff]  ;;  %v387_v54 = vld [vmem:[%s4245_s12 + $0x268] sm:$0xff] }
  0x64   : > { %2375 = vmatprep.subr.bf16.mxu1 %v3630_v30  ;;  %v3908_v56 = vcombine.high %v606_v48, %v610_v49  ;;  %v614_v58 = vld [vmem:[%s4245_s12 + $0x980] sm:$0xff]  ;;  %v3907_v0 = vcombine.low %v606_v48, %v610_v49  ;;  %v3686_v28 = vcombine.high %v383_v25, %v387_v54  ;;  %v455_v29 = vld [vmem:[%s4245_s12 + $0x488] sm:$0xff]  ;;  %v3685_v35 = vcombine.low %v383_v25, %v387_v54 }
  0x65   : > { %v618_v61 = vld [vmem:[%s4245_s12 + $0x9a0] sm:$0xff]  ;;  %v459_v30 = vld [vmem:[%s4245_s12 + $0x4a8] sm:$0xff] }
  0x66   : > { %2335 = vmatpush1.bf16.msra.mxu0 %v3883_v36  ;;  %v3916_v2 = vcombine.high %v614_v58, %v618_v61  ;;  %v622_v4 = vld [vmem:[%s4245_s12 + $0x9c0] sm:$0xff]  ;;  %v3915_v8 = vcombine.low %v614_v58, %v618_v61  ;;  %v391_v31 = vld [vmem:[%s4245_s12 + $0x288] sm:$0xff]  ;;  %v3758_v36 = vcombine.high %v455_v29, %v459_v30  ;;  %v3757_v42 = vcombine.low %v455_v29, %v459_v30 }
  0x67   : > { %2376 = vmatpush1.bf16.msra.mxu1 %v3629_v37  ;;  %2336 = vmatprep.subr.bf16.mxu0 %v3892_v38  ;;  %v626_v5 = vld [vmem:[%s4245_s12 + $0x9e0] sm:$0xff]  ;;  %v395_v32 = vld [vmem:[%s4245_s12 + $0x2a8] sm:$0xff] }
  0x68   : > { %2377 = vmatprep.subr.bf16.mxu1 %v3638_v39  ;;  %v3924_v10 = vcombine.high %v622_v4, %v626_v5  ;;  %v3923_v16 = vcombine.low %v622_v4, %v626_v5  ;;  %v3694_v37 = vcombine.high %v391_v31, %v395_v32  ;;  %v463_v38 = vld [vmem:[%s4245_s12 + $0x4c8] sm:$0xff]  ;;  %v3693_v43 = vcombine.low %v391_v31, %v395_v32 }
  0x69   : > { %v467_v39 = vld [vmem:[%s4245_s12 + $0x4e8] sm:$0xff] }
  0x6a   : > { %2337 = vmatpush1.bf16.msra.mxu0 %v3891_v44  ;;  %v399_v40 = vld [vmem:[%s4245_s12 + $0x2c8] sm:$0xff]  ;;  %v3766_v44 = vcombine.high %v463_v38, %v467_v39  ;;  %v3765_v50 = vcombine.low %v463_v38, %v467_v39 }
  0x6b   : > { %2378 = vmatpush1.bf16.msra.mxu1 %v3637_v45  ;;  %2338 = vmatprep.subr.bf16.mxu0 %v3900_v46  ;;  %v403_v41 = vld [vmem:[%s4245_s12 + $0x2e8] sm:$0xff] }
  0x6c   : > { %2379 = vmatprep.subr.bf16.mxu1 %v3646_v47  ;;  %v3702_v45 = vcombine.high %v399_v40, %v403_v41  ;;  %v471_v46 = vld [vmem:[%s4245_s12 + $0x508] sm:$0xff]  ;;  %v3701_v51 = vcombine.low %v399_v40, %v403_v41 }
  0x6d   : > { %v475_v47 = vld [vmem:[%s4245_s12 + $0x528] sm:$0xff] }
  0x6e   : > { %2339 = vmatpush1.bf16.msra.mxu0 %v3899_v52  ;;  %v407_v48 = vld [vmem:[%s4245_s12 + $0x308] sm:$0xff]  ;;  %v3774_v52 = vcombine.high %v471_v46, %v475_v47  ;;  %v3773_v62 = vcombine.low %v471_v46, %v475_v47 }
  0x6f   : > { %2380 = vmatpush1.bf16.msra.mxu1 %v3645_v53  ;;  %2340 = vmatprep.subr.bf16.mxu0 %v3908_v56  ;;  %v411_v49 = vld [vmem:[%s4245_s12 + $0x328] sm:$0xff] }
  0x70   : > { %2381 = vmatprep.subr.bf16.mxu1 %v3654_v57  ;;  %v3710_v53 = vcombine.high %v407_v48, %v411_v49  ;;  %v479_v56 = vld [vmem:[%s4245_s12 + $0x548] sm:$0xff]  ;;  %v3709_v63 = vcombine.low %v407_v48, %v411_v49 }
  0x71   : > { %v483_v57 = vld [vmem:[%s4245_s12 + $0x568] sm:$0xff] }
  0x72   : > { %2341 = vmatpush1.bf16.msra.mxu0 %v3907_v0  ;;  %v415_v58 = vld [vmem:[%s4245_s12 + $0x348] sm:$0xff]  ;;  %v3782_v0 = vcombine.high %v479_v56, %v483_v57  ;;  %v3781_v6 = vcombine.low %v479_v56, %v483_v57 }
  0x73   : > { %2382 = vmatpush1.bf16.msra.mxu1 %v3653_v1  ;;  %2342 = vmatprep.subr.bf16.mxu0 %v3916_v2  ;;  %v419_v61 = vld [vmem:[%s4245_s12 + $0x368] sm:$0xff] }
  0x74   : > { %2383 = vmatprep.subr.bf16.mxu1 %v3662_v3  ;;  %v3718_v1 = vcombine.high %v415_v58, %v419_v61  ;;  %v487_v2 = vld [vmem:[%s4245_s12 + $0x588] sm:$0xff]  ;;  %v3717_v7 = vcombine.low %v415_v58, %v419_v61 }
  0x75   : > { %v491_v3 = vld [vmem:[%s4245_s12 + $0x5a8] sm:$0xff] }
  0x76   : > { %2343 = vmatpush1.bf16.msra.mxu0 %v3915_v8  ;;  %v423_v4 = vld [vmem:[%s4245_s12 + $0x388] sm:$0xff]  ;;  %v3790_v8 = vcombine.high %v487_v2, %v491_v3  ;;  %v3789_v14 = vcombine.low %v487_v2, %v491_v3 }
  0x77   : > { %2384 = vmatpush1.bf16.msra.mxu1 %v3661_v9  ;;  %2344 = vmatprep.subr.bf16.mxu0 %v3924_v10  ;;  %v427_v5 = vld [vmem:[%s4245_s12 + $0x3a8] sm:$0xff] }
  0x78   : > { %2385 = vmatprep.subr.bf16.mxu1 %v3670_v11  ;;  %v3726_v9 = vcombine.high %v423_v4, %v427_v5  ;;  %v495_v10 = vld [vmem:[%s4245_s12 + $0x5c8] sm:$0xff]  ;;  %v3725_v15 = vcombine.low %v423_v4, %v427_v5 }
  0x79   : > { %v499_v11 = vld [vmem:[%s4245_s12 + $0x5e8] sm:$0xff] }
  0x7a   : > { %2345 = vmatpush1.bf16.msra.mxu0 %v3923_v16  ;;  %v431_v12 = vld [vmem:[%s4245_s12 + $0x3c8] sm:$0xff]  ;;  %v3798_v16 = vcombine.high %v495_v10, %v499_v11  ;;  %v3797_v25 = vcombine.low %v495_v10, %v499_v11 }
  0x7b   : > { %2386 = vmatpush1.bf16.msra.mxu1 %v3669_v18  ;;  %2412 = vmatprep.subr.bf16.mxu0 %v3742_v19  ;;  %v435_v13 = vld [vmem:[%s4245_s12 + $0x3e8] sm:$0xff] }
  0x7c   : > { %2387 = vmatprep.subr.bf16.mxu1 %v3678_v21  ;;  %v3734_v18 = vcombine.high %v431_v12, %v435_v13  ;;  %v503_v19 = vld [vmem:[%s4245_s12 + $0x608] sm:$0xff]  ;;  %v3733_v54 = vcombine.low %v431_v12, %v435_v13 }
  0x7d   : > { %2363 = vmatmul.mubr.bf16.vlgmr.msra.gmra.mrb[4].mxu0 %v4379_v24  ;;  %v507_v21 = vld [vmem:[%s4245_s12 + $0x628] sm:$0xff] }
  0x7e   : > { %2413 = vmatpush1.bf16.msra.mxu0 %v3741_v26  ;;  %2444 = vmatprep.mubr.bf16.mxu0 %v4290_v60  ;;  %v567_v22 = vld [vmem:[%s4245_s12 + $0x808] sm:$0xff]  ;;  %v3806_v26 = vcombine.high %v503_v19, %v507_v21  ;;  %v3805_v31 = vcombine.low %v503_v19, %v507_v21 }
  0x7f   : > { %2388 = vmatpush1.bf16.msra.mxu1 %v3677_v27  ;;  %2414 = vmatprep.subr.bf16.mxu0 %v3750_v55  ;;  %v571_v23 = vld [vmem:[%s4245_s12 + $0x828] sm:$0xff] }
  0x80   : > { %2389 = vmatprep.subr.bf16.mxu1 %v3686_v28  ;;  %v3870_v27 = vcombine.high %v567_v22, %v571_v23  ;;  %v511_v55 = vld [vmem:[%s4245_s12 + $0x648] sm:$0xff]  ;;  %v3869_v32 = vcombine.low %v567_v22, %v571_v23 }
  0x81   : > { %v515_v28 = vld [vmem:[%s4245_s12 + $0x668] sm:$0xff] }
  0x82   : > { %2415 = vmatpush1.bf16.msra.mxu0 %v3749_v34  ;;  %v575_v29 = vld [vmem:[%s4245_s12 + $0x848] sm:$0xff]  ;;  %v3814_v34 = vcombine.high %v511_v55, %v515_v28  ;;  %v3813_v40 = vcombine.low %v511_v55, %v515_v28  ;;  %v440_v55 = vld [vmem:[%s4245_s12 + $0x410] sm:$0xff] }
  0x83   : > { %2390 = vmatpush1.bf16.msra.mxu1 %v3685_v35  ;;  %2416 = vmatprep.subr.bf16.mxu0 %v3758_v36  ;;  %v579_v30 = vld [vmem:[%s4245_s12 + $0x868] sm:$0xff]  ;;  %v444_v28 = vld [vmem:[%s4245_s12 + $0x430] sm:$0xff] }
  0x84   : > { %2391 = vmatprep.subr.bf16.mxu1 %v3694_v37  ;;  %v3878_v35 = vcombine.high %v575_v29, %v579_v30  ;;  %v519_v36 = vld [vmem:[%s4245_s12 + $0x688] sm:$0xff]  ;;  %v3877_v41 = vcombine.low %v575_v29, %v579_v30 }
  0x85   : > { %v523_v37 = vld [vmem:[%s4245_s12 + $0x6a8] sm:$0xff] }
  0x86   : > { %2417 = vmatpush1.bf16.msra.mxu0 %v3757_v42  ;;  %v583_v38 = vld [vmem:[%s4245_s12 + $0x888] sm:$0xff]  ;;  %v3822_v42 = vcombine.high %v519_v36, %v523_v37  ;;  %v3821_v48 = vcombine.low %v519_v36, %v523_v37  ;;  %v448_v36 = vld [vmem:[%s4245_s12 + $0x450] sm:$0xff] }
  0x87   : > { %2392 = vmatpush1.bf16.msra.mxu1 %v3693_v43  ;;  %2418 = vmatprep.subr.bf16.mxu0 %v3766_v44  ;;  %v587_v39 = vld [vmem:[%s4245_s12 + $0x8a8] sm:$0xff]  ;;  %v452_v37 = vld [vmem:[%s4245_s12 + $0x470] sm:$0xff] }
  0x88   : > { %2393 = vmatprep.subr.bf16.mxu1 %v3702_v45  ;;  %v3886_v43 = vcombine.high %v583_v38, %v587_v39  ;;  %v527_v44 = vld [vmem:[%s4245_s12 + $0x6c8] sm:$0xff]  ;;  %v3885_v49 = vcombine.low %v583_v38, %v587_v39  ;;  %v3743_v39 = vcombine.low %v440_v55, %v444_v28 }
  0x89   : > { %v531_v45 = vld [vmem:[%s4245_s12 + $0x6e8] sm:$0xff] }
  0x8a   : > { %2419 = vmatpush1.bf16.msra.mxu0 %v3765_v50  ;;  %v591_v46 = vld [vmem:[%s4245_s12 + $0x8c8] sm:$0xff]  ;;  %v3830_v50 = vcombine.high %v527_v44, %v531_v45  ;;  %v3829_v58 = vcombine.low %v527_v44, %v531_v45  ;;  %v456_v44 = vld [vmem:[%s4245_s12 + $0x490] sm:$0xff] }
  0x8b   : > { %2394 = vmatpush1.bf16.msra.mxu1 %v3701_v51  ;;  %2420 = vmatprep.subr.bf16.mxu0 %v3774_v52  ;;  %v595_v47 = vld [vmem:[%s4245_s12 + $0x8e8] sm:$0xff]  ;;  %v460_v45 = vld [vmem:[%s4245_s12 + $0x4b0] sm:$0xff] }
  0x8c   : > { %2395 = vmatprep.subr.bf16.mxu1 %v3710_v53  ;;  %v3894_v51 = vcombine.high %v591_v46, %v595_v47  ;;  %v535_v52 = vld [vmem:[%s4245_s12 + $0x708] sm:$0xff]  ;;  %v3893_v61 = vcombine.low %v591_v46, %v595_v47  ;;  %v3751_v47 = vcombine.low %v448_v36, %v452_v37 }
  0x8d   : > { %v539_v53 = vld [vmem:[%s4245_s12 + $0x728] sm:$0xff] }
  0x8e   : > { %2421 = vmatpush1.bf16.msra.mxu0 %v3773_v62  ;;  %v599_v56 = vld [vmem:[%s4245_s12 + $0x908] sm:$0xff]  ;;  %v3838_v62 = vcombine.high %v535_v52, %v539_v53  ;;  %v3837_v4 = vcombine.low %v535_v52, %v539_v53  ;;  %v464_v52 = vld [vmem:[%s4245_s12 + $0x4d0] sm:$0xff] }
  0x8f   : > { %2396 = vmatpush1.bf16.msra.mxu1 %v3709_v63  ;;  %2422 = vmatprep.subr.bf16.mxu0 %v3782_v0  ;;  %v603_v57 = vld [vmem:[%s4245_s12 + $0x928] sm:$0xff]  ;;  %v468_v53 = vld [vmem:[%s4245_s12 + $0x4f0] sm:$0xff] }
  0x90   : > { %2397 = vmatprep.subr.bf16.mxu1 %v3718_v1  ;;  %v3902_v63 = vcombine.high %v599_v56, %v603_v57  ;;  %v543_v0 = vld [vmem:[%s4245_s12 + $0x748] sm:$0xff]  ;;  %v3901_v5 = vcombine.low %v599_v56, %v603_v57  ;;  %v3759_v57 = vcombine.low %v456_v44, %v460_v45 }
  0x91   : > { %v547_v1 = vld [vmem:[%s4245_s12 + $0x768] sm:$0xff] }
  0x92   : > { %2423 = vmatpush1.bf16.msra.mxu0 %v3781_v6  ;;  %v607_v2 = vld [vmem:[%s4245_s12 + $0x948] sm:$0xff]  ;;  %v3846_v6 = vcombine.high %v543_v0, %v547_v1  ;;  %v3845_v12 = vcombine.low %v543_v0, %v547_v1  ;;  %v472_v0 = vld [vmem:[%s4245_s12 + $0x510] sm:$0xff] }
  0x93   : > { %2398 = vmatpush1.bf16.msra.mxu1 %v3717_v7  ;;  %2424 = vmatprep.subr.bf16.mxu0 %v3790_v8  ;;  %v611_v3 = vld [vmem:[%s4245_s12 + $0x968] sm:$0xff]  ;;  %v476_v1 = vld [vmem:[%s4245_s12 + $0x530] sm:$0xff] }
  0x94   : > { %2399 = vmatprep.subr.bf16.mxu1 %v3726_v9  ;;  %v3910_v7 = vcombine.high %v607_v2, %v611_v3  ;;  %v551_v8 = vld [vmem:[%s4245_s12 + $0x788] sm:$0xff]  ;;  %v3909_v13 = vcombine.low %v607_v2, %v611_v3  ;;  %v3767_v3 = vcombine.low %v464_v52, %v468_v53 }
  0x95   : > { %v555_v9 = vld [vmem:[%s4245_s12 + $0x7a8] sm:$0xff] }
  0x96   : > { %2425 = vmatpush1.bf16.msra.mxu0 %v3789_v14  ;;  %v615_v10 = vld [vmem:[%s4245_s12 + $0x988] sm:$0xff]  ;;  %v3854_v14 = vcombine.high %v551_v8, %v555_v9  ;;  %v3853_v22 = vcombine.low %v551_v8, %v555_v9  ;;  %v480_v8 = vld [vmem:[%s4245_s12 + $0x550] sm:$0xff] }
  0x97   : > { %2400 = vmatpush1.bf16.msra.mxu1 %v3725_v15  ;;  %2426 = vmatprep.subr.bf16.mxu0 %v3798_v16  ;;  %v619_v11 = vld [vmem:[%s4245_s12 + $0x9a8] sm:$0xff]  ;;  %v484_v9 = vld [vmem:[%s4245_s12 + $0x570] sm:$0xff] }
  0x98   : > { %2401 = vmatprep.subr.bf16.mxu1 %v3734_v18  ;;  %v3918_v15 = vcombine.high %v615_v10, %v619_v11  ;;  %v559_v16 = vld [vmem:[%s4245_s12 + $0x7c8] sm:$0xff]  ;;  %v3917_v23 = vcombine.low %v615_v10, %v619_v11  ;;  %v3775_v11 = vcombine.low %v472_v0, %v476_v1 }
  0x99   : > { %v563_v18 = vld [vmem:[%s4245_s12 + $0x7e8] sm:$0xff] }
  0x9a   : > { %2427 = vmatpush1.bf16.msra.mxu0 %v3797_v25  ;;  %v623_v19 = vld [vmem:[%s4245_s12 + $0x9c8] sm:$0xff]  ;;  %v3862_v25 = vcombine.high %v559_v16, %v563_v18  ;;  %v3861_v29 = vcombine.low %v559_v16, %v563_v18  ;;  %v488_v16 = vld [vmem:[%s4245_s12 + $0x590] sm:$0xff] }
  0x9b   : > { %2402 = vmatpush1.bf16.msra.mxu1 %v3733_v54  ;;  %2428 = vmatprep.subr.bf16.mxu0 %v3806_v26  ;;  %v627_v21 = vld [vmem:[%s4245_s12 + $0x9e8] sm:$0xff]  ;;  %v312_v26 = vld [vmem:[%s4245_s12 + $0x10] sm:$0xff] }
  0x9c   : > { %2453 = vmatprep.subr.bf16.mxu1 %v3870_v27  ;;  %v3926_v54 = vcombine.high %v623_v19, %v627_v21  ;;  %v316_v27 = vld [vmem:[%s4245_s12 + $0x30] sm:$0xff]  ;;  %v3925_v30 = vcombine.low %v623_v19, %v627_v21  ;;  %v3783_v21 = vcombine.low %v480_v8, %v484_v9 }
  0x9d   : > { %v3615_v38 = vcombine.low %v312_v26, %v316_v27  ;;  %v492_v18 = vld [vmem:[%s4245_s12 + $0x5b0] sm:$0xff] }
  0x9e   : > { %2404 = vmatmul.mubr.bf16.vlgmr.msra.gmra.mrb[4].mxu1 %v4336_v17  ;;  %2429 = vmatpush1.bf16.msra.mxu0 %v3805_v31  ;;  %v3616_v31 = vcombine.high %v312_v26, %v316_v27  ;;  %v496_v26 = vld [vmem:[%s4245_s12 + $0x5d0] sm:$0xff] }
  0x9f   : > { %2454 = vmatpush1.bf16.msra.mxu1 %v3869_v32  ;;  %2430 = vmatprep.subr.bf16.mxu0 %v3814_v34  ;;  %v3744_v32 = vcombine.high %v440_v55, %v444_v28  ;;  %v320_v34 = vld [vmem:[%s4245_s12 + $0x50] sm:$0xff]  ;;  %v3791_v28 = vcombine.low %v488_v16, %v492_v18 }
  0xa0   : > { %2455 = vmatprep.subr.bf16.mxu1 %v3878_v35  ;;  %2485 = vmatprep.mubr.bf16.mxu1 %v4182_v33  ;;  %v324_v35 = vld [vmem:[%s4245_s12 + $0x70] sm:$0xff] }
  0xa1   : > { %v3623_v46 = vcombine.low %v320_v34, %v324_v35  ;;  %v500_v27 = vld [vmem:[%s4245_s12 + $0x5f0] sm:$0xff] }
  0xa2   : > { %2431 = vmatpush1.bf16.msra.mxu0 %v3813_v40  ;;  %v3624_v40 = vcombine.high %v320_v34, %v324_v35  ;;  %v504_v34 = vld [vmem:[%s4245_s12 + $0x610] sm:$0xff] }
  0xa3   : > { %2456 = vmatpush1.bf16.msra.mxu1 %v3877_v41  ;;  %2432 = vmatprep.subr.bf16.mxu0 %v3822_v42  ;;  %v3752_v41 = vcombine.high %v448_v36, %v452_v37  ;;  %v328_v42 = vld [vmem:[%s4245_s12 + $0x90] sm:$0xff]  ;;  %v3799_v37 = vcombine.low %v496_v26, %v500_v27 }
  0xa4   : > { %2457 = vmatprep.subr.bf16.mxu1 %v3886_v43  ;;  %v332_v43 = vld [vmem:[%s4245_s12 + $0xb0] sm:$0xff] }
  0xa5   : > { %v3631_v56 = vcombine.low %v328_v42, %v332_v43  ;;  %v508_v35 = vld [vmem:[%s4245_s12 + $0x630] sm:$0xff] }
  0xa6   : > { %2433 = vmatpush1.bf16.msra.mxu0 %v3821_v48  ;;  %v3632_v48 = vcombine.high %v328_v42, %v332_v43  ;;  %v512_v42 = vld [vmem:[%s4245_s12 + $0x650] sm:$0xff] }
  0xa7   : > { %2458 = vmatpush1.bf16.msra.mxu1 %v3885_v49  ;;  %2434 = vmatprep.subr.bf16.mxu0 %v3830_v50  ;;  %v3760_v49 = vcombine.high %v456_v44, %v460_v45  ;;  %v336_v50 = vld [vmem:[%s4245_s12 + $0xd0] sm:$0xff]  ;;  %v3807_v45 = vcombine.low %v504_v34, %v508_v35 }
  0xa8   : > { %2459 = vmatprep.subr.bf16.mxu1 %v3894_v51  ;;  %v340_v51 = vld [vmem:[%s4245_s12 + $0xf0] sm:$0xff] }
  0xa9   : > { %v3639_v2 = vcombine.low %v336_v50, %v340_v51  ;;  %v516_v43 = vld [vmem:[%s4245_s12 + $0x670] sm:$0xff] }
  0xaa   : > { %2435 = vmatpush1.bf16.msra.mxu0 %v3829_v58  ;;  %v3640_v58 = vcombine.high %v336_v50, %v340_v51  ;;  %v520_v50 = vld [vmem:[%s4245_s12 + $0x690] sm:$0xff] }
  0xab   : > { %2460 = vmatpush1.bf16.msra.mxu1 %v3893_v61  ;;  %2436 = vmatprep.subr.bf16.mxu0 %v3838_v62  ;;  %v3768_v61 = vcombine.high %v464_v52, %v468_v53  ;;  %v344_v62 = vld [vmem:[%s4245_s12 + $0x110] sm:$0xff]  ;;  %v3815_v53 = vcombine.low %v512_v42, %v516_v43 }
  0xac   : > { %2461 = vmatprep.subr.bf16.mxu1 %v3902_v63  ;;  %v348_v63 = vld [vmem:[%s4245_s12 + $0x130] sm:$0xff] }
  0xad   : > { %v3647_v10 = vcombine.low %v344_v62, %v348_v63  ;;  %v524_v51 = vld [vmem:[%s4245_s12 + $0x6b0] sm:$0xff] }
  0xae   : > { %2437 = vmatpush1.bf16.msra.mxu0 %v3837_v4  ;;  %v3648_v4 = vcombine.high %v344_v62, %v348_v63  ;;  %v528_v62 = vld [vmem:[%s4245_s12 + $0x6d0] sm:$0xff] }
  0xaf   : > { %2462 = vmatpush1.bf16.msra.mxu1 %v3901_v5  ;;  %2438 = vmatprep.subr.bf16.mxu0 %v3846_v6  ;;  %v3776_v5 = vcombine.high %v472_v0, %v476_v1  ;;  %v352_v6 = vld [vmem:[%s4245_s12 + $0x150] sm:$0xff]  ;;  %v3823_v1 = vcombine.low %v520_v50, %v524_v51 }
  0xb0   : > { %2463 = vmatprep.subr.bf16.mxu1 %v3910_v7  ;;  %v356_v7 = vld [vmem:[%s4245_s12 + $0x170] sm:$0xff] }
  0xb1   : > { %v3655_v19 = vcombine.low %v352_v6, %v356_v7  ;;  %v532_v63 = vld [vmem:[%s4245_s12 + $0x6f0] sm:$0xff] }
  0xb2   : > { %2439 = vmatpush1.bf16.msra.mxu0 %v3845_v12  ;;  %v3656_v12 = vcombine.high %v352_v6, %v356_v7  ;;  %v536_v6 = vld [vmem:[%s4245_s12 + $0x710] sm:$0xff] }
  0xb3   : > { %2464 = vmatpush1.bf16.msra.mxu1 %v3909_v13  ;;  %2440 = vmatprep.subr.bf16.mxu0 %v3854_v14  ;;  %v3784_v13 = vcombine.high %v480_v8, %v484_v9  ;;  %v360_v14 = vld [vmem:[%s4245_s12 + $0x190] sm:$0xff]  ;;  %v3831_v9 = vcombine.low %v528_v62, %v532_v63 }
  0xb4   : > { %2465 = vmatprep.subr.bf16.mxu1 %v3918_v15  ;;  %v364_v15 = vld [vmem:[%s4245_s12 + $0x1b0] sm:$0xff] }
  0xb5   : > { %v3663_v55 = vcombine.low %v360_v14, %v364_v15  ;;  %v540_v7 = vld [vmem:[%s4245_s12 + $0x730] sm:$0xff] }
  0xb6   : > { %2441 = vmatpush1.bf16.msra.mxu0 %v3853_v22  ;;  %v3664_v22 = vcombine.high %v360_v14, %v364_v15  ;;  %v544_v14 = vld [vmem:[%s4245_s12 + $0x750] sm:$0xff] }
  0xb7   : > { %2466 = vmatpush1.bf16.msra.mxu1 %v3917_v23  ;;  %2442 = vmatprep.subr.bf16.mxu0 %v3862_v25  ;;  %v3792_v23 = vcombine.high %v488_v16, %v492_v18  ;;  %v368_v25 = vld [vmem:[%s4245_s12 + $0x1d0] sm:$0xff]  ;;  %v3839_v18 = vcombine.low %v536_v6, %v540_v7 }
  0xb8   : > { %2467 = vmatprep.subr.bf16.mxu1 %v3926_v54  ;;  %v372_v54 = vld [vmem:[%s4245_s12 + $0x1f0] sm:$0xff] }
  0xb9   : > { %v3671_v36 = vcombine.low %v368_v25, %v372_v54  ;;  %v548_v15 = vld [vmem:[%s4245_s12 + $0x770] sm:$0xff] }
  0xba   : > { %2443 = vmatpush1.bf16.msra.mxu0 %v3861_v29  ;;  %v3672_v29 = vcombine.high %v368_v25, %v372_v54  ;;  %v552_v25 = vld [vmem:[%s4245_s12 + $0x790] sm:$0xff] }
  0xbb   : > { %2468 = vmatpush1.bf16.msra.mxu1 %v3925_v30  ;;  %2494 = vmatprep.subr.bf16.mxu0 %v3616_v31  ;;  %v3800_v30 = vcombine.high %v496_v26, %v500_v27  ;;  %v376_v31 = vld [vmem:[%s4245_s12 + $0x210] sm:$0xff]  ;;  %v3847_v27 = vcombine.low %v544_v14, %v548_v15 }
  0xbc   : > { %2535 = vmatprep.subr.bf16.mxu1 %v3744_v32  ;;  %v380_v32 = vld [vmem:[%s4245_s12 + $0x230] sm:$0xff] }
  0xbd   : > { %2445 = vmatmul.mubr.bf16.vlgmr.msra.gmra.mrb[8].mxu0 %v4342_v20  ;;  %v3679_v44 = vcombine.low %v376_v31, %v380_v32  ;;  %v556_v54 = vld [vmem:[%s4245_s12 + $0x7b0] sm:$0xff] }
  0xbe   : > { %2486 = vmatmul.mubr.bf16.vlgmr.msra.gmra.mrb[8].mxu1 %v4379_v24  ;;  %2495 = vmatpush1.bf16.msra.mxu0 %v3615_v38  ;;  %v3680_v38 = vcombine.high %v376_v31, %v380_v32  ;;  %v560_v31 = vld [vmem:[%s4245_s12 + $0x7d0] sm:$0xff] }
  0xbf   : > { %2536 = vmatpush1.bf16.msra.mxu1 %v3743_v39  ;;  %2496 = vmatprep.subr.bf16.mxu0 %v3624_v40  ;;  %v3808_v39 = vcombine.high %v504_v34, %v508_v35  ;;  %v384_v40 = vld [vmem:[%s4245_s12 + $0x250] sm:$0xff]  ;;  %v3855_v35 = vcombine.low %v552_v25, %v556_v54 }
  0xc0   : > { %2537 = vmatprep.subr.bf16.mxu1 %v3752_v41  ;;  %2526 = vmatprep.mubr.bf16.mxu0 %v4286_v59  ;;  %v388_v41 = vld [vmem:[%s4245_s12 + $0x270] sm:$0xff] }
  0xc1   : > { %2567 = vmatprep.mubr.bf16.mxu1 %v4290_v60  ;;  %v3687_v52 = vcombine.low %v384_v40, %v388_v41  ;;  %v564_v32 = vld [vmem:[%s4245_s12 + $0x7f0] sm:$0xff] }
  0xc2   : > { %2497 = vmatpush1.bf16.msra.mxu0 %v3623_v46  ;;  %v3688_v46 = vcombine.high %v384_v40, %v388_v41  ;;  %v313_v40 = vld [vmem:[%s4245_s12 + $0x18] sm:$0xff] }
  0xc3   : > { %2538 = vmatpush1.bf16.msra.mxu1 %v3751_v47  ;;  %2498 = vmatprep.subr.bf16.mxu0 %v3632_v48  ;;  %v3816_v47 = vcombine.high %v512_v42, %v516_v43  ;;  %v392_v48 = vld [vmem:[%s4245_s12 + $0x290] sm:$0xff]  ;;  %v317_v41 = vld [vmem:[%s4245_s12 + $0x38] sm:$0xff]  ;;  %v3863_v43 = vcombine.low %v560_v31, %v564_v32 }
  0xc4   : > { %2539 = vmatprep.subr.bf16.mxu1 %v3760_v49  ;;  %v396_v49 = vld [vmem:[%s4245_s12 + $0x2b0] sm:$0xff] }
  0xc5   : > { %v3695_v0 = vcombine.low %v392_v48, %v396_v49 }
  0xc6   : > { %2499 = vmatpush1.bf16.msra.mxu0 %v3631_v56  ;;  %v3696_v56 = vcombine.high %v392_v48, %v396_v49  ;;  %v321_v48 = vld [vmem:[%s4245_s12 + $0x58] sm:$0xff] }
  0xc7   : > { %2540 = vmatpush1.bf16.msra.mxu1 %v3759_v57  ;;  %2500 = vmatprep.subr.bf16.mxu0 %v3640_v58  ;;  %v3824_v57 = vcombine.high %v520_v50, %v524_v51  ;;  %v400_v58 = vld [vmem:[%s4245_s12 + $0x2d0] sm:$0xff]  ;;  %v325_v49 = vld [vmem:[%s4245_s12 + $0x78] sm:$0xff]  ;;  %v3617_v51 = vcombine.low %v313_v40, %v317_v41 }
  0xc8   : > { %2541 = vmatprep.subr.bf16.mxu1 %v3768_v61  ;;  %v404_v61 = vld [vmem:[%s4245_s12 + $0x2f0] sm:$0xff] }
  0xc9   : > { %v3703_v8 = vcombine.low %v400_v58, %v404_v61 }
  0xca   : > { %2501 = vmatpush1.bf16.msra.mxu0 %v3639_v2  ;;  %v3704_v2 = vcombine.high %v400_v58, %v404_v61  ;;  %v329_v58 = vld [vmem:[%s4245_s12 + $0x98] sm:$0xff] }
  0xcb   : > { %2542 = vmatpush1.bf16.msra.mxu1 %v3767_v3  ;;  %2502 = vmatprep.subr.bf16.mxu0 %v3648_v4  ;;  %v3832_v3 = vcombine.high %v528_v62, %v532_v63  ;;  %v408_v4 = vld [vmem:[%s4245_s12 + $0x310] sm:$0xff]  ;;  %v333_v61 = vld [vmem:[%s4245_s12 + $0xb8] sm:$0xff]  ;;  %v3625_v63 = vcombine.low %v321_v48, %v325_v49 }
  0xcc   : > { %2543 = vmatprep.subr.bf16.mxu1 %v3776_v5  ;;  %v412_v5 = vld [vmem:[%s4245_s12 + $0x330] sm:$0xff] }
  0xcd   : > { %v3711_v16 = vcombine.low %v408_v4, %v412_v5 }
  0xce   : > { %2503 = vmatpush1.bf16.msra.mxu0 %v3647_v10  ;;  %v3712_v10 = vcombine.high %v408_v4, %v412_v5  ;;  %v337_v4 = vld [vmem:[%s4245_s12 + $0xd8] sm:$0xff] }
  0xcf   : > { %2544 = vmatpush1.bf16.msra.mxu1 %v3775_v11  ;;  %2504 = vmatprep.subr.bf16.mxu0 %v3656_v12  ;;  %v3840_v11 = vcombine.high %v536_v6, %v540_v7  ;;  %v416_v12 = vld [vmem:[%s4245_s12 + $0x350] sm:$0xff]  ;;  %v341_v5 = vld [vmem:[%s4245_s12 + $0xf8] sm:$0xff]  ;;  %v3633_v7 = vcombine.low %v329_v58, %v333_v61 }
  0xd0   : > { %2545 = vmatprep.subr.bf16.mxu1 %v3784_v13  ;;  %v420_v13 = vld [vmem:[%s4245_s12 + $0x370] sm:$0xff] }
  0xd1   : > { %v3719_v26 = vcombine.low %v416_v12, %v420_v13 }
  0xd2   : > { %2505 = vmatpush1.bf16.msra.mxu0 %v3655_v19  ;;  %v3720_v19 = vcombine.high %v416_v12, %v420_v13  ;;  %v345_v12 = vld [vmem:[%s4245_s12 + $0x118] sm:$0xff] }
  0xd3   : > { %2546 = vmatpush1.bf16.msra.mxu1 %v3783_v21  ;;  %2506 = vmatprep.subr.bf16.mxu0 %v3664_v22  ;;  %v3848_v21 = vcombine.high %v544_v14, %v548_v15  ;;  %v424_v22 = vld [vmem:[%s4245_s12 + $0x390] sm:$0xff]  ;;  %v349_v13 = vld [vmem:[%s4245_s12 + $0x138] sm:$0xff] }
  0xd4   : > { %2547 = vmatprep.subr.bf16.mxu1 %v3792_v23  ;;  %v428_v23 = vld [vmem:[%s4245_s12 + $0x3b0] sm:$0xff] }
  0xd5   : > { %v3727_v34 = vcombine.low %v424_v22, %v428_v23 }
  0xd6   : > { %2507 = vmatpush1.bf16.msra.mxu0 %v3663_v55  ;;  %v3728_v55 = vcombine.high %v424_v22, %v428_v23  ;;  %v357_v22 = vld [vmem:[%s4245_s12 + $0x178] sm:$0xff] }
  0xd7   : > { %2548 = vmatpush1.bf16.msra.mxu1 %v3791_v28  ;;  %2508 = vmatprep.subr.bf16.mxu0 %v3672_v29  ;;  %v3856_v28 = vcombine.high %v552_v25, %v556_v54  ;;  %v432_v29 = vld [vmem:[%s4245_s12 + $0x3d0] sm:$0xff]  ;;  %v3649_v25 = vcombine.low %v345_v12, %v349_v13 }
  0xd8   : > { %2549 = vmatprep.subr.bf16.mxu1 %v3800_v30  ;;  %v436_v30 = vld [vmem:[%s4245_s12 + $0x3f0] sm:$0xff] }
  0xd9   : > { %v3735_v42 = vcombine.low %v432_v29, %v436_v30 }
  0xda   : > { %2509 = vmatpush1.bf16.msra.mxu0 %v3671_v36  ;;  %v3736_v36 = vcombine.high %v432_v29, %v436_v30  ;;  %v365_v29 = vld [vmem:[%s4245_s12 + $0x1b8] sm:$0xff] }
  0xdb   : > { %2550 = vmatpush1.bf16.msra.mxu1 %v3799_v37  ;;  %2510 = vmatprep.subr.bf16.mxu0 %v3680_v38  ;;  %v3864_v37 = vcombine.high %v560_v31, %v564_v32  ;;  %v568_v38 = vld [vmem:[%s4245_s12 + $0x810] sm:$0xff] }
  0xdc   : > { %2551 = vmatprep.subr.bf16.mxu1 %v3808_v39  ;;  %v572_v39 = vld [vmem:[%s4245_s12 + $0x830] sm:$0xff] }
  0xdd   : > { %v3871_v50 = vcombine.low %v568_v38, %v572_v39 }
  0xde   : > { %2511 = vmatpush1.bf16.msra.mxu0 %v3679_v44  ;;  %v3872_v44 = vcombine.high %v568_v38, %v572_v39  ;;  %v373_v38 = vld [vmem:[%s4245_s12 + $0x1f8] sm:$0xff] }
  0xdf   : > { %2552 = vmatpush1.bf16.msra.mxu1 %v3807_v45  ;;  %2512 = vmatprep.subr.bf16.mxu0 %v3688_v46  ;;  %v3618_v45 = vcombine.high %v313_v40, %v317_v41  ;;  %v576_v46 = vld [vmem:[%s4245_s12 + $0x850] sm:$0xff] }
  0xe0   : > { %2553 = vmatprep.subr.bf16.mxu1 %v3816_v47  ;;  %v580_v47 = vld [vmem:[%s4245_s12 + $0x870] sm:$0xff] }
  0xe1   : > { %v3879_v62 = vcombine.low %v576_v46, %v580_v47 }
  0xe2   : > { %2513 = vmatpush1.bf16.msra.mxu0 %v3687_v52  ;;  %v3880_v52 = vcombine.high %v576_v46, %v580_v47  ;;  %v381_v46 = vld [vmem:[%s4245_s12 + $0x238] sm:$0xff] }
  0xe3   : > { %2554 = vmatpush1.bf16.msra.mxu1 %v3815_v53  ;;  %2514 = vmatprep.subr.bf16.mxu0 %v3696_v56  ;;  %v3626_v53 = vcombine.high %v321_v48, %v325_v49  ;;  %v584_v56 = vld [vmem:[%s4245_s12 + $0x890] sm:$0xff] }
  0xe4   : > { %2555 = vmatprep.subr.bf16.mxu1 %v3824_v57  ;;  %v588_v57 = vld [vmem:[%s4245_s12 + $0x8b0] sm:$0xff] }
  0xe5   : > { %v3887_v6 = vcombine.low %v584_v56, %v588_v57 }
  0xe6   : > { %2515 = vmatpush1.bf16.msra.mxu0 %v3695_v0  ;;  %v3888_v0 = vcombine.high %v584_v56, %v588_v57  ;;  %v389_v56 = vld [vmem:[%s4245_s12 + $0x278] sm:$0xff] }
  0xe7   : > { %2556 = vmatpush1.bf16.msra.mxu1 %v3823_v1  ;;  %2516 = vmatprep.subr.bf16.mxu0 %v3704_v2  ;;  %v3634_v1 = vcombine.high %v329_v58, %v333_v61  ;;  %v592_v2 = vld [vmem:[%s4245_s12 + $0x8d0] sm:$0xff] }
  0xe8   : > { %2557 = vmatprep.subr.bf16.mxu1 %v3832_v3  ;;  %v596_v3 = vld [vmem:[%s4245_s12 + $0x8f0] sm:$0xff] }
  0xe9   : > { %v3895_v14 = vcombine.low %v592_v2, %v596_v3 }
  0xea   : > { %2517 = vmatpush1.bf16.msra.mxu0 %v3703_v8  ;;  %v3896_v8 = vcombine.high %v592_v2, %v596_v3  ;;  %v397_v2 = vld [vmem:[%s4245_s12 + $0x2b8] sm:$0xff] }
  0xeb   : > { %2558 = vmatpush1.bf16.msra.mxu1 %v3831_v9  ;;  %2518 = vmatprep.subr.bf16.mxu0 %v3712_v10  ;;  %v3642_v9 = vcombine.high %v337_v4, %v341_v5  ;;  %v600_v10 = vld [vmem:[%s4245_s12 + $0x910] sm:$0xff] }
  0xec   : > { %2559 = vmatprep.subr.bf16.mxu1 %v3840_v11  ;;  %v604_v11 = vld [vmem:[%s4245_s12 + $0x930] sm:$0xff] }
  0xed   : > { %v3904_v15 = vcombine.high %v600_v10, %v604_v11  ;;  %v3903_v23 = vcombine.low %v600_v10, %v604_v11 }
  0xee   : > { %2519 = vmatpush1.bf16.msra.mxu0 %v3711_v16  ;;  %v3650_v16 = vcombine.high %v345_v12, %v349_v13  ;;  %v473_v13 = vld [vmem:[%s4245_s12 + $0x518] sm:$0xff] }
  0xef   : > { %2560 = vmatpush1.bf16.msra.mxu1 %v3839_v18  ;;  %2520 = vmatprep.subr.bf16.mxu0 %v3720_v19  ;;  %v608_v18 = vld [vmem:[%s4245_s12 + $0x950] sm:$0xff] }
  0xf0   : > { %2561 = vmatprep.subr.bf16.mxu1 %v3848_v21  ;;  %v612_v19 = vld [vmem:[%s4245_s12 + $0x970] sm:$0xff]  ;;  %v353_v21 = vld [vmem:[%s4245_s12 + $0x158] sm:$0xff] }
  0xf1   : > { %v3912_v54 = vcombine.high %v608_v18, %v612_v19  ;;  %v3911_v30 = vcombine.low %v608_v18, %v612_v19  ;;  %v3657_v31 = vcombine.low %v353_v21, %v357_v22 }
  0xf2   : > { %2521 = vmatpush1.bf16.msra.mxu0 %v3719_v26  ;;  %v3658_v26 = vcombine.high %v353_v21, %v357_v22  ;;  %v481_v22 = vld [vmem:[%s4245_s12 + $0x558] sm:$0xff] }
  0xf3   : > { %2562 = vmatpush1.bf16.msra.mxu1 %v3847_v27  ;;  %2522 = vmatprep.subr.bf16.mxu0 %v3728_v55  ;;  %v616_v27 = vld [vmem:[%s4245_s12 + $0x990] sm:$0xff] }
  0xf4   : > { %2563 = vmatprep.subr.bf16.mxu1 %v3856_v28  ;;  %v620_v55 = vld [vmem:[%s4245_s12 + $0x9b0] sm:$0xff]  ;;  %v361_v28 = vld [vmem:[%s4245_s12 + $0x198] sm:$0xff] }
  0xf5   : > { %v3920_v32 = vcombine.high %v616_v27, %v620_v55  ;;  %v3919_v39 = vcombine.low %v616_v27, %v620_v55  ;;  %v3665_v40 = vcombine.low %v361_v28, %v365_v29 }
  0xf6   : > { %2523 = vmatpush1.bf16.msra.mxu0 %v3727_v34  ;;  %v3666_v34 = vcombine.high %v361_v28, %v365_v29  ;;  %v489_v29 = vld [vmem:[%s4245_s12 + $0x598] sm:$0xff] }
  0xf7   : > { %2564 = vmatpush1.bf16.msra.mxu1 %v3855_v35  ;;  %2524 = vmatprep.subr.bf16.mxu0 %v3736_v36  ;;  %v624_v35 = vld [vmem:[%s4245_s12 + $0x9d0] sm:$0xff] }
  0xf8   : > { %2565 = vmatprep.subr.bf16.mxu1 %v3864_v37  ;;  %v628_v36 = vld [vmem:[%s4245_s12 + $0x9f0] sm:$0xff]  ;;  %v369_v37 = vld [vmem:[%s4245_s12 + $0x1d8] sm:$0xff] }
  0xf9   : > { %v3928_v41 = vcombine.high %v624_v35, %v628_v36  ;;  %v3927_v47 = vcombine.low %v624_v35, %v628_v36  ;;  %v3673_v48 = vcombine.low %v369_v37, %v373_v38 }
  0xfa   : > { %2525 = vmatpush1.bf16.msra.mxu0 %v3735_v42  ;;  %v3674_v42 = vcombine.high %v369_v37, %v373_v38 }
  0xfb   : > { %2566 = vmatpush1.bf16.msra.mxu1 %v3863_v43  ;;  %2576 = vmatprep.subr.bf16.mxu0 %v3872_v44  ;;  %v441_v43 = vld [vmem:[%s4245_s12 + $0x418] sm:$0xff] }
  0xfc   : > { %2617 = vmatprep.subr.bf16.mxu1 %v3618_v45  ;;  %v445_v44 = vld [vmem:[%s4245_s12 + $0x438] sm:$0xff] }
  0xfd   : > { %2527 = vmatmul.mubr.bf16.vlgmr.msra.gmra.mrb[12].mxu0 %v4336_v17  ;;  %v377_v45 = vld [vmem:[%s4245_s12 + $0x218] sm:$0xff]  ;;  %v3746_v49 = vcombine.high %v441_v43, %v445_v44  ;;  %v3745_v57 = vcombine.low %v441_v43, %v445_v44 }
  0xfe   : > { %2568 = vmatmul.mubr.bf16.vlgmr.msra.gmra.mrb[12].mxu1 %v4342_v20  ;;  %2577 = vmatpush1.bf16.msra.mxu0 %v3871_v50  ;;  %v3682_v50 = vcombine.high %v377_v45, %v381_v46  ;;  %v3681_v58 = vcombine.low %v377_v45, %v381_v46  ;;  %v433_v43 = vld [vmem:[%s4245_s12 + $0x3d8] sm:$0xff] }
  0xff   : > { %2618 = vmatpush1.bf16.msra.mxu1 %v3617_v51  ;;  %2578 = vmatprep.subr.bf16.mxu0 %v3880_v52  ;;  %v449_v51 = vld [vmem:[%s4245_s12 + $0x458] sm:$0xff] }
 0x100   : > { %2619 = vmatprep.subr.bf16.mxu1 %v3626_v53  ;;  %2608 = vmatprep.mubr.bf16.mxu0 %v4182_v33  ;;  %v453_v52 = vld [vmem:[%s4245_s12 + $0x478] sm:$0xff] }
 0x101   : > { %2649 = vmatprep.mubr.bf16.mxu1 %v4286_v59  ;;  %v3641_v59 = vcombine.low %v337_v4, %v341_v5  ;;  %v385_v53 = vld [vmem:[%s4245_s12 + $0x258] sm:$0xff]  ;;  %v3754_v61 = vcombine.high %v449_v51, %v453_v52  ;;  %v3753_v3 = vcombine.low %v449_v51, %v453_v52 }
 0x102   : > { %2579 = vmatpush1.bf16.msra.mxu0 %v3879_v62  ;;  %v3690_v62 = vcombine.high %v385_v53, %v389_v56  ;;  %v3689_v4 = vcombine.low %v385_v53, %v389_v56  ;;  %v437_v44 = vld [vmem:[%s4245_s12 + $0x3f8] sm:$0xff] }
 0x103   : > { %2620 = vmatpush1.bf16.msra.mxu1 %v3625_v63  ;;  %2580 = vmatprep.subr.bf16.mxu0 %v3888_v0  ;;  %v457_v63 = vld [vmem:[%s4245_s12 + $0x498] sm:$0xff] }
 0x104   : > { %2621 = vmatprep.subr.bf16.mxu1 %v3634_v1  ;;  %v461_v0 = vld [vmem:[%s4245_s12 + $0x4b8] sm:$0xff] }
 0x105   : > { %v393_v1 = vld [vmem:[%s4245_s12 + $0x298] sm:$0xff]  ;;  %v3762_v5 = vcombine.high %v457_v63, %v461_v0  ;;  %v3761_v10 = vcombine.low %v457_v63, %v461_v0 }
 0x106   : > { %2581 = vmatpush1.bf16.msra.mxu0 %v3887_v6  ;;  %v3698_v6 = vcombine.high %v393_v1, %v397_v2  ;;  %v3697_v11 = vcombine.low %v393_v1, %v397_v2  ;;  %v573_v63 = vld [vmem:[%s4245_s12 + $0x838] sm:$0xff]  ;;  %v3737_v1 = vcombine.low %v433_v43, %v437_v44 }
 0x107   : > { %2622 = vmatpush1.bf16.msra.mxu1 %v3633_v7  ;;  %2582 = vmatprep.subr.bf16.mxu0 %v3896_v8  ;;  %v465_v7 = vld [vmem:[%s4245_s12 + $0x4d8] sm:$0xff] }
 0x108   : > { %2623 = vmatprep.subr.bf16.mxu1 %v3642_v9  ;;  %v469_v8 = vld [vmem:[%s4245_s12 + $0x4f8] sm:$0xff] }
 0x109   : > { %v401_v9 = vld [vmem:[%s4245_s12 + $0x2d8] sm:$0xff] }
 0x10a   : > { %2583 = vmatpush1.bf16.msra.mxu0 %v3895_v14  ;;  %v477_v14 = vld [vmem:[%s4245_s12 + $0x538] sm:$0xff] }
 0x10b   : > { %2624 = vmatpush1.bf16.msra.mxu1 %v3641_v59  ;;  %2584 = vmatprep.subr.bf16.mxu0 %v3904_v15  ;;  %v409_v59 = vld [vmem:[%s4245_s12 + $0x318] sm:$0xff]  ;;  %v3778_v19 = vcombine.high %v473_v13, %v477_v14 }
 0x10c   : > { %2625 = vmatprep.subr.bf16.mxu1 %v3650_v16  ;;  %v413_v15 = vld [vmem:[%s4245_s12 + $0x338] sm:$0xff]  ;;  %v3769_v16 = vcombine.low %v465_v7, %v469_v8 }
 0x10d   : > { %v3714_v21 = vcombine.high %v409_v59, %v413_v15  ;;  %v3713_v27 = vcombine.low %v409_v59, %v413_v15 }
 0x10e   : > { %2585 = vmatpush1.bf16.msra.mxu0 %v3903_v23  ;;  %v485_v23 = vld [vmem:[%s4245_s12 + $0x578] sm:$0xff] }
 0x10f   : > { %2626 = vmatpush1.bf16.msra.mxu1 %v3649_v25  ;;  %2586 = vmatprep.subr.bf16.mxu0 %v3912_v54  ;;  %v417_v25 = vld [vmem:[%s4245_s12 + $0x358] sm:$0xff]  ;;  %v3786_v55 = vcombine.high %v481_v22, %v485_v23 }
 0x110   : > { %2627 = vmatprep.subr.bf16.mxu1 %v3658_v26  ;;  %v421_v54 = vld [vmem:[%s4245_s12 + $0x378] sm:$0xff]  ;;  %v3777_v26 = vcombine.low %v473_v13, %v477_v14 }
 0x111   : > { %v3722_v28 = vcombine.high %v417_v25, %v421_v54  ;;  %v3721_v35 = vcombine.low %v417_v25, %v421_v54  ;;  %v589_v13 = vld [vmem:[%s4245_s12 + $0x8b8] sm:$0xff] }
 0x112   : > { %2587 = vmatpush1.bf16.msra.mxu0 %v3911_v30  ;;  %v493_v30 = vld [vmem:[%s4245_s12 + $0x5b8] sm:$0xff] }
 0x113   : > { %2628 = vmatpush1.bf16.msra.mxu1 %v3657_v31  ;;  %2588 = vmatprep.subr.bf16.mxu0 %v3920_v32  ;;  %v425_v31 = vld [vmem:[%s4245_s12 + $0x398] sm:$0xff]  ;;  %v3794_v36 = vcombine.high %v489_v29, %v493_v30 }
 0x114   : > { %2629 = vmatprep.subr.bf16.mxu1 %v3666_v34  ;;  %v429_v32 = vld [vmem:[%s4245_s12 + $0x3b8] sm:$0xff]  ;;  %v3785_v34 = vcombine.low %v481_v22, %v485_v23 }
 0x115   : > { %v3730_v38 = vcombine.high %v425_v31, %v429_v32  ;;  %v3729_v52 = vcombine.low %v425_v31, %v429_v32  ;;  %v597_v22 = vld [vmem:[%s4245_s12 + $0x8f8] sm:$0xff] }
 0x116   : > { %2589 = vmatpush1.bf16.msra.mxu0 %v3919_v39  ;;  %v497_v39 = vld [vmem:[%s4245_s12 + $0x5d8] sm:$0xff] }
 0x117   : > { %2630 = vmatpush1.bf16.msra.mxu1 %v3665_v40  ;;  %2590 = vmatprep.subr.bf16.mxu0 %v3928_v41  ;;  %v501_v40 = vld [vmem:[%s4245_s12 + $0x5f8] sm:$0xff] }
 0x118   : > { %2631 = vmatprep.subr.bf16.mxu1 %v3674_v42  ;;  %v3802_v53 = vcombine.high %v497_v39, %v501_v40  ;;  %v3801_v0 = vcombine.low %v497_v39, %v501_v40  ;;  %v545_v32 = vld [vmem:[%s4245_s12 + $0x758] sm:$0xff] }
 0x11a   : > { %2591 = vmatpush1.bf16.msra.mxu0 %v3927_v47 }
 0x11b   : > { %2632 = vmatpush1.bf16.msra.mxu1 %v3673_v48  ;;  %2658 = vmatprep.subr.bf16.mxu0 %v3746_v49  ;;  %v3793_v48 = vcombine.low %v489_v29, %v493_v30 }
 0x11c   : > { %2633 = vmatprep.subr.bf16.mxu1 %v3682_v50 }
 0x11d   : > { %2609 = vmatmul.mubr.bf16.vlgmr.msra.gmra.mrb[16].mxu0 %v4379_v24  ;;  %v405_v24 = vld [vmem:[%s4245_s12 + $0x2f8] sm:$0xff] }
 0x11e   : > { %2659 = vmatpush1.bf16.msra.mxu0 %v3745_v57  ;;  %2690 = vmatprep.mubr.bf16.mxu0 %v4290_v60  ;;  %v3770_v60 = vcombine.high %v465_v7, %v469_v8  ;;  %v3706_v12 = vcombine.high %v401_v9, %v405_v24  ;;  %v3705_v18 = vcombine.low %v401_v9, %v405_v24  ;;  %v581_v7 = vld [vmem:[%s4245_s12 + $0x878] sm:$0xff] }
 0x11f   : > { %2634 = vmatpush1.bf16.msra.mxu1 %v3681_v58  ;;  %2660 = vmatprep.subr.bf16.mxu0 %v3754_v61  ;;  %v3738_v57 = vcombine.high %v433_v43, %v437_v44  ;;  %v505_v58 = vld [vmem:[%s4245_s12 + $0x618] sm:$0xff] }
 0x120   : > { %2635 = vmatprep.subr.bf16.mxu1 %v3690_v62  ;;  %v509_v61 = vld [vmem:[%s4245_s12 + $0x638] sm:$0xff] }
 0x121   : > { %v569_v62 = vld [vmem:[%s4245_s12 + $0x818] sm:$0xff]  ;;  %v3810_v2 = vcombine.high %v505_v58, %v509_v61  ;;  %v3809_v8 = vcombine.low %v505_v58, %v509_v61  ;;  %v300_v58 = vld [vmem:[#allocation2 + $0x8] sm:$0xff] }
 0x122   : > { %2661 = vmatpush1.bf16.msra.mxu0 %v3753_v3  ;;  %v3874_v3 = vcombine.high %v569_v62, %v573_v63  ;;  %v3873_v9 = vcombine.low %v569_v62, %v573_v63  ;;  %v617_v43 = vld [vmem:[%s4245_s12 + $0x998] sm:$0xff] }
 0x123   : > { %2636 = vmatpush1.bf16.msra.mxu1 %v3689_v4  ;;  %2662 = vmatprep.subr.bf16.mxu0 %v3762_v5  ;;  %v513_v4 = vld [vmem:[%s4245_s12 + $0x658] sm:$0xff] }
 0x124   : > { %2637 = vmatprep.subr.bf16.mxu1 %v3698_v6  ;;  %v517_v5 = vld [vmem:[%s4245_s12 + $0x678] sm:$0xff] }
 0x125   : > { %v577_v6 = vld [vmem:[%s4245_s12 + $0x858] sm:$0xff]  ;;  %v3818_v24 = vcombine.high %v513_v4, %v517_v5  ;;  %v3817_v14 = vcombine.low %v513_v4, %v517_v5 }
 0x126   : > { %2663 = vmatpush1.bf16.msra.mxu0 %v3761_v10  ;;  %v3882_v10 = vcombine.high %v577_v6, %v581_v7  ;;  %v3881_v59 = vcombine.low %v577_v6, %v581_v7  ;;  %v621_v44 = vld [vmem:[%s4245_s12 + $0x9b8] sm:$0xff] }
 0x127   : > { %2638 = vmatpush1.bf16.msra.mxu1 %v3697_v11  ;;  %2664 = vmatprep.subr.bf16.mxu0 %v3770_v60  ;;  %v521_v11 = vld [vmem:[%s4245_s12 + $0x698] sm:$0xff]  ;;  %v3921_v5 = vcombine.low %v617_v43, %v621_v44 }
 0x128   : > { %2639 = vmatprep.subr.bf16.mxu1 %v3706_v12  ;;  %v525_v60 = vld [vmem:[%s4245_s12 + $0x6b8] sm:$0xff] }
 0x129   : > { %v585_v12 = vld [vmem:[%s4245_s12 + $0x898] sm:$0xff]  ;;  %v3826_v15 = vcombine.high %v521_v11, %v525_v60 }
 0x12a   : > { %2665 = vmatpush1.bf16.msra.mxu0 %v3769_v16  ;;  %v3890_v16 = vcombine.high %v585_v12, %v589_v13  ;;  %v3889_v23 = vcombine.low %v585_v12, %v589_v13  ;;  %v625_v62 = vld [vmem:[%s4245_s12 + $0x9d8] sm:$0xff] }
 0x12b   : > { %2640 = vmatpush1.bf16.msra.mxu1 %v3705_v18  ;;  %2666 = vmatprep.subr.bf16.mxu0 %v3778_v19  ;;  %v529_v18 = vld [vmem:[%s4245_s12 + $0x6d8] sm:$0xff] }
 0x12c   : > { %2641 = vmatprep.subr.bf16.mxu1 %v3714_v21  ;;  %v533_v19 = vld [vmem:[%s4245_s12 + $0x6f8] sm:$0xff] }
 0x12d   : > { %v593_v21 = vld [vmem:[%s4245_s12 + $0x8d8] sm:$0xff]  ;;  %v3834_v25 = vcombine.high %v529_v18, %v533_v19 }
 0x12e   : > { %2667 = vmatpush1.bf16.msra.mxu0 %v3777_v26  ;;  %v3898_v54 = vcombine.high %v593_v21, %v597_v22  ;;  %v537_v26 = vld [vmem:[%s4245_s12 + $0x718] sm:$0xff]  ;;  %v3897_v29 = vcombine.low %v593_v21, %v597_v22 }
 0x12f   : > { %2642 = vmatpush1.bf16.msra.mxu1 %v3713_v27  ;;  %2668 = vmatprep.subr.bf16.mxu0 %v3786_v55  ;;  %v541_v27 = vld [vmem:[%s4245_s12 + $0x738] sm:$0xff] }
 0x130   : > { %v2282_v37 = vpop.f32.mrb[0].mxu0  ;;  %2643 = vmatprep.subr.bf16.mxu1 %v3722_v28  ;;  %v601_v55 = vld [vmem:[%s4245_s12 + $0x918] sm:$0xff]  ;;  %v3842_v30 = vcombine.high %v537_v26, %v541_v27 }
 0x131   : > { %v2323_v41 = vpop.f32.mrb[0].mxu1  ;;  %v2284_v42 = vpop.f32.mrb[1].mxu0  ;;  %v605_v28 = vld [vmem:[%s4245_s12 + $0x938] sm:$0xff] }
 0x132   : > { %v4581_v45 = vadd.f32 %v2323_v41, %v2282_v37  ;;  %v2325_v46 = vpop.f32.mrb[1].mxu1  ;;  %v2286_v47 = vpop.f32.mrb[2].mxu0  ;;  %2669 = vmatpush1.bf16.msra.mxu0 %v3785_v34  ;;  %v3906_v31 = vcombine.high %v601_v55, %v605_v28  ;;  %v549_v34 = vld [vmem:[%s4245_s12 + $0x778] sm:$0xff]  ;;  %v3841_v37 = vcombine.low %v537_v26, %v541_v27 }
 0x133   : > { %v4583_v49 = vadd.f32 %v2325_v46, %v2284_v42  ;;  %v2327_v50 = vpop.f32.mrb[2].mxu1  ;;  %2644 = vmatpush1.bf16.msra.mxu1 %v3721_v35  ;;  %v2287_v51 = vpop.f32.mrb[3].mxu0  ;;  %2670 = vmatprep.subr.bf16.mxu0 %v3794_v36  ;;  %v609_v35 = vld [vmem:[%s4245_s12 + $0x958] sm:$0xff]  ;;  %v3850_v39 = vcombine.high %v545_v32, %v549_v34  ;;  %v3849_v46 = vcombine.low %v545_v32, %v549_v34 }
 0x134   : > { %v2328_v56 = vpop.f32.mrb[3].mxu1  ;;  %2645 = vmatprep.subr.bf16.mxu1 %v3730_v38  ;;  %v613_v36 = vld [vmem:[%s4245_s12 + $0x978] sm:$0xff]  ;;  %v3905_v38 = vcombine.low %v601_v55, %v605_v28  ;;  %v299_v50 = vld [vmem:[#allocation2] sm:$0xff] }
 0x135   : > { %v3914_v40 = vcombine.high %v609_v35, %v613_v36  ;;  %v553_v41 = vld [vmem:[%s4245_s12 + $0x798] sm:$0xff]  ;;  %v3913_v47 = vcombine.low %v609_v35, %v613_v36  ;;  %v303_v36 = vld [vmem:[#allocation2 + $0x20] sm:$0xff] }
 0x136   : > { %2671 = vmatpush1.bf16.msra.mxu0 %v3793_v48  ;;  %v557_v42 = vld [vmem:[%s4245_s12 + $0x7b8] sm:$0xff] }
 0x137   : > { %2646 = vmatpush1.bf16.msra.mxu1 %v3729_v52  ;;  %2672 = vmatprep.subr.bf16.mxu0 %v3802_v53  ;;  %v3858_v48 = vcombine.high %v553_v41, %v557_v42  ;;  %v3922_v52 = vcombine.high %v617_v43, %v621_v44  ;;  %v561_v53 = vld [vmem:[%s4245_s12 + $0x7d8] sm:$0xff] }
 0x138   : > { %2647 = vmatprep.subr.bf16.mxu1 %v3738_v57  ;;  %v565_v56 = vld [vmem:[%s4245_s12 + $0x7f8] sm:$0xff] }
 0x139   : > { %v629_v63 = vld [vmem:[%s4245_s12 + $0x9f8] sm:$0xff]  ;;  %v3866_v6 = vcombine.high %v561_v53, %v565_v56 }
 0x13a   : > { %2673 = vmatpush1.bf16.msra.mxu0 %v3801_v0  ;;  %v302_v22 = vld [vmem:[#allocation2 + $0x18] sm:$0xff] }
 0x13b   : > { %2648 = vmatpush1.bf16.msra.mxu1 %v3737_v1  ;;  %2674 = vmatprep.subr.bf16.mxu0 %v3810_v2  ;;  %v3857_v2 = vcombine.low %v553_v41, %v557_v42 }
 0x13c   : > { %2699 = vmatprep.subr.bf16.mxu1 %v3874_v3 }
 0x13e   : > { %2650 = vmatmul.mubr.bf16.vlgmr.msra.gmra.mrb[16].mxu1 %v4336_v17  ;;  %2675 = vmatpush1.bf16.msra.mxu0 %v3809_v8  ;;  %v3825_v17 = vcombine.low %v521_v11, %v525_v60  ;;  %v3930_v8 = vcombine.high %v625_v62, %v629_v63 }
 0x13f   : > { %2700 = vmatpush1.bf16.msra.mxu1 %v3873_v9  ;;  %2676 = vmatprep.subr.bf16.mxu0 %v3818_v24  ;;  %v4107_v9 = vld [vmem:[%s4240_s8 + $0x10] ss:$0 sps:$4 sm:$0xff]  }
 0x140   : > { %2701 = vmatprep.subr.bf16.mxu1 %v3882_v10  ;;  %2731 = vmatprep.mubr.bf16.mxu1 %v4182_v33  ;;  %v3833_v33 = vcombine.low %v529_v18, %v533_v19 }
 0x142   : > { %2677 = vmatpush1.bf16.msra.mxu0 %v3817_v14 }
 0x143   : > { %2702 = vmatpush1.bf16.msra.mxu1 %v3881_v59  ;;  %2678 = vmatprep.subr.bf16.mxu0 %v3826_v15  ;;  %v301_v15 = vld [vmem:[#allocation2 + $0x10] sm:$0xff] }
 0x144   : > { %2703 = vmatprep.subr.bf16.mxu1 %v3890_v16 }
 0x146   : > { %2679 = vmatpush1.bf16.msra.mxu0 %v3825_v17 }
 0x147   : > { %2704 = vmatpush1.bf16.msra.mxu1 %v3889_v23  ;;  %2680 = vmatprep.subr.bf16.mxu0 %v3834_v25 }
 0x148   : > { %2705 = vmatprep.subr.bf16.mxu1 %v3898_v54 }
 0x14a   : > { %2681 = vmatpush1.bf16.msra.mxu0 %v3833_v33 }
 0x14b   : > { %2706 = vmatpush1.bf16.msra.mxu1 %v3897_v29  ;;  %2682 = vmatprep.subr.bf16.mxu0 %v3842_v30 }
 0x14c   : > { %2707 = vmatprep.subr.bf16.mxu1 %v3906_v31 }
 0x14e   : > { %2683 = vmatpush1.bf16.msra.mxu0 %v3841_v37 }
 0x14f   : > { %2708 = vmatpush1.bf16.msra.mxu1 %v3905_v38  ;;  %2684 = vmatprep.subr.bf16.mxu0 %v3850_v39  ;;  %v304_v39 = vld [vmem:[#allocation2 + $0x28] sm:$0xff] }
 0x150   : > { %v2364_v51 = vpop.f32.mrb[4].mxu0  ;;  %2709 = vmatprep.subr.bf16.mxu1 %v3914_v40 }
 0x151   : > { %v2365_v57 = vadd.f32 %v2364_v51, %v4581_v45  ;;  %v2366_v61 = vpop.f32.mrb[5].mxu0  ;;  %v3865_v45 = vcombine.low %v561_v53, %v565_v56 }
 0x152   : > { %v2367_v0 = vadd.f32 %v2366_v61, %v4583_v49  ;;  %v2368_v1 = vpop.f32.mrb[6].mxu0  ;;  %2685 = vmatpush1.bf16.msra.mxu0 %v3849_v46  ;;  %v3929_v49 = vcombine.low %v625_v62, %v629_v63 }
 0x153   : > { %v2740_v3 = vadd.f32 %v2365_v57, %v299_v50  ;;  %2710 = vmatpush1.bf16.msra.mxu1 %v3913_v47  ;;  %v2369_v4 = vpop.f32.mrb[7].mxu0  ;;  %2686 = vmatprep.subr.bf16.mxu0 %v3858_v48  ;;  %v306_v1 = vld [vmem:[#allocation2 + $0x38] sm:$0xff] }
 0x154   : > { %v2741_v7 = vadd.f32 %v2367_v0, %v300_v58  ;;  %2711 = vmatprep.subr.bf16.mxu1 %v3922_v52  ;;  %v305_v58 = vld [vmem:[#allocation2 + $0x30] sm:$0xff] }
 0x155   : > { %2748 = vst [vmem:[#allocation2] sm:$0xff] %v2740_v3 }
 0x156   : > { %2749 = vst [vmem:[#allocation2 + $0x8] sm:$0xff] %v2741_v7  ;;  %2687 = vmatpush1.bf16.msra.mxu0 %v3857_v2 }
 0x157   : > { %2712 = vmatpush1.bf16.msra.mxu1 %v3921_v5  ;;  %2688 = vmatprep.subr.bf16.mxu0 %v3866_v6 }
 0x158   : > { %2713 = vmatprep.subr.bf16.mxu1 %v3930_v8  ;;  %v4109_v8 = vld [vmem:[%s4860_s3 + $0x40] sm:$0xff] (!%p3931_p6)  }
 0x15a   : > { %2689 = vmatpush1.bf16.msra.mxu0 %v3865_v45  ;;  %v4110_v45 = vld [vmem:[%s4860_s3 + $0xc0] sm:$0xff] (!%p3931_p6)  }
 0x15b   : > { %2714 = vmatpush1.bf16.msra.mxu1 %v3929_v49  ;;  %4000 = vmatprep.subr.bf16.mxu0 (!%p3931_p6), %v4109_v8  ;;  %v4111_v49 = vld [vmem:[%s4860_s3] sm:$0xff] (!%p3931_p6)   ;;  %v4146_v8 = vld [vmem:[%s4860_s3 + $0x1c8] sm:$0xff] (!%p3931_p6)  }
 0x15c   : > { %4022 = vmatprep.subr.bf16.mxu1 (!%p3931_p6), %v4110_v45  ;;  %v4147_v45 = vld [vmem:[%s4860_s3 + $0x108] sm:$0xff] (!%p3931_p6)  }
 0x15d   : > { %2691 = vmatmul.mubr.bf16.vlgmr.msra.gmra.mrb[20].mxu0 %v4342_v20 }
 0x15e   : > { %2732 = vmatmul.mubr.bf16.vlgmr.msra.gmra.mrb[20].mxu1 %v4107_v9  ;;  %v4112_v9 = vld [vmem:[%s4860_s3 + $0x80] sm:$0xff] (!%p3931_p6)   ;;  %4001 = vmatpush3.bf16.msra.mxu0 (!%p3931_p6), %v4111_v49  ;;  %v4148_v49 = vld [vmem:[%s4860_s3 + $0x188] sm:$0xff] (!%p3931_p6)  }
 0x15f   : > { %4023 = vmatpush3.bf16.msra.mxu1 (!%p3931_p6), %v4112_v9  ;;  %v4149_v9 = vld [vmem:[%s4860_s3 + $0x150] sm:$0xff] (!%p3931_p6)  }
 0x171   : > { %v2405_v24 = vpop.f32.mrb[4].mxu1 }
 0x172   : > { %v2407_v10 = vpop.f32.mrb[5].mxu1 }
 0x173   : > { %v2409_v11 = vpop.f32.mrb[6].mxu1 }
 0x174   : > { %v2410_v60 = vpop.f32.mrb[7].mxu1  ;;  %v4115_v11 = vld [vmem:[%s4860_s3 + $0x8] sm:$0xff] (!%p3931_p6)  }
 0x175   : > { %v4116_v60 = vld [vmem:[%s4860_s3 + $0x88] sm:$0xff] (!%p3931_p6)  }
 0x190   : > { %v2446_v12 = vpop.f32.mrb[8].mxu0 }
 0x191   : > { %v2447_v13 = vadd.f32 %v2446_v12, %v2405_v24  ;;  %v2487_v14 = vpop.f32.mrb[8].mxu1  ;;  %v2448_v59 = vpop.f32.mrb[9].mxu0  ;;  %v4113_v24 = vld [vmem:[%s4860_s3 + $0x48] sm:$0xff] (!%p3931_p6)   ;;  %v4117_v12 = vld [vmem:[%s4860_s3 + $0x50] sm:$0xff] (!%p3931_p6)  }
 0x192   : > { %v2449_v16 = vadd.f32 %v2448_v59, %v2407_v10  ;;  %v2489_v18 = vpop.f32.mrb[9].mxu1  ;;  %v2450_v19 = vpop.f32.mrb[10].mxu0  ;;  %v4114_v10 = vld [vmem:[%s4860_s3 + $0xc8] sm:$0xff] (!%p3931_p6)   ;;  %4002 = vmatprep.subr.bf16.mxu0 (!%p3931_p6), %v4113_v24  ;;  %v4120_v59 = vld [vmem:[%s4860_s3 + $0x90] sm:$0xff] (!%p3931_p6)  }
 0x193   : > { %v2488_v21 = vadd.f32 %v2487_v14, %v2447_v13  ;;  %v2491_v17 = vpop.f32.mrb[10].mxu1  ;;  %v2451_v23 = vpop.f32.mrb[11].mxu0  ;;  %4024 = vmatprep.subr.bf16.mxu1 (!%p3931_p6), %v4114_v10  ;;  %4003 = vmatpush3.bf16.msra.mxu0 (!%p3931_p6), %v4115_v11  ;;  %v4118_v13 = vld [vmem:[%s4860_s3 + $0xd0] sm:$0xff] (!%p3931_p6)   ;;  %v4124_v19 = vld [vmem:[%s4860_s3 + $0x98] sm:$0xff] (!%p3931_p6)  }
 0x194   : > { %v2490_v25 = vadd.f32 %v2489_v18, %v2449_v16  ;;  %v2492_v20 = vpop.f32.mrb[11].mxu1  ;;  %4025 = vmatpush3.bf16.msra.mxu1 (!%p3931_p6), %v4116_v60  ;;  %4004 = vmatprep.subr.bf16.mxu0 (!%p3931_p6), %v4117_v12  ;;  %v4119_v14 = vld [vmem:[%s4860_s3 + $0x10] sm:$0xff] (!%p3931_p6)   ;;  %v4122_v16 = vld [vmem:[%s4860_s3 + $0xd8] sm:$0xff] (!%p3931_p6)   ;;  %v4127_v17 = vld [vmem:[%s4860_s3 + $0x20] sm:$0xff] (!%p3931_p6)   ;;  %v2770_v23 = vlaneseq (!%p3931_p6) }
 0x195   : > { %v2742_v54 = vadd.f32 %v2488_v21, %v301_v15  ;;  %4026 = vmatprep.subr.bf16.mxu1 (!%p3931_p6), %v4118_v13  ;;  %v4121_v15 = vld [vmem:[%s4860_s3 + $0x58] sm:$0xff] (!%p3931_p6)   ;;  %v4125_v21 = vld [vmem:[%s4860_s3 + $0x60] sm:$0xff] (!%p3931_p6)   ;;  %v4129_v20 = vld [vmem:[%s4860_s3 + $0x68] sm:$0xff] (!%p3931_p6)  }
 0x196   : > { %v2743_v26 = vadd.f32 %v2490_v25, %v302_v22  ;;  %v4123_v18 = vld [vmem:[%s4860_s3 + $0x18] sm:$0xff] (!%p3931_p6)   ;;  %v4126_v22 = vld [vmem:[%s4860_s3 + $0xe0] sm:$0xff] (!%p3931_p6)   ;;  %v4150_v24 = vld [vmem:[%s4860_s3 + $0x1d0] sm:$0xff] (!%p3931_p6)  }
 0x197   : > { %2750 = vst [vmem:[#allocation2 + $0x10] sm:$0xff] %v2742_v54  ;;  %4005 = vmatpush3.bf16.msra.mxu0 (!%p3931_p6), %v4119_v14  ;;  %v4128_v25 = vld [vmem:[%s4860_s3 + $0xa0] sm:$0xff] (!%p3931_p6)   ;;  %v4130_v54 = vld [vmem:[%s4860_s3 + $0xe8] sm:$0xff] (!%p3931_p6)   ;;  %v4151_v10 = vld [vmem:[%s4860_s3 + $0x110] sm:$0xff] (!%p3931_p6)  }
 0x198   : > { %2751 = vst [vmem:[#allocation2 + $0x18] sm:$0xff] %v2743_v26  ;;  %4027 = vmatpush3.bf16.msra.mxu1 (!%p3931_p6), %v4120_v59  ;;  %4006 = vmatprep.subr.bf16.mxu0 (!%p3931_p6), %v4121_v15  ;;  %v4131_v26 = vld [vmem:[%s4860_s3 + $0x28] sm:$0xff] (!%p3931_p6)   ;;  %v4152_v11 = vld [vmem:[%s4860_s3 + $0x190] sm:$0xff] (!%p3931_p6)   ;;  %v4153_v60 = vld [vmem:[%s4860_s3 + $0x158] sm:$0xff] (!%p3931_p6)  }
 0x199   : > { %4028 = vmatprep.subr.bf16.mxu1 (!%p3931_p6), %v4122_v16  ;;  %v4154_v12 = vld [vmem:[%s4860_s3 + $0x1d8] sm:$0xff] (!%p3931_p6)   ;;  %v4157_v59 = vld [vmem:[%s4860_s3 + $0x160] sm:$0xff] (!%p3931_p6)  }
 0x19a   : > { %v4155_v13 = vld [vmem:[%s4860_s3 + $0x118] sm:$0xff] (!%p3931_p6)   ;;  %v4158_v15 = vld [vmem:[%s4860_s3 + $0x1e0] sm:$0xff] (!%p3931_p6)  }
 0x19b   : > { %4007 = vmatpush3.bf16.msra.mxu0 (!%p3931_p6), %v4123_v18  ;;  %v4156_v14 = vld [vmem:[%s4860_s3 + $0x198] sm:$0xff] (!%p3931_p6)   ;;  %v4159_v16 = vld [vmem:[%s4860_s3 + $0x120] sm:$0xff] (!%p3931_p6)  }
 0x19c   : > { %4029 = vmatpush3.bf16.msra.mxu1 (!%p3931_p6), %v4124_v19  ;;  %4008 = vmatprep.subr.bf16.mxu0 (!%p3931_p6), %v4125_v21  ;;  %v4160_v18 = vld [vmem:[%s4860_s3 + $0x1a0] sm:$0xff] (!%p3931_p6)   ;;  %v4161_v19 = vld [vmem:[%s4860_s3 + $0x168] sm:$0xff] (!%p3931_p6)  }
 0x19d   : > { %4030 = vmatprep.subr.bf16.mxu1 (!%p3931_p6), %v4126_v22  ;;  %v4162_v21 = vld [vmem:[%s4860_s3 + $0x1e8] sm:$0xff] (!%p3931_p6)  }
 0x19e   : > { %v4163_v22 = vld [vmem:[%s4860_s3 + $0x128] sm:$0xff] (!%p3931_p6)  }
 0x19f   : > { %4009 = vmatpush3.bf16.msra.mxu0 (!%p3931_p6), %v4127_v17 }
 0x1a0   : > { %4031 = vmatpush3.bf16.msra.mxu1 (!%p3931_p6), %v4128_v25  ;;  %4010 = vmatprep.subr.bf16.mxu0 (!%p3931_p6), %v4129_v20  ;;  %v4164_v25 = vld [vmem:[%s4860_s3 + $0x1a8] sm:$0xff] (!%p3931_p6)  }
 0x1a1   : > { %4032 = vmatprep.subr.bf16.mxu1 (!%p3931_p6), %v4130_v54  ;;  %v4165_v54 = vld [vmem:[%s4860_s3 + $0x170] sm:$0xff] (!%p3931_p6)  }
 0x1a3   : > { %4011 = vmatpush3.bf16.msra.mxu0 (!%p3931_p6), %v4131_v26 }
 0x1d0   : > { %v2528_v27 = vpop.f32.mrb[12].mxu0 }
 0x1d1   : > { %v2569_v55 = vpop.f32.mrb[12].mxu1  ;;  %v2530_v28 = vpop.f32.mrb[13].mxu0 }
 0x1d2   : > { %v2570_v33 = vadd.f32 %v2569_v55, %v2528_v27  ;;  %v2571_v29 = vpop.f32.mrb[13].mxu1  ;;  %v2532_v30 = vpop.f32.mrb[14].mxu0  ;;  %v4694_v27 = vshrl.u32 (!%p3931_p6), %v2770_v23, 7  ;;  %v4132_v55 = vld [vmem:[%s4860_s3 + $0xa8] sm:$0xff] (!%p3931_p6)  }
 0x1d3   : > { %v2572_v31 = vadd.f32 %v2571_v29, %v2530_v28  ;;  %v2573_v32 = vpop.f32.mrb[14].mxu1  ;;  %v2533_v34 = vpop.f32.mrb[15].mxu0  ;;  %v4133_v28 = vld [vmem:[%s4860_s3 + $0x70] sm:$0xff] (!%p3931_p6)   ;;  %4033 = vmatpush3.bf16.msra.mxu1 (!%p3931_p6), %v4132_v55 }
 0x1d4   : > { %v2574_v35 = vpop.f32.mrb[15].mxu1  ;;  %4012 = vmatprep.subr.bf16.mxu0 (!%p3931_p6), %v4133_v28  ;;  %v4135_v29 = vld [vmem:[%s4860_s3 + $0x30] sm:$0xff] (!%p3931_p6)   ;;  %v2776_v30 = vsub.s32 (!%p3931_p6), 1, %v4694_v27  ;;  %v2784_v32 = vsub.s32 (!%p3931_p6), 3, %v4694_v27  ;;  %v4137_v34 = vld [vmem:[%s4860_s3 + $0x78] sm:$0xff] (!%p3931_p6)   ;;  %v2792_v17 = vsub.s32 (!%p3931_p6), 5, %v4694_v27 }
 0x1d5   : > { %4013 = vmatpush3.bf16.msra.mxu0 (!%p3931_p6), %v4135_v29  ;;  %v2772_v35 = vsub.s32 (!%p3931_p6), 0, %v4694_v27  ;;  %v2800_v20 = vsub.s32 (!%p3931_p6), 7, %v4694_v27  ;;  %v2788_v26 = vsub.s32 (!%p3931_p6), 4, %v4694_v27  ;;  %v4166_v55 = vld [vmem:[%s4860_s3 + $0x1f0] sm:$0xff] (!%p3931_p6)   ;;  %v2796_v28 = vsub.s32 (!%p3931_p6), 6, %v4694_v27 }
 0x1d6   : > { %4014 = vmatprep.subr.bf16.mxu0 (!%p3931_p6), %v4137_v34  ;;  %v4168_v29 = vld [vmem:[%s4860_s3 + $0x1b0] sm:$0xff] (!%p3931_p6)   ;;  %v4170_v34 = vld [vmem:[%s4860_s3 + $0x1f8] sm:$0xff] (!%p3931_p6)   ;;  %vm3517_vm0 = vcmp.lt.s32.totalorder (!%p3931_p6), %v4694_v27, 2 }
 0x1f0   : > { %v2610_v37 = vpop.f32.mrb[16].mxu0 }
 0x1f1   : > { %v2611_v38 = vadd.f32 %v2610_v37, %v2570_v33  ;;  %v2612_v40 = vpop.f32.mrb[17].mxu0  ;;  %v4134_v33 = vld [vmem:[%s4860_s3 + $0xf0] sm:$0xff] (!%p3931_p6)   ;;  %v2780_v37 = vsub.s32 (!%p3931_p6), 2, %v4694_v27 }
 0x1f2   : > { %v2613_v41 = vadd.f32 %v2612_v40, %v2572_v31  ;;  %v2614_v42 = vpop.f32.mrb[18].mxu0  ;;  %4034 = vmatprep.subr.bf16.mxu1 (!%p3931_p6), %v4134_v33  ;;  %v4136_v31 = vld [vmem:[%s4860_s3 + $0xb0] sm:$0xff] (!%p3931_p6)   ;;  %v2761_v40 = vld [vmem:[#allocation2 + $0x8] sm:$0xff] (!%p3931_p6) }
 0x1f3   : > { %v2744_v43 = vadd.f32 %v2611_v38, %v303_v36  ;;  %v2615_v44 = vpop.f32.mrb[19].mxu0  ;;  %4035 = vmatpush3.bf16.msra.mxu1 (!%p3931_p6), %v4136_v31  ;;  %v4138_v36 = vld [vmem:[%s4860_s3 + $0xf8] sm:$0xff] (!%p3931_p6)   ;;  %v4167_v33 = vld [vmem:[%s4860_s3 + $0x130] sm:$0xff] (!%p3931_p6)  }
 0x1f4   : > { %v2745_v46 = vadd.f32 %v2613_v41, %v304_v39  ;;  %v4139_v38 = vld [vmem:[%s4860_s3 + $0x38] sm:$0xff] (!%p3931_p6)   ;;  %4036 = vmatprep.subr.bf16.mxu1 (!%p3931_p6), %v4138_v36  ;;  %v4730_v41 = vld [vmem:[%s4859_s2] sm:$0xff] (!%p3931_p6) }
 0x1f5   : > { %2752 = vst [vmem:[#allocation2 + $0x20] sm:$0xff] %v2744_v43  ;;  %v4140_v39 = vld [vmem:[%s4860_s3 + $0xb8] sm:$0xff] (!%p3931_p6)   ;;  %4015 = vmatpush3.bf16.msra.mxu0 (!%p3931_p6), %v4139_v38  ;;  %v2777_v43 = vrot.slane (!%p3931_p6), %v4730_v41, %v2776_v30  ;;  %v2785_v44 = vrot.slane (!%p3931_p6), %v4730_v41, %v2784_v32  ;;  %v2793_v31 = vrot.slane (!%p3931_p6), %v4730_v41, %v2792_v17 }
 0x1f6   : > { %2753 = vst [vmem:[#allocation2 + $0x28] sm:$0xff] %v2745_v46  ;;  %v2763_v42 = vld [vmem:[#allocation2 + $0x18] sm:$0xff] (!%p3931_p6)  ;;  %v2760_v46 = vld [vmem:[#allocation2] sm:$0xff] (!%p3931_p6)  ;;  %v2801_v32 = vrot.slane (!%p3931_p6), %v4730_v41, %v2800_v20  ;;  %v2797_v36 = vrot.slane (!%p3931_p6), %v4730_v41, %v2796_v28 }
 0x1f7   : > { %4037 = vmatpush3.bf16.msra.mxu1 (!%p3931_p6), %v4140_v39  ;;  %v4169_v30 = vld [vmem:[%s4860_s3 + $0x178] sm:$0xff] (!%p3931_p6)  }
 0x1fd   : > { %v2765_v38 = vld [vmem:[#allocation2 + $0x28] sm:$0xff] (!%p3931_p6) }
 0x211   : > { %v2651_v47 = vpop.f32.mrb[16].mxu1 }
 0x212   : > { %v2653_v48 = vpop.f32.mrb[17].mxu1 }
 0x213   : > { %v2655_v50 = vpop.f32.mrb[18].mxu1 }
 0x214   : > { %v2656_v51 = vpop.f32.mrb[19].mxu1  ;;  %v2781_v50 = vrot.slane (!%p3931_p6), %v4730_v41, %v2780_v37  ;;  %v4171_v37 = vld [vmem:[%s4860_s3 + $0x138] sm:$0xff] (!%p3931_p6)  }
 0x215   : > { %v4141_v51 = vld [vmem:[%s4860_s3 + $0x140] sm:$0xff] (!%p3931_p6)  }
 0x216   : > { %4044 = vmatprep.subr.bf16.mxu0 (!%p3931_p6), %v4141_v51 }
 0x230   : > { %v2692_v52 = vpop.f32.mrb[20].mxu0 }
 0x231   : > { %v2693_v53 = vadd.f32 %v2692_v52, %v2651_v47  ;;  %v2733_v56 = vpop.f32.mrb[20].mxu1  ;;  %v2694_v57 = vpop.f32.mrb[21].mxu0  ;;  %v2773_v47 = vrot.slane (!%p3931_p6), %v4730_v41, %v2772_v35  ;;  %v2811_v52 = vadd.f32 (!%p3931_p6), %v2777_v43, %v2761_v40  ;;  %v2789_v35 = vrot.slane (!%p3931_p6), %v4730_v41, %v2788_v26  ;;  %v4172_v40 = vld [vmem:[%s4860_s3 + $0x1b8] sm:$0xff] (!%p3931_p6)  }
 0x232   : > { %v2695_v61 = vadd.f32 %v2694_v57, %v2653_v48  ;;  %v2735_v62 = vpop.f32.mrb[21].mxu1  ;;  %v2696_v63 = vpop.f32.mrb[22].mxu0  ;;  %2759 = sbr.rel (%p3931_p6) target bundleno = 1033 (0x409), region = 48  ;;  %v2762_v48 = vld [vmem:[#allocation2 + $0x10] sm:$0xff] (!%p3931_p6) }
 0x233   : > { %v2734_v0 = vadd.f32 %v2733_v56, %v2693_v53  ;;  %v2737_v2 = vpop.f32.mrb[22].mxu1  ;;  %v2697_v3 = vpop.f32.mrb[23].mxu0  ;;  %v2813_v53 = vadd.f32 (!%p3931_p6), %v2785_v44, %v2763_v42  ;;  %v2810_v56 = vadd.f32 (!%p3931_p6), %v2773_v47, %v2760_v46  ;;  %v2812_v57 = vadd.f32 (!%p3931_p6), %v2781_v50, %v2762_v48  ;;  %v2764_v44 = vld [vmem:[#allocation2 + $0x20] sm:$0xff] (!%p3931_p6) }
 0x234   : > { %v2736_v4 = vadd.f32 %v2735_v62, %v2695_v61  ;;  %v2738_v5 = vpop.f32.mrb[23].mxu1  ;;  %v2819_v61 = vmax.f32 (!%p3931_p6), %v2811_v52, 0.0  ;;  %v4144_v2 = vld [vmem:[%s4860_s3 + $0x180] sm:$0xff] (!%p3931_p6)   ;;  %v2815_v42 = vadd.f32 (!%p3931_p6), %v2793_v31, %v2765_v38  ;;  %v2814_v47 = vadd.f32 (!%p3931_p6), %v2789_v35, %v2764_v44 }
 0x235   : > { %v2746_v6 = vadd.f32 %v2734_v0, %v305_v58  ;;  %v4142_v58 = vld [vmem:[%s4860_s3 + $0x1c0] sm:$0xff] (!%p3931_p6)   ;;  %v2821_v62 = vmax.f32 (!%p3931_p6), %v2813_v53, 0.0  ;;  %v2818_v63 = vmax.f32 (!%p3931_p6), %v2810_v56, 0.0  ;;  %v2820_v0 = vmax.f32 (!%p3931_p6), %v2812_v57, 0.0 }
 0x236   : > { %v2747_v7 = vadd.f32 %v2736_v4, %v306_v1  ;;  %4066 = vmatprep.subr.bf16.mxu1 (!%p3931_p6), %v4142_v58  ;;  %v4143_v1 = vld [vmem:[%s4860_s3 + $0x100] sm:$0xff] (!%p3931_p6)   ;;  %v2827_v3 = vpack.c.bf16 (!%p3931_p6), %v2819_v61, %v2819_v61  ;;  %v2823_v48 = vmax.f32 (!%p3931_p6), %v2815_v42, 0.0  ;;  %v2822_v51 = vmax.f32 (!%p3931_p6), %v2814_v47, 0.0 }
 0x237   : > { %2754 = vst [vmem:[#allocation2 + $0x30] sm:$0xff] %v2746_v6  ;;  %v2829_v4 = vpack.c.bf16 (!%p3931_p6), %v2821_v62, %v2821_v62  ;;  %v2826_v5 = vpack.c.bf16 (!%p3931_p6), %v2818_v63, %v2818_v63  ;;  %v2828_v6 = vpack.c.bf16 (!%p3931_p6), %v2820_v0, %v2820_v0  ;;  %v4183_v61 = vmov (!%p3931_p6), 127   ;;  %v3932_v0 = vld [vmem:[%s4861_s4] ss:$0 sm:$0xff] (!%p3931_p6) }
 0x238   : > { %2755 = vst [vmem:[#allocation2 + $0x38] sm:$0xff] %v2747_v7  ;;  %v4145_v7 = vld [vmem:[%s4860_s3 + $0x148] sm:$0xff] (!%p3931_p6)   ;;  %3385 = vmatprep.mubr.bf16.mxu0 (!%p3931_p6), %v2827_v3  ;;  %v2831_v53 = vpack.c.bf16 (!%p3931_p6), %v2823_v48, %v2823_v48  ;;  %v2830_v57 = vpack.c.bf16 (!%p3931_p6), %v2822_v51, %v2822_v51  ;;  %4108 = vset.pattern.permute.xlu0 (!%p3931_p6), %v4183_v61 }
 0x239   : > { %3425 = vmatprep.mubr.bf16.mxu1 %v2829_v4  ;;  %3386 = vmatmul.mubr.bf16.vlgmr.msra.gmra.mrb[0].mxu0 %v2826_v5 }
 0x23a   : > { %3426 = vmatmul.mubr.bf16.vlgmr.msra.gmra.mrb[0].mxu1 %v2828_v6  ;;  %4045 = vmatpush3.bf16.msra.mxu0 %v4143_v1 }
 0x23b   : > { %4067 = vmatpush3.bf16.msra.mxu1 %v4144_v2  ;;  %4046 = vmatprep.subr.bf16.mxu0 %v4145_v7 }
 0x23c   : > { %4068 = vmatprep.subr.bf16.mxu1 %v4146_v8  ;;  %3465 = vmatprep.mubr.bf16.mxu0 %v2831_v53 }
 0x23e   : > { %4047 = vmatpush3.bf16.msra.mxu0 %v4147_v45  ;;  %v2766_v46 = vld [vmem:[#allocation2 + $0x30] sm:$0xff] }
 0x23f   : > { %4069 = vmatpush3.bf16.msra.mxu1 %v4148_v49  ;;  %4048 = vmatprep.subr.bf16.mxu0 %v4149_v9  ;;  %v2767_v39 = vld [vmem:[#allocation2 + $0x38] sm:$0xff]  ;;  %v2816_v41 = vadd.f32 %v2797_v36, %v2766_v46  ;;  %v3516_v9 = vand.u32 127, %v2770_v23 }
 0x240   : > { %4070 = vmatprep.subr.bf16.mxu1 %v4150_v24  ;;  %v2817_v43 = vadd.f32 %v2801_v32, %v2767_v39 }
 0x241   : > { %v2824_v52 = vmax.f32 %v2816_v41, 0.0  ;;  %vm3518_vm1 = vcmp.lt.s32.totalorder %v3516_v9, 6 }
 0x242   : > { %4049 = vmatpush3.bf16.msra.mxu0 %v4151_v10  ;;  %v2825_v50 = vmax.f32 %v2817_v43, 0.0  ;;  %vm3519_vm2 = vmand %vm3517_vm0, %vm3518_vm1 }
 0x243   : > { %4071 = vmatpush3.bf16.msra.mxu1 %v4152_v11  ;;  %4050 = vmatprep.subr.bf16.mxu0 %v4153_v60  ;;  %v2832_v58 = vpack.c.bf16 %v2824_v52, %v2824_v52 }
 0x244   : > { %4072 = vmatprep.subr.bf16.mxu1 %v4154_v12  ;;  %v2833_v56 = vpack.c.bf16 %v2825_v50, %v2825_v50 }
 0x246   : > { %4051 = vmatpush3.bf16.msra.mxu0 %v4155_v13  ;;  %3505 = vmatprep.mubr.bf16.mxu1 %v2833_v56 }
 0x247   : > { %4073 = vmatpush3.bf16.msra.mxu1 %v4156_v14  ;;  %4052 = vmatprep.subr.bf16.mxu0 %v4157_v59 }
 0x248   : > { %4074 = vmatprep.subr.bf16.mxu1 %v4158_v15 }
 0x24a   : > { %4053 = vmatpush3.bf16.msra.mxu0 %v4159_v16 }
 0x24b   : > { %4075 = vmatpush3.bf16.msra.mxu1 %v4160_v18  ;;  %4054 = vmatprep.subr.bf16.mxu0 %v4161_v19 }
 0x24c   : > { %4076 = vmatprep.subr.bf16.mxu1 %v4162_v21 }
 0x24e   : > { %4055 = vmatpush3.bf16.msra.mxu0 %v4163_v22 }
 0x24f   : > { %4077 = vmatpush3.bf16.msra.mxu1 %v4164_v25  ;;  %4056 = vmatprep.subr.bf16.mxu0 %v4165_v54 }
 0x250   : > { %4078 = vmatprep.subr.bf16.mxu1 %v4166_v55 }
 0x252   : > { %4057 = vmatpush3.bf16.msra.mxu0 %v4167_v33 }
 0x253   : > { %4079 = vmatpush3.bf16.msra.mxu1 %v4168_v29  ;;  %4058 = vmatprep.subr.bf16.mxu0 %v4169_v30 }
 0x254   : > { %4080 = vmatprep.subr.bf16.mxu1 %v4170_v34 }
 0x256   : > { %4059 = vmatpush3.bf16.msra.mxu0 %v4171_v37 }
 0x257   : > { %4081 = vmatpush3.bf16.msra.mxu1 %v4172_v40 }
 0x259   : > { %3466 = vmatmul.mubr.bf16.vlgmr.msra.gmra.mrb[4].mxu0 %v2830_v57 }
 0x25a   : > { %3506 = vmatmul.mubr.bf16.vlgmr.msra.gmra.mrb[4].mxu1 %v2832_v58 }
 0x30c   : > { %v4016_v62 = vpop.f32.mrb[0].mxu0 }
 0x30d   : > { %v4038_v63 = vpop.f32.mrb[0].mxu1  ;;  %v4017_v1 = vpop.f32.mrb[1].mxu0 }
 0x30e   : > { %v4039_v2 = vpop.f32.mrb[1].mxu1  ;;  %v4018_v3 = vadd.f32 %v4017_v1, %v4016_v62  ;;  %v4019_v5 = vpop.f32.mrb[2].mxu0 }
 0x30f   : > { %v4040_v4 = vadd.f32 %v4039_v2, %v4038_v63  ;;  %v4041_v6 = vpop.f32.mrb[2].mxu1  ;;  %v4020_v7 = vpop.f32.mrb[3].mxu0 }
 0x310   : > { %v4042_v8 = vpop.f32.mrb[3].mxu1  ;;  %v3388_v45 = vadd.f32 %v4018_v3, %v3932_v0 }
 0x312   : > { %v3428_v49 = vadd.f32 %v4040_v4, %v3388_v45 }
 0x32c   : > { %v4060_v24 = vpop.f32.mrb[4].mxu0 }
 0x32d   : > { %v4082_v10 = vpop.f32.mrb[4].mxu1  ;;  %v4061_v11 = vpop.f32.mrb[5].mxu0 }
 0x32e   : > { %v4083_v60 = vpop.f32.mrb[5].mxu1  ;;  %v4062_v12 = vadd.f32 %v4061_v11, %v4060_v24  ;;  %v4063_v14 = vpop.f32.mrb[6].mxu0 }
 0x32f   : > { %v4084_v13 = vadd.f32 %v4083_v60, %v4082_v10  ;;  %v4085_v59 = vpop.f32.mrb[6].mxu1  ;;  %v4064_v15 = vpop.f32.mrb[7].mxu0 }
 0x330   : > { %v4086_v16 = vpop.f32.mrb[7].mxu1  ;;  %v3468_v18 = vadd.f32 %v4062_v12, %v3428_v49 }
 0x332   : > { %v3508_v19 = vadd.f32 %v4084_v13, %v3468_v18 }
 0x334   : > { %3544 = vst [vmem:[%s4863_s6] sm:$0xff] %v3508_v19  ;;  %3539 = vrot.lane.b32.xlu1 %v3508_v19, %s4184_s15  ;;  %v3520_v23 = vsel %vm3519_vm2, %v3508_v19, 0.0 }
 0x335   : > { %3521 = vadd.xlane.f32.xlu0 %v3520_v23 }
 0x34b   : > { %3535 = vperm.xlu0 %4108, %v3508_v19  }
 0x3a6   : > { %v3540_v21 = vpop.permute.xlu1 %3539 }
 0x3a7   : > { %3543 = vst.msk [vmem:[%s4862_s5] sm:$0xff] %vm3542_vm3, %v3540_v21 }
 0x3c2   : > { %v3522_v27 = vpop.xlane.xlu0 %3521 }
 0x3c3   : > { %v3523_v22 = vrot.slane %v3522_v27, 4 }
 0x3c5   : > { %v3524_v17 = vadd.f32 %v3523_v22, %v3522_v27 }
 0x3c7   : > { %v3525_v25 = vrot.slane %v3524_v17, 2 }
 0x3c9   : > { %v3526_v20 = vadd.f32 %v3525_v25, %v3524_v17 }
 0x3ca   : > { %v3536_v33 = vpop.permute.xlu0 %3535 }
 0x3cb   : > { %v3527_v54 = vrot.slane %v3526_v20, 1 }
 0x3cd   : > { %v3528_v26 = vadd.f32 %v3527_v54, %v3526_v20 }
 0x3cf   : > { %4088 = vpush %v3528_v26 }
 0x400   : > { %s4089_s18 = spop %4088 }
 0x401   : > { %s3530_s19 = smul.f32 0.16666667, %s4089_s18 }
 0x403   : > { %v3531_v55 = vstv %s3530_s19 }
 0x404   : > { %v3532_v28 = vsub.f32 %v3508_v19, %v3531_v55 }
 0x406   : > { %v3538_v29 = vadd.f32 %v3536_v33, %v3532_v28 }
 0x408   : > { %3545 = vst [vmem:[%s4864_s7] sm:$0xff] %v3538_v29 }
 0x409 PF: > { %s18_s24 = sadd.s32 1, %s4179_s24  }
 0x40a   : > { %p15_p7 = scmp.ge.s32.totalorder %s18_s24, 7  }
 0x40c   :  { %17 = sbr.rel (!%p15_p7) target bundleno = 1 (0x1), region = 93 }

</bundles_post_ra>
